<compile_context>
chip_gen: v7x
topology: tpu7x:2x2x1
jax: 0.10.0
libtpu: 0.0.40
codegen_flags: <defaults>
</compile_context>

<pallas_src>
import functools

import jax
import jax.numpy as jnp
from jax.experimental import pallas as pl
from jax.experimental.pallas import tpu as pltpu


def _critic_encoder_kernel(x_ref, wq_ref, wk_ref, bq_ref, bk_ref,
                           w_ih_ref, w_hh_ref, b_ref, ow_ref, ob_ref,
                           out_ref, h_buf, *, num_heads, lstm_layers):
    B, S, E = x_ref.shape                     # B = batch tile
    hd = E // num_heads
    scale = 1.0 / (hd ** 0.5)

    x = x_ref[...]                            # (B, S, E)
    x2d = x.reshape(B * S, E)                 # row = b*S + s

    # causal additive mask built in-kernel (no HBM DMA / VMEM input buffer)
    row = jax.lax.broadcasted_iota(jnp.int32, (S, S), 0)
    col = jax.lax.broadcasted_iota(jnp.int32, (S, S), 1)
    neg_mask = jnp.where(col > row, -1e9, 0.0).astype(jnp.float32)   # (S, S)

    # ---- multi-head self-attention: only the (head-averaged) weights are used ----
    w_sum = jnp.zeros((B, S, S), jnp.float32)
    for h in range(num_heads):                # static unroll over heads
        # slice the *weight/bias refs* per head (free leading-axis views)
        qh = (jnp.dot(x2d, wq_ref[h], preferred_element_type=jnp.float32)
              + bq_ref[h]).reshape(B, S, hd)
        kh = (jnp.dot(x2d, wk_ref[h], preferred_element_type=jnp.float32)
              + bk_ref[h]).reshape(B, S, hd)
        s = jnp.einsum("bqd,bkd->bqk", qh, kh,
                       preferred_element_type=jnp.float32) * scale
        s = s + neg_mask[None, :, :]
        m = jnp.max(s, axis=-1, keepdims=True)
        e = jnp.exp(s - m)
        denom = jnp.sum(e, axis=-1, keepdims=True)
        w_sum = w_sum + e * pl.reciprocal(denom, approx=True)   # softmax (EUP divide)

    # weighted sum; fold the 1/num_heads head-average into the (B,S,E) result
    attn = jnp.einsum("bqk,bkd->bqd", w_sum, x,
                      preferred_element_type=jnp.float32) * (1.0 / num_heads)

    # ---- stacked LSTM (hidden == input == E), h0 = c0 = 0, batched over B ----
    lstm_in2d = attn.reshape(B * S, E)        # row = b*S + s
    for layer in range(lstm_layers):
        # Hoisted input projection: one (B*S,E)@(E,E) matmul per gate for the
        # whole sequence; gate weights are pre-split so each gate output is
        # lane-aligned at offset 0 (no sub-128-lane slices on the serial path).
        gx = []
        for g in range(4):
            gxg = (jnp.dot(lstm_in2d, w_ih_ref[layer, g],
                           preferred_element_type=jnp.float32)
                   + b_ref[layer, g]).reshape(B, S, E)
            gx.append(gxg)
        gx_i, gx_f, gx_g, gx_o = gx

        whh_i = w_hh_ref[layer, 0]            # (E, E) loads hoisted out of the loop
        whh_f = w_hh_ref[layer, 1]
        whh_g = w_hh_ref[layer, 2]
        whh_o = w_hh_ref[layer, 3]

        h = jnp.zeros((B, E), jnp.float32)
        c = jnp.zeros((B, E), jnp.float32)
        for t in range(S):                    # serial recurrence (static unroll)
            i_g = jax.nn.sigmoid(gx_i[:, t, :] +
                                 jnp.dot(h, whh_i, preferred_element_type=jnp.float32))
            f_g = jax.nn.sigmoid(gx_f[:, t, :] +
                                 jnp.dot(h, whh_f, preferred_element_type=jnp.float32))
            g_g = jnp.tanh(gx_g[:, t, :] +
                           jnp.dot(h, whh_g, preferred_element_type=jnp.float32))
            o_g = jax.nn.sigmoid(gx_o[:, t, :] +
                                 jnp.dot(h, whh_o, preferred_element_type=jnp.float32))
            c = f_g * c + i_g * g_g
            h = o_g * jnp.tanh(c)
            h_buf[:, t, :] = h                # per-step write to VMEM scratch
        lstm_in2d = h_buf[...].reshape(B * S, E)

    # ---- output linear E -> 1, emitted as a lane-dense (B, S) slab ----
    y = jnp.sum(h_buf[...] * ow_ref[...][None, :, :], axis=-1)    # (B, S)
    out_ref[...] = y + ob_ref[...]


def critic_encoder_forward(x, params, *, num_heads, lstm_layers):
    B, S, E = x.shape
    hd = E // num_heads
    L = lstm_layers

    # whole batch (or chunks of up to 8 to fill sublanes) per kernel invocation
    BT = B if B <= 8 else 8
    assert B % BT == 0, "pad batch to a multiple of 8 when B > 8"

    # Repack params into kernel-friendly layouts (head-split / gate-split) so
    # all in-kernel weight slices are leading-axis ref views.
    wq_h = params["wq_t"].reshape(E, num_heads, hd).transpose(1, 0, 2)   # (H, E, hd)
    wk_h = params["wk_t"].reshape(E, num_heads, hd).transpose(1, 0, 2)
    bq_h = params["bq"].reshape(num_heads, 1, hd)                        # (H, 1, hd)
    bk_h = params["bk"].reshape(num_heads, 1, hd)
    w_ih_g = params["w_ih"].reshape(L, E, 4, E).transpose(0, 2, 1, 3)    # (L, 4, E, E)
    w_hh_g = params["w_hh"].reshape(L, E, 4, E).transpose(0, 2, 1, 3)
    b_g = (params["b_ih"] + params["b_hh"]).reshape(L, 4, 1, E)          # (L, 4, 1, E)
    ow_row = params["ow"].reshape(1, E)
    ob = params["ob"].reshape(1, 1)

    kern = functools.partial(_critic_encoder_kernel,
                             num_heads=num_heads, lstm_layers=L)

    grid_spec = pltpu.PrefetchScalarGridSpec(
        num_scalar_prefetch=0,
        grid=(B // BT,),
        in_specs=[
            pl.BlockSpec((BT, S, E), lambda b: (b, 0, 0)),          # x
            pl.BlockSpec((num_heads, E, hd), lambda b: (0, 0, 0)),  # Wq (head-split)
            pl.BlockSpec((num_heads, E, hd), lambda b: (0, 0, 0)),  # Wk (head-split)
            pl.BlockSpec((num_heads, 1, hd), lambda b: (0, 0, 0)),  # bq
            pl.BlockSpec((num_heads, 1, hd), lambda b: (0, 0, 0)),  # bk
            pl.BlockSpec((L, 4, E, E), lambda b: (0, 0, 0, 0)),     # W_ih (gate-split)
            pl.BlockSpec((L, 4, E, E), lambda b: (0, 0, 0, 0)),     # W_hh (gate-split)
            pl.BlockSpec((L, 4, 1, E), lambda b: (0, 0, 0, 0)),     # b_ih + b_hh
            pl.BlockSpec((1, E), lambda b: (0, 0)),                 # output W (row)
            pl.BlockSpec((1, 1), lambda b: (0, 0)),                 # output b
        ],
        out_specs=pl.BlockSpec((BT, S), lambda b: (b, 0)),
        scratch_shapes=[pltpu.VMEM((BT, S, E), jnp.float32)],       # per-layer h buffer
    )

    out = pl.pallas_call(
        kern,
        grid_spec=grid_spec,
        out_shape=jax.ShapeDtypeStruct((B, S), jnp.float32),
        compiler_params=pltpu.CompilerParams(
            dimension_semantics=("parallel",)),   # batch tiles are independent
    )(x, wq_h, wk_h, bq_h, bk_h, w_ih_g, w_hh_g, b_g, ow_row, ob)

    return out[:, :, None]                        # (B, S, 1), matches the module


def critic_encoder_reference(x, params, *, num_heads, lstm_layers):
    """Pure-JAX reference with identical semantics (for correctness check)."""
    B, S, E = x.shape
    hd = E // num_heads
    mask = jnp.where(jnp.triu(jnp.ones((S, S), jnp.float32), k=1) > 0, -1e9, 0.0)
    q = x @ params["wq_t"] + params["bq"]
    k = x @ params["wk_t"] + params["bk"]
    qh = q.reshape(B, S, num_heads, hd).transpose(0, 2, 1, 3)
    kh = k.reshape(B, S, num_heads, hd).transpose(0, 2, 1, 3)
    s = jnp.einsum("bhqd,bhkd->bhqk", qh, kh) / (hd ** 0.5) + mask
    w = jax.nn.softmax(s, axis=-1).mean(axis=1)          # (B, S, S)
    out = jnp.einsum("bqk,bkd->bqd", w, x)
    for layer in range(lstm_layers):
        w_ih = params["w_ih"][layer]
        w_hh = params["w_hh"][layer]
        b = params["b_ih"][layer] + params["b_hh"][layer]

        def step(carry, x_t):
            h, c = carry
            gates = x_t @ w_ih + h @ w_hh + b
            i = jax.nn.sigmoid(gates[:, :E])
            f = jax.nn.sigmoid(gates[:, E:2 * E])
            g = jnp.tanh(gates[:, 2 * E:3 * E])
            o = jax.nn.sigmoid(gates[:, 3 * E:])
            c = f * c + i * g
            h = o * jnp.tanh(c)
            return (h, c), h

        h0 = jnp.zeros((B, E), jnp.float32)
        c0 = jnp.zeros((B, E), jnp.float32)
        _, hs = jax.lax.scan(step, (h0, c0), out.transpose(1, 0, 2))
        out = hs.transpose(1, 0, 2)
    return out @ params["ow"] + params["ob"]


if __name__ == "__main__":
    B, S, E, H, L = 2, 8, 32, 4, 2   # batch, seq, embedding_dim, heads, lstm_layers

    key = jax.random.PRNGKey(0)
    keys = jax.random.split(key, 12)
    sc = 1.0 / (E ** 0.5)

    def u(k, shape):
        return jax.random.uniform(k, shape, jnp.float32, -sc, sc)

    params = dict(
        wq_t=u(keys[0], (E, E)),
        wk_t=u(keys[1], (E, E)),
        bq=u(keys[2], (1, E)),
        bk=u(keys[3], (1, E)),
        w_ih=u(keys[4], (L, E, 4 * E)),
        w_hh=u(keys[5], (L, E, 4 * E)),
        b_ih=u(keys[6], (L, 1, 4 * E)),
        b_hh=u(keys[7], (L, 1, 4 * E)),
        ow=u(keys[8], (E, 1)),
        ob=u(keys[9], (1, 1)),
    )
    x = jax.random.normal(keys[10], (B, S, E), jnp.float32)

    out = critic_encoder_forward(x, params, num_heads=H, lstm_layers=L)
    out = jax.block_until_ready(out)

    ref = critic_encoder_reference(x, params, num_heads=H, lstm_layers=L)
    assert out.shape == (B, S, 1)
    # tolerance slightly relaxed vs 1e-3: in-kernel softmax uses the EUP
    # approximate reciprocal (pl.reciprocal(..., approx=True))
    assert jnp.allclose(out, ref, atol=2e-3, rtol=2e-3), "mismatch vs JAX reference"

    print("KERNEL_OK")
</pallas_src>

<mosaic_0001>
module attributes {stable_mosaic.version = 11 : i64} {
  func.func @_critic_encoder_kernel(%arg0: i32, %arg1: memref<2x8x32xf32, #tpu.memory_space<vmem>>, %arg2: memref<4x32x8xf32, #tpu.memory_space<vmem>>, %arg3: memref<4x32x8xf32, #tpu.memory_space<vmem>>, %arg4: memref<4x1x8xf32, #tpu.memory_space<vmem>>, %arg5: memref<4x1x8xf32, #tpu.memory_space<vmem>>, %arg6: memref<2x4x32x32xf32, #tpu.memory_space<vmem>>, %arg7: memref<2x4x32x32xf32, #tpu.memory_space<vmem>>, %arg8: memref<2x4x1x32xf32, #tpu.memory_space<vmem>>, %arg9: memref<1x32xf32, #tpu.memory_space<vmem>>, %arg10: memref<1x1xf32, #tpu.memory_space<vmem>>, %arg11: memref<2x8xf32, #tpu.memory_space<vmem>>, %arg12: memref<2x8x32xf32, #tpu.memory_space<vmem>>) attributes {dimension_semantics = [#tpu.dimension_semantics<parallel>], iteration_bounds = array<i64: 1>, scalar_prefetch = 0 : i64, scratch_operands = 1 : i64, tpu.core_type = #tpu.core_type<tc>, window_params = [{transform_indices = @transform_0, window_bounds = array<i64: 2, 8, 32>}, {pipeline_mode = #tpu.pipeline_mode<synchronous>, transform_indices = @transform_1, window_bounds = array<i64: 4, 32, 8>}, {pipeline_mode = #tpu.pipeline_mode<synchronous>, transform_indices = @transform_2, window_bounds = array<i64: 4, 32, 8>}, {pipeline_mode = #tpu.pipeline_mode<synchronous>, transform_indices = @transform_3, window_bounds = array<i64: 4, 1, 8>}, {pipeline_mode = #tpu.pipeline_mode<synchronous>, transform_indices = @transform_4, window_bounds = array<i64: 4, 1, 8>}, {pipeline_mode = #tpu.pipeline_mode<synchronous>, transform_indices = @transform_5, window_bounds = array<i64: 2, 4, 32, 32>}, {pipeline_mode = #tpu.pipeline_mode<synchronous>, transform_indices = @transform_6, window_bounds = array<i64: 2, 4, 32, 32>}, {pipeline_mode = #tpu.pipeline_mode<synchronous>, transform_indices = @transform_7, window_bounds = array<i64: 2, 4, 1, 32>}, {pipeline_mode = #tpu.pipeline_mode<synchronous>, transform_indices = @transform_8, window_bounds = array<i64: 1, 32>}, {pipeline_mode = #tpu.pipeline_mode<synchronous>, transform_indices = @transform_9, window_bounds = array<i64: 1, 1>}, {transform_indices = @transform_10, window_bounds = array<i64: 2, 8>}]} {
    %c0 = arith.constant 0 : index
    %c0_0 = arith.constant 0 : index
    %c0_1 = arith.constant 0 : index
    %0 = vector.load %arg1[%c0, %c0_0, %c0_1] : memref<2x8x32xf32, #tpu.memory_space<vmem>>, vector<2x8x32xf32>
    %1 = vector.shape_cast %0 : vector<2x8x32xf32> to vector<16x32xf32>
    %2 = tpu.iota {dimensions = array<i32: 0>} : vector<8x8xi32>
    %3 = tpu.iota {dimensions = array<i32: 1>} : vector<8x8xi32>
    %4 = arith.cmpi sgt, %3, %2 : vector<8x8xi32>
    %cst = arith.constant -1.000000e+09 : f32
    %cst_2 = arith.constant 0.000000e+00 : f32
    %5 = vector.broadcast %cst : f32 to vector<8x8xf32>
    %6 = vector.broadcast %cst_2 : f32 to vector<8x8xf32>
    %7 = arith.select %4, %5, %6 : vector<8x8xi1>, vector<8x8xf32>
    %cst_3 = arith.constant 0.000000e+00 : f32
    %8 = vector.broadcast %cst_3 : f32 to vector<2x8x8xf32>
    %c0_4 = arith.constant 0 : index
    %c0_5 = arith.constant 0 : index
    %c0_6 = arith.constant 0 : index
    %9 = vector.load %arg2[%c0_4, %c0_5, %c0_6] : memref<4x32x8xf32, #tpu.memory_space<vmem>>, vector<1x32x8xf32>
    %10 = vector.shape_cast %9 : vector<1x32x8xf32> to vector<32x8xf32>
    %cst_7 = arith.constant dense<0.000000e+00> : vector<16x8xf32>
    %11 = tpu.matmul %1, %10, %cst_7 {dimension_numbers = #tpu.dot_dimension_numbers<[1], [0], [0], [1], [0, 0, 1, 1], [], []>} : vector<16x32xf32>, vector<32x8xf32>, vector<16x8xf32> -> vector<16x8xf32>
    %c0_8 = arith.constant 0 : index
    %c0_9 = arith.constant 0 : index
    %c0_10 = arith.constant 0 : index
    %12 = vector.load %arg4[%c0_8, %c0_9, %c0_10] : memref<4x1x8xf32, #tpu.memory_space<vmem>>, vector<1x1x8xf32>
    %13 = vector.shape_cast %12 : vector<1x1x8xf32> to vector<1x8xf32>
    %14 = vector.broadcast %13 : vector<1x8xf32> to vector<16x8xf32>
    %15 = arith.addf %11, %14 : vector<16x8xf32>
    %16 = vector.shape_cast %15 : vector<16x8xf32> to vector<2x8x8xf32>
    %c0_11 = arith.constant 0 : index
    %c0_12 = arith.constant 0 : index
    %c0_13 = arith.constant 0 : index
    %17 = vector.load %arg3[%c0_11, %c0_12, %c0_13] : memref<4x32x8xf32, #tpu.memory_space<vmem>>, vector<1x32x8xf32>
    %18 = vector.shape_cast %17 : vector<1x32x8xf32> to vector<32x8xf32>
    %cst_14 = arith.constant dense<0.000000e+00> : vector<16x8xf32>
    %19 = tpu.matmul %1, %18, %cst_14 {dimension_numbers = #tpu.dot_dimension_numbers<[1], [0], [0], [1], [0, 0, 1, 1], [], []>} : vector<16x32xf32>, vector<32x8xf32>, vector<16x8xf32> -> vector<16x8xf32>
    %c0_15 = arith.constant 0 : index
    %c0_16 = arith.constant 0 : index
    %c0_17 = arith.constant 0 : index
    %20 = vector.load %arg5[%c0_15, %c0_16, %c0_17] : memref<4x1x8xf32, #tpu.memory_space<vmem>>, vector<1x1x8xf32>
    %21 = vector.shape_cast %20 : vector<1x1x8xf32> to vector<1x8xf32>
    %22 = vector.broadcast %21 : vector<1x8xf32> to vector<16x8xf32>
    %23 = arith.addf %19, %22 : vector<16x8xf32>
    %24 = vector.shape_cast %23 : vector<16x8xf32> to vector<2x8x8xf32>
    "tpu.trace_start"() <{level = 10 : i32, message = "bqd,bkd->bqk"}> : () -> ()
    %cst_18 = arith.constant dense<0.000000e+00> : vector<2x8x8xf32>
    %25 = tpu.matmul %16, %24, %cst_18 {dimension_numbers = #tpu.dot_dimension_numbers<[2], [2], [1], [1], [0, 0, 0, 1, 1, 1], [0], [0]>} : vector<2x8x8xf32>, vector<2x8x8xf32>, vector<2x8x8xf32> -> vector<2x8x8xf32>
    "tpu.trace_stop"() : () -> ()
    %cst_19 = arith.constant 0.353553385 : f32
    %26 = vector.broadcast %cst_19 : f32 to vector<2x8x8xf32>
    %27 = arith.mulf %25, %26 : vector<2x8x8xf32>
    %28 = vector.shape_cast %7 : vector<8x8xf32> to vector<1x8x8xf32>
    %29 = vector.broadcast %28 : vector<1x8x8xf32> to vector<2x8x8xf32>
    %30 = arith.addf %27, %29 : vector<2x8x8xf32>
    %cst_20 = arith.constant dense<0xFF800000> : vector<2x8xf32>
    %31 = vector.multi_reduction <maximumf>, %30, %cst_20 [2] : vector<2x8x8xf32> to vector<2x8xf32>
    %32 = vector.shape_cast %31 : vector<2x8xf32> to vector<2x8x1xf32>
    %33 = vector.broadcast %32 : vector<2x8x1xf32> to vector<2x8x8xf32>
    %34 = arith.subf %30, %33 : vector<2x8x8xf32>
    %35 = math.exp %34 : vector<2x8x8xf32>
    %cst_21 = arith.constant dense<0.000000e+00> : vector<2x8xf32>
    %36 = vector.multi_reduction <add>, %35, %cst_21 [2] : vector<2x8x8xf32> to vector<2x8xf32>
    %37 = vector.shape_cast %36 : vector<2x8xf32> to vector<2x8x1xf32>
    %38 = tpu.reciprocal %37 {approx = true} : vector<2x8x1xf32> -> vector<2x8x1xf32>
    %39 = vector.broadcast %38 : vector<2x8x1xf32> to vector<2x8x8xf32>
    %40 = arith.mulf %35, %39 : vector<2x8x8xf32>
    %41 = arith.addf %8, %40 : vector<2x8x8xf32>
    %c1 = arith.constant 1 : index
    %c0_22 = arith.constant 0 : index
    %c0_23 = arith.constant 0 : index
    %42 = vector.load %arg2[%c1, %c0_22, %c0_23] : memref<4x32x8xf32, #tpu.memory_space<vmem>>, vector<1x32x8xf32>
    %43 = vector.shape_cast %42 : vector<1x32x8xf32> to vector<32x8xf32>
    %cst_24 = arith.constant dense<0.000000e+00> : vector<16x8xf32>
    %44 = tpu.matmul %1, %43, %cst_24 {dimension_numbers = #tpu.dot_dimension_numbers<[1], [0], [0], [1], [0, 0, 1, 1], [], []>} : vector<16x32xf32>, vector<32x8xf32>, vector<16x8xf32> -> vector<16x8xf32>
    %c1_25 = arith.constant 1 : index
    %c0_26 = arith.constant 0 : index
    %c0_27 = arith.constant 0 : index
    %45 = vector.load %arg4[%c1_25, %c0_26, %c0_27] : memref<4x1x8xf32, #tpu.memory_space<vmem>>, vector<1x1x8xf32>
    %46 = vector.shape_cast %45 : vector<1x1x8xf32> to vector<1x8xf32>
    %47 = vector.broadcast %46 : vector<1x8xf32> to vector<16x8xf32>
    %48 = arith.addf %44, %47 : vector<16x8xf32>
    %49 = vector.shape_cast %48 : vector<16x8xf32> to vector<2x8x8xf32>
    %c1_28 = arith.constant 1 : index
    %c0_29 = arith.constant 0 : index
    %c0_30 = arith.constant 0 : index
    %50 = vector.load %arg3[%c1_28, %c0_29, %c0_30] : memref<4x32x8xf32, #tpu.memory_space<vmem>>, vector<1x32x8xf32>
    %51 = vector.shape_cast %50 : vector<1x32x8xf32> to vector<32x8xf32>
    %cst_31 = arith.constant dense<0.000000e+00> : vector<16x8xf32>
    %52 = tpu.matmul %1, %51, %cst_31 {dimension_numbers = #tpu.dot_dimension_numbers<[1], [0], [0], [1], [0, 0, 1, 1], [], []>} : vector<16x32xf32>, vector<32x8xf32>, vector<16x8xf32> -> vector<16x8xf32>
    %c1_32 = arith.constant 1 : index
    %c0_33 = arith.constant 0 : index
    %c0_34 = arith.constant 0 : index
    %53 = vector.load %arg5[%c1_32, %c0_33, %c0_34] : memref<4x1x8xf32, #tpu.memory_space<vmem>>, vector<1x1x8xf32>
    %54 = vector.shape_cast %53 : vector<1x1x8xf32> to vector<1x8xf32>
    %55 = vector.broadcast %54 : vector<1x8xf32> to vector<16x8xf32>
    %56 = arith.addf %52, %55 : vector<16x8xf32>
    %57 = vector.shape_cast %56 : vector<16x8xf32> to vector<2x8x8xf32>
    "tpu.trace_start"() <{level = 10 : i32, message = "bqd,bkd->bqk"}> : () -> ()
    %cst_35 = arith.constant dense<0.000000e+00> : vector<2x8x8xf32>
    %58 = tpu.matmul %49, %57, %cst_35 {dimension_numbers = #tpu.dot_dimension_numbers<[2], [2], [1], [1], [0, 0, 0, 1, 1, 1], [0], [0]>} : vector<2x8x8xf32>, vector<2x8x8xf32>, vector<2x8x8xf32> -> vector<2x8x8xf32>
    "tpu.trace_stop"() : () -> ()
    %cst_36 = arith.constant 0.353553385 : f32
    %59 = vector.broadcast %cst_36 : f32 to vector<2x8x8xf32>
    %60 = arith.mulf %58, %59 : vector<2x8x8xf32>
    %61 = vector.shape_cast %7 : vector<8x8xf32> to vector<1x8x8xf32>
    %62 = vector.broadcast %61 : vector<1x8x8xf32> to vector<2x8x8xf32>
    %63 = arith.addf %60, %62 : vector<2x8x8xf32>
    %cst_37 = arith.constant dense<0xFF800000> : vector<2x8xf32>
    %64 = vector.multi_reduction <maximumf>, %63, %cst_37 [2] : vector<2x8x8xf32> to vector<2x8xf32>
    %65 = vector.shape_cast %64 : vector<2x8xf32> to vector<2x8x1xf32>
    %66 = vector.broadcast %65 : vector<2x8x1xf32> to vector<2x8x8xf32>
    %67 = arith.subf %63, %66 : vector<2x8x8xf32>
    %68 = math.exp %67 : vector<2x8x8xf32>
    %cst_38 = arith.constant dense<0.000000e+00> : vector<2x8xf32>
    %69 = vector.multi_reduction <add>, %68, %cst_38 [2] : vector<2x8x8xf32> to vector<2x8xf32>
    %70 = vector.shape_cast %69 : vector<2x8xf32> to vector<2x8x1xf32>
    %71 = tpu.reciprocal %70 {approx = true} : vector<2x8x1xf32> -> vector<2x8x1xf32>
    %72 = vector.broadcast %71 : vector<2x8x1xf32> to vector<2x8x8xf32>
    %73 = arith.mulf %68, %72 : vector<2x8x8xf32>
    %74 = arith.addf %41, %73 : vector<2x8x8xf32>
    %c2 = arith.constant 2 : index
    %c0_39 = arith.constant 0 : index
    %c0_40 = arith.constant 0 : index
    %75 = vector.load %arg2[%c2, %c0_39, %c0_40] : memref<4x32x8xf32, #tpu.memory_space<vmem>>, vector<1x32x8xf32>
    %76 = vector.shape_cast %75 : vector<1x32x8xf32> to vector<32x8xf32>
    %cst_41 = arith.constant dense<0.000000e+00> : vector<16x8xf32>
    %77 = tpu.matmul %1, %76, %cst_41 {dimension_numbers = #tpu.dot_dimension_numbers<[1], [0], [0], [1], [0, 0, 1, 1], [], []>} : vector<16x32xf32>, vector<32x8xf32>, vector<16x8xf32> -> vector<16x8xf32>
    %c2_42 = arith.constant 2 : index
    %c0_43 = arith.constant 0 : index
    %c0_44 = arith.constant 0 : index
    %78 = vector.load %arg4[%c2_42, %c0_43, %c0_44] : memref<4x1x8xf32, #tpu.memory_space<vmem>>, vector<1x1x8xf32>
    %79 = vector.shape_cast %78 : vector<1x1x8xf32> to vector<1x8xf32>
    %80 = vector.broadcast %79 : vector<1x8xf32> to vector<16x8xf32>
    %81 = arith.addf %77, %80 : vector<16x8xf32>
    %82 = vector.shape_cast %81 : vector<16x8xf32> to vector<2x8x8xf32>
    %c2_45 = arith.constant 2 : index
    %c0_46 = arith.constant 0 : index
    %c0_47 = arith.constant 0 : index
    %83 = vector.load %arg3[%c2_45, %c0_46, %c0_47] : memref<4x32x8xf32, #tpu.memory_space<vmem>>, vector<1x32x8xf32>
    %84 = vector.shape_cast %83 : vector<1x32x8xf32> to vector<32x8xf32>
    %cst_48 = arith.constant dense<0.000000e+00> : vector<16x8xf32>
    %85 = tpu.matmul %1, %84, %cst_48 {dimension_numbers = #tpu.dot_dimension_numbers<[1], [0], [0], [1], [0, 0, 1, 1], [], []>} : vector<16x32xf32>, vector<32x8xf32>, vector<16x8xf32> -> vector<16x8xf32>
    %c2_49 = arith.constant 2 : index
    %c0_50 = arith.constant 0 : index
    %c0_51 = arith.constant 0 : index
    %86 = vector.load %arg5[%c2_49, %c0_50, %c0_51] : memref<4x1x8xf32, #tpu.memory_space<vmem>>, vector<1x1x8xf32>
    %87 = vector.shape_cast %86 : vector<1x1x8xf32> to vector<1x8xf32>
    %88 = vector.broadcast %87 : vector<1x8xf32> to vector<16x8xf32>
    %89 = arith.addf %85, %88 : vector<16x8xf32>
    %90 = vector.shape_cast %89 : vector<16x8xf32> to vector<2x8x8xf32>
    "tpu.trace_start"() <{level = 10 : i32, message = "bqd,bkd->bqk"}> : () -> ()
    %cst_52 = arith.constant dense<0.000000e+00> : vector<2x8x8xf32>
    %91 = tpu.matmul %82, %90, %cst_52 {dimension_numbers = #tpu.dot_dimension_numbers<[2], [2], [1], [1], [0, 0, 0, 1, 1, 1], [0], [0]>} : vector<2x8x8xf32>, vector<2x8x8xf32>, vector<2x8x8xf32> -> vector<2x8x8xf32>
    "tpu.trace_stop"() : () -> ()
    %cst_53 = arith.constant 0.353553385 : f32
    %92 = vector.broadcast %cst_53 : f32 to vector<2x8x8xf32>
    %93 = arith.mulf %91, %92 : vector<2x8x8xf32>
    %94 = vector.shape_cast %7 : vector<8x8xf32> to vector<1x8x8xf32>
    %95 = vector.broadcast %94 : vector<1x8x8xf32> to vector<2x8x8xf32>
    %96 = arith.addf %93, %95 : vector<2x8x8xf32>
    %cst_54 = arith.constant dense<0xFF800000> : vector<2x8xf32>
    %97 = vector.multi_reduction <maximumf>, %96, %cst_54 [2] : vector<2x8x8xf32> to vector<2x8xf32>
    %98 = vector.shape_cast %97 : vector<2x8xf32> to vector<2x8x1xf32>
    %99 = vector.broadcast %98 : vector<2x8x1xf32> to vector<2x8x8xf32>
    %100 = arith.subf %96, %99 : vector<2x8x8xf32>
    %101 = math.exp %100 : vector<2x8x8xf32>
    %cst_55 = arith.constant dense<0.000000e+00> : vector<2x8xf32>
    %102 = vector.multi_reduction <add>, %101, %cst_55 [2] : vector<2x8x8xf32> to vector<2x8xf32>
    %103 = vector.shape_cast %102 : vector<2x8xf32> to vector<2x8x1xf32>
    %104 = tpu.reciprocal %103 {approx = true} : vector<2x8x1xf32> -> vector<2x8x1xf32>
    %105 = vector.broadcast %104 : vector<2x8x1xf32> to vector<2x8x8xf32>
    %106 = arith.mulf %101, %105 : vector<2x8x8xf32>
    %107 = arith.addf %74, %106 : vector<2x8x8xf32>
    %c3 = arith.constant 3 : index
    %c0_56 = arith.constant 0 : index
    %c0_57 = arith.constant 0 : index
    %108 = vector.load %arg2[%c3, %c0_56, %c0_57] : memref<4x32x8xf32, #tpu.memory_space<vmem>>, vector<1x32x8xf32>
    %109 = vector.shape_cast %108 : vector<1x32x8xf32> to vector<32x8xf32>
    %cst_58 = arith.constant dense<0.000000e+00> : vector<16x8xf32>
    %110 = tpu.matmul %1, %109, %cst_58 {dimension_numbers = #tpu.dot_dimension_numbers<[1], [0], [0], [1], [0, 0, 1, 1], [], []>} : vector<16x32xf32>, vector<32x8xf32>, vector<16x8xf32> -> vector<16x8xf32>
    %c3_59 = arith.constant 3 : index
    %c0_60 = arith.constant 0 : index
    %c0_61 = arith.constant 0 : index
    %111 = vector.load %arg4[%c3_59, %c0_60, %c0_61] : memref<4x1x8xf32, #tpu.memory_space<vmem>>, vector<1x1x8xf32>
    %112 = vector.shape_cast %111 : vector<1x1x8xf32> to vector<1x8xf32>
    %113 = vector.broadcast %112 : vector<1x8xf32> to vector<16x8xf32>
    %114 = arith.addf %110, %113 : vector<16x8xf32>
    %115 = vector.shape_cast %114 : vector<16x8xf32> to vector<2x8x8xf32>
    %c3_62 = arith.constant 3 : index
    %c0_63 = arith.constant 0 : index
    %c0_64 = arith.constant 0 : index
    %116 = vector.load %arg3[%c3_62, %c0_63, %c0_64] : memref<4x32x8xf32, #tpu.memory_space<vmem>>, vector<1x32x8xf32>
    %117 = vector.shape_cast %116 : vector<1x32x8xf32> to vector<32x8xf32>
    %cst_65 = arith.constant dense<0.000000e+00> : vector<16x8xf32>
    %118 = tpu.matmul %1, %117, %cst_65 {dimension_numbers = #tpu.dot_dimension_numbers<[1], [0], [0], [1], [0, 0, 1, 1], [], []>} : vector<16x32xf32>, vector<32x8xf32>, vector<16x8xf32> -> vector<16x8xf32>
    %c3_66 = arith.constant 3 : index
    %c0_67 = arith.constant 0 : index
    %c0_68 = arith.constant 0 : index
    %119 = vector.load %arg5[%c3_66, %c0_67, %c0_68] : memref<4x1x8xf32, #tpu.memory_space<vmem>>, vector<1x1x8xf32>
    %120 = vector.shape_cast %119 : vector<1x1x8xf32> to vector<1x8xf32>
    %121 = vector.broadcast %120 : vector<1x8xf32> to vector<16x8xf32>
    %122 = arith.addf %118, %121 : vector<16x8xf32>
    %123 = vector.shape_cast %122 : vector<16x8xf32> to vector<2x8x8xf32>
    "tpu.trace_start"() <{level = 10 : i32, message = "bqd,bkd->bqk"}> : () -> ()
    %cst_69 = arith.constant dense<0.000000e+00> : vector<2x8x8xf32>
    %124 = tpu.matmul %115, %123, %cst_69 {dimension_numbers = #tpu.dot_dimension_numbers<[2], [2], [1], [1], [0, 0, 0, 1, 1, 1], [0], [0]>} : vector<2x8x8xf32>, vector<2x8x8xf32>, vector<2x8x8xf32> -> vector<2x8x8xf32>
    "tpu.trace_stop"() : () -> ()
    %cst_70 = arith.constant 0.353553385 : f32
    %125 = vector.broadcast %cst_70 : f32 to vector<2x8x8xf32>
    %126 = arith.mulf %124, %125 : vector<2x8x8xf32>
    %127 = vector.shape_cast %7 : vector<8x8xf32> to vector<1x8x8xf32>
    %128 = vector.broadcast %127 : vector<1x8x8xf32> to vector<2x8x8xf32>
    %129 = arith.addf %126, %128 : vector<2x8x8xf32>
    %cst_71 = arith.constant dense<0xFF800000> : vector<2x8xf32>
    %130 = vector.multi_reduction <maximumf>, %129, %cst_71 [2] : vector<2x8x8xf32> to vector<2x8xf32>
    %131 = vector.shape_cast %130 : vector<2x8xf32> to vector<2x8x1xf32>
    %132 = vector.broadcast %131 : vector<2x8x1xf32> to vector<2x8x8xf32>
    %133 = arith.subf %129, %132 : vector<2x8x8xf32>
    %134 = math.exp %133 : vector<2x8x8xf32>
    %cst_72 = arith.constant dense<0.000000e+00> : vector<2x8xf32>
    %135 = vector.multi_reduction <add>, %134, %cst_72 [2] : vector<2x8x8xf32> to vector<2x8xf32>
    %136 = vector.shape_cast %135 : vector<2x8xf32> to vector<2x8x1xf32>
    %137 = tpu.reciprocal %136 {approx = true} : vector<2x8x1xf32> -> vector<2x8x1xf32>
    %138 = vector.broadcast %137 : vector<2x8x1xf32> to vector<2x8x8xf32>
    %139 = arith.mulf %134, %138 : vector<2x8x8xf32>
    %140 = arith.addf %107, %139 : vector<2x8x8xf32>
    "tpu.trace_start"() <{level = 10 : i32, message = "bqk,bkd->bqd"}> : () -> ()
    %cst_73 = arith.constant dense<0.000000e+00> : vector<2x8x32xf32>
    %141 = tpu.matmul %140, %0, %cst_73 {dimension_numbers = #tpu.dot_dimension_numbers<[2], [1], [1], [2], [0, 0, 0, 1, 1, 2], [0], [0]>} : vector<2x8x8xf32>, vector<2x8x32xf32>, vector<2x8x32xf32> -> vector<2x8x32xf32>
    "tpu.trace_stop"() : () -> ()
    %cst_74 = arith.constant 2.500000e-01 : f32
    %142 = vector.broadcast %cst_74 : f32 to vector<2x8x32xf32>
    %143 = arith.mulf %141, %142 : vector<2x8x32xf32>
    %144 = vector.shape_cast %143 : vector<2x8x32xf32> to vector<16x32xf32>
    %c0_75 = arith.constant 0 : index
    %c0_76 = arith.constant 0 : index
    %c0_77 = arith.constant 0 : index
    %c0_78 = arith.constant 0 : index
    %145 = vector.load %arg6[%c0_75, %c0_76, %c0_77, %c0_78] : memref<2x4x32x32xf32, #tpu.memory_space<vmem>>, vector<1x1x32x32xf32>
    %146 = vector.shape_cast %145 : vector<1x1x32x32xf32> to vector<32x32xf32>
    %cst_79 = arith.constant dense<0.000000e+00> : vector<16x32xf32>
    %147 = tpu.matmul %144, %146, %cst_79 {dimension_numbers = #tpu.dot_dimension_numbers<[1], [0], [0], [1], [0, 0, 1, 1], [], []>} : vector<16x32xf32>, vector<32x32xf32>, vector<16x32xf32> -> vector<16x32xf32>
    %c0_80 = arith.constant 0 : index
    %c0_81 = arith.constant 0 : index
    %c0_82 = arith.constant 0 : index
    %c0_83 = arith.constant 0 : index
    %148 = vector.load %arg8[%c0_80, %c0_81, %c0_82, %c0_83] : memref<2x4x1x32xf32, #tpu.memory_space<vmem>>, vector<1x1x1x32xf32>
    %149 = vector.shape_cast %148 : vector<1x1x1x32xf32> to vector<1x32xf32>
    %150 = vector.broadcast %149 : vector<1x32xf32> to vector<16x32xf32>
    %151 = arith.addf %147, %150 : vector<16x32xf32>
    %152 = vector.shape_cast %151 : vector<16x32xf32> to vector<2x8x32xf32>
    %c0_84 = arith.constant 0 : index
    %c1_85 = arith.constant 1 : index
    %c0_86 = arith.constant 0 : index
    %c0_87 = arith.constant 0 : index
    %153 = vector.load %arg6[%c0_84, %c1_85, %c0_86, %c0_87] : memref<2x4x32x32xf32, #tpu.memory_space<vmem>>, vector<1x1x32x32xf32>
    %154 = vector.shape_cast %153 : vector<1x1x32x32xf32> to vector<32x32xf32>
    %cst_88 = arith.constant dense<0.000000e+00> : vector<16x32xf32>
    %155 = tpu.matmul %144, %154, %cst_88 {dimension_numbers = #tpu.dot_dimension_numbers<[1], [0], [0], [1], [0, 0, 1, 1], [], []>} : vector<16x32xf32>, vector<32x32xf32>, vector<16x32xf32> -> vector<16x32xf32>
    %c0_89 = arith.constant 0 : index
    %c1_90 = arith.constant 1 : index
    %c0_91 = arith.constant 0 : index
    %c0_92 = arith.constant 0 : index
    %156 = vector.load %arg8[%c0_89, %c1_90, %c0_91, %c0_92] : memref<2x4x1x32xf32, #tpu.memory_space<vmem>>, vector<1x1x1x32xf32>
    %157 = vector.shape_cast %156 : vector<1x1x1x32xf32> to vector<1x32xf32>
    %158 = vector.broadcast %157 : vector<1x32xf32> to vector<16x32xf32>
    %159 = arith.addf %155, %158 : vector<16x32xf32>
    %160 = vector.shape_cast %159 : vector<16x32xf32> to vector<2x8x32xf32>
    %c0_93 = arith.constant 0 : index
    %c2_94 = arith.constant 2 : index
    %c0_95 = arith.constant 0 : index
    %c0_96 = arith.constant 0 : index
    %161 = vector.load %arg6[%c0_93, %c2_94, %c0_95, %c0_96] : memref<2x4x32x32xf32, #tpu.memory_space<vmem>>, vector<1x1x32x32xf32>
    %162 = vector.shape_cast %161 : vector<1x1x32x32xf32> to vector<32x32xf32>
    %cst_97 = arith.constant dense<0.000000e+00> : vector<16x32xf32>
    %163 = tpu.matmul %144, %162, %cst_97 {dimension_numbers = #tpu.dot_dimension_numbers<[1], [0], [0], [1], [0, 0, 1, 1], [], []>} : vector<16x32xf32>, vector<32x32xf32>, vector<16x32xf32> -> vector<16x32xf32>
    %c0_98 = arith.constant 0 : index
    %c2_99 = arith.constant 2 : index
    %c0_100 = arith.constant 0 : index
    %c0_101 = arith.constant 0 : index
    %164 = vector.load %arg8[%c0_98, %c2_99, %c0_100, %c0_101] : memref<2x4x1x32xf32, #tpu.memory_space<vmem>>, vector<1x1x1x32xf32>
    %165 = vector.shape_cast %164 : vector<1x1x1x32xf32> to vector<1x32xf32>
    %166 = vector.broadcast %165 : vector<1x32xf32> to vector<16x32xf32>
    %167 = arith.addf %163, %166 : vector<16x32xf32>
    %168 = vector.shape_cast %167 : vector<16x32xf32> to vector<2x8x32xf32>
    %c0_102 = arith.constant 0 : index
    %c3_103 = arith.constant 3 : index
    %c0_104 = arith.constant 0 : index
    %c0_105 = arith.constant 0 : index
    %169 = vector.load %arg6[%c0_102, %c3_103, %c0_104, %c0_105] : memref<2x4x32x32xf32, #tpu.memory_space<vmem>>, vector<1x1x32x32xf32>
    %170 = vector.shape_cast %169 : vector<1x1x32x32xf32> to vector<32x32xf32>
    %cst_106 = arith.constant dense<0.000000e+00> : vector<16x32xf32>
    %171 = tpu.matmul %144, %170, %cst_106 {dimension_numbers = #tpu.dot_dimension_numbers<[1], [0], [0], [1], [0, 0, 1, 1], [], []>} : vector<16x32xf32>, vector<32x32xf32>, vector<16x32xf32> -> vector<16x32xf32>
    %c0_107 = arith.constant 0 : index
    %c3_108 = arith.constant 3 : index
    %c0_109 = arith.constant 0 : index
    %c0_110 = arith.constant 0 : index
    %172 = vector.load %arg8[%c0_107, %c3_108, %c0_109, %c0_110] : memref<2x4x1x32xf32, #tpu.memory_space<vmem>>, vector<1x1x1x32xf32>
    %173 = vector.shape_cast %172 : vector<1x1x1x32xf32> to vector<1x32xf32>
    %174 = vector.broadcast %173 : vector<1x32xf32> to vector<16x32xf32>
    %175 = arith.addf %171, %174 : vector<16x32xf32>
    %176 = vector.shape_cast %175 : vector<16x32xf32> to vector<2x8x32xf32>
    %c0_111 = arith.constant 0 : index
    %c0_112 = arith.constant 0 : index
    %c0_113 = arith.constant 0 : index
    %c0_114 = arith.constant 0 : index
    %177 = vector.load %arg7[%c0_111, %c0_112, %c0_113, %c0_114] : memref<2x4x32x32xf32, #tpu.memory_space<vmem>>, vector<1x1x32x32xf32>
    %178 = vector.shape_cast %177 : vector<1x1x32x32xf32> to vector<32x32xf32>
    %c0_115 = arith.constant 0 : index
    %c1_116 = arith.constant 1 : index
    %c0_117 = arith.constant 0 : index
    %c0_118 = arith.constant 0 : index
    %179 = vector.load %arg7[%c0_115, %c1_116, %c0_117, %c0_118] : memref<2x4x32x32xf32, #tpu.memory_space<vmem>>, vector<1x1x32x32xf32>
    %180 = vector.shape_cast %179 : vector<1x1x32x32xf32> to vector<32x32xf32>
    %c0_119 = arith.constant 0 : index
    %c2_120 = arith.constant 2 : index
    %c0_121 = arith.constant 0 : index
    %c0_122 = arith.constant 0 : index
    %181 = vector.load %arg7[%c0_119, %c2_120, %c0_121, %c0_122] : memref<2x4x32x32xf32, #tpu.memory_space<vmem>>, vector<1x1x32x32xf32>
    %182 = vector.shape_cast %181 : vector<1x1x32x32xf32> to vector<32x32xf32>
    %c0_123 = arith.constant 0 : index
    %c3_124 = arith.constant 3 : index
    %c0_125 = arith.constant 0 : index
    %c0_126 = arith.constant 0 : index
    %183 = vector.load %arg7[%c0_123, %c3_124, %c0_125, %c0_126] : memref<2x4x32x32xf32, #tpu.memory_space<vmem>>, vector<1x1x32x32xf32>
    %184 = vector.shape_cast %183 : vector<1x1x32x32xf32> to vector<32x32xf32>
    %cst_127 = arith.constant 0.000000e+00 : f32
    %185 = vector.broadcast %cst_127 : f32 to vector<2x32xf32>
    %cst_128 = arith.constant 0.000000e+00 : f32
    %186 = vector.broadcast %cst_128 : f32 to vector<2x32xf32>
    %187 = vector.extract_strided_slice %152 {offsets = [0, 0, 0], sizes = [2, 1, 32], strides = [1, 1, 1]} : vector<2x8x32xf32> to vector<2x1x32xf32>
    %188 = vector.shape_cast %187 : vector<2x1x32xf32> to vector<2x32xf32>
    %cst_129 = arith.constant dense<0.000000e+00> : vector<2x32xf32>
    %189 = tpu.matmul %185, %178, %cst_129 {dimension_numbers = #tpu.dot_dimension_numbers<[1], [0], [0], [1], [0, 0, 1, 1], [], []>} : vector<2x32xf32>, vector<32x32xf32>, vector<2x32xf32> -> vector<2x32xf32>
    %190 = arith.addf %188, %189 : vector<2x32xf32>
    %191 = arith.negf %190 : vector<2x32xf32>
    %192 = math.exp %191 : vector<2x32xf32>
    %cst_130 = arith.constant 1.000000e+00 : f32
    %193 = vector.broadcast %cst_130 : f32 to vector<2x32xf32>
    %194 = arith.addf %193, %192 : vector<2x32xf32>
    %195 = arith.divf %193, %194 : vector<2x32xf32>
    %196 = vector.extract_strided_slice %160 {offsets = [0, 0, 0], sizes = [2, 1, 32], strides = [1, 1, 1]} : vector<2x8x32xf32> to vector<2x1x32xf32>
    %197 = vector.shape_cast %196 : vector<2x1x32xf32> to vector<2x32xf32>
    %cst_131 = arith.constant dense<0.000000e+00> : vector<2x32xf32>
    %198 = tpu.matmul %185, %180, %cst_131 {dimension_numbers = #tpu.dot_dimension_numbers<[1], [0], [0], [1], [0, 0, 1, 1], [], []>} : vector<2x32xf32>, vector<32x32xf32>, vector<2x32xf32> -> vector<2x32xf32>
    %199 = arith.addf %197, %198 : vector<2x32xf32>
    %200 = arith.negf %199 : vector<2x32xf32>
    %201 = math.exp %200 : vector<2x32xf32>
    %cst_132 = arith.constant 1.000000e+00 : f32
    %202 = vector.broadcast %cst_132 : f32 to vector<2x32xf32>
    %203 = arith.addf %202, %201 : vector<2x32xf32>
    %204 = arith.divf %202, %203 : vector<2x32xf32>
    %205 = vector.extract_strided_slice %168 {offsets = [0, 0, 0], sizes = [2, 1, 32], strides = [1, 1, 1]} : vector<2x8x32xf32> to vector<2x1x32xf32>
    %206 = vector.shape_cast %205 : vector<2x1x32xf32> to vector<2x32xf32>
    %cst_133 = arith.constant dense<0.000000e+00> : vector<2x32xf32>
    %207 = tpu.matmul %185, %182, %cst_133 {dimension_numbers = #tpu.dot_dimension_numbers<[1], [0], [0], [1], [0, 0, 1, 1], [], []>} : vector<2x32xf32>, vector<32x32xf32>, vector<2x32xf32> -> vector<2x32xf32>
    %208 = arith.addf %206, %207 : vector<2x32xf32>
    %209 = math.tanh %208 : vector<2x32xf32>
    %210 = vector.extract_strided_slice %176 {offsets = [0, 0, 0], sizes = [2, 1, 32], strides = [1, 1, 1]} : vector<2x8x32xf32> to vector<2x1x32xf32>
    %211 = vector.shape_cast %210 : vector<2x1x32xf32> to vector<2x32xf32>
    %cst_134 = arith.constant dense<0.000000e+00> : vector<2x32xf32>
    %212 = tpu.matmul %185, %184, %cst_134 {dimension_numbers = #tpu.dot_dimension_numbers<[1], [0], [0], [1], [0, 0, 1, 1], [], []>} : vector<2x32xf32>, vector<32x32xf32>, vector<2x32xf32> -> vector<2x32xf32>
    %213 = arith.addf %211, %212 : vector<2x32xf32>
    %214 = arith.negf %213 : vector<2x32xf32>
    %215 = math.exp %214 : vector<2x32xf32>
    %cst_135 = arith.constant 1.000000e+00 : f32
    %216 = vector.broadcast %cst_135 : f32 to vector<2x32xf32>
    %217 = arith.addf %216, %215 : vector<2x32xf32>
    %218 = arith.divf %216, %217 : vector<2x32xf32>
    %219 = arith.mulf %204, %186 : vector<2x32xf32>
    %220 = arith.mulf %195, %209 : vector<2x32xf32>
    %221 = arith.addf %219, %220 : vector<2x32xf32>
    %222 = math.tanh %221 : vector<2x32xf32>
    %223 = arith.mulf %218, %222 : vector<2x32xf32>
    %c0_136 = arith.constant 0 : index
    %c0_137 = arith.constant 0 : index
    %c0_138 = arith.constant 0 : index
    %224 = vector.load %arg12[%c0_136, %c0_137, %c0_138] : memref<2x8x32xf32, #tpu.memory_space<vmem>>, vector<2x1x32xf32>
    %225 = vector.shape_cast %224 : vector<2x1x32xf32> to vector<2x32xf32>
    %226 = vector.shape_cast %223 : vector<2x32xf32> to vector<2x1x32xf32>
    tpu.vector_store %arg12[%c0_136, %c0_137, %c0_138], %226 {strides = array<i32>} : memref<2x8x32xf32, #tpu.memory_space<vmem>>, vector<2x1x32xf32>,
    %227 = vector.extract_strided_slice %152 {offsets = [0, 1, 0], sizes = [2, 1, 32], strides = [1, 1, 1]} : vector<2x8x32xf32> to vector<2x1x32xf32>
    %228 = vector.shape_cast %227 : vector<2x1x32xf32> to vector<2x32xf32>
    %cst_139 = arith.constant dense<0.000000e+00> : vector<2x32xf32>
    %229 = tpu.matmul %223, %178, %cst_139 {dimension_numbers = #tpu.dot_dimension_numbers<[1], [0], [0], [1], [0, 0, 1, 1], [], []>} : vector<2x32xf32>, vector<32x32xf32>, vector<2x32xf32> -> vector<2x32xf32>
    %230 = arith.addf %228, %229 : vector<2x32xf32>
    %231 = arith.negf %230 : vector<2x32xf32>
    %232 = math.exp %231 : vector<2x32xf32>
    %cst_140 = arith.constant 1.000000e+00 : f32
    %233 = vector.broadcast %cst_140 : f32 to vector<2x32xf32>
    %234 = arith.addf %233, %232 : vector<2x32xf32>
    %235 = arith.divf %233, %234 : vector<2x32xf32>
    %236 = vector.extract_strided_slice %160 {offsets = [0, 1, 0], sizes = [2, 1, 32], strides = [1, 1, 1]} : vector<2x8x32xf32> to vector<2x1x32xf32>
    %237 = vector.shape_cast %236 : vector<2x1x32xf32> to vector<2x32xf32>
    %cst_141 = arith.constant dense<0.000000e+00> : vector<2x32xf32>
    %238 = tpu.matmul %223, %180, %cst_141 {dimension_numbers = #tpu.dot_dimension_numbers<[1], [0], [0], [1], [0, 0, 1, 1], [], []>} : vector<2x32xf32>, vector<32x32xf32>, vector<2x32xf32> -> vector<2x32xf32>
    %239 = arith.addf %237, %238 : vector<2x32xf32>
    %240 = arith.negf %239 : vector<2x32xf32>
    %241 = math.exp %240 : vector<2x32xf32>
    %cst_142 = arith.constant 1.000000e+00 : f32
    %242 = vector.broadcast %cst_142 : f32 to vector<2x32xf32>
    %243 = arith.addf %242, %241 : vector<2x32xf32>
    %244 = arith.divf %242, %243 : vector<2x32xf32>
    %245 = vector.extract_strided_slice %168 {offsets = [0, 1, 0], sizes = [2, 1, 32], strides = [1, 1, 1]} : vector<2x8x32xf32> to vector<2x1x32xf32>
    %246 = vector.shape_cast %245 : vector<2x1x32xf32> to vector<2x32xf32>
    %cst_143 = arith.constant dense<0.000000e+00> : vector<2x32xf32>
    %247 = tpu.matmul %223, %182, %cst_143 {dimension_numbers = #tpu.dot_dimension_numbers<[1], [0], [0], [1], [0, 0, 1, 1], [], []>} : vector<2x32xf32>, vector<32x32xf32>, vector<2x32xf32> -> vector<2x32xf32>
    %248 = arith.addf %246, %247 : vector<2x32xf32>
    %249 = math.tanh %248 : vector<2x32xf32>
    %250 = vector.extract_strided_slice %176 {offsets = [0, 1, 0], sizes = [2, 1, 32], strides = [1, 1, 1]} : vector<2x8x32xf32> to vector<2x1x32xf32>
    %251 = vector.shape_cast %250 : vector<2x1x32xf32> to vector<2x32xf32>
    %cst_144 = arith.constant dense<0.000000e+00> : vector<2x32xf32>
    %252 = tpu.matmul %223, %184, %cst_144 {dimension_numbers = #tpu.dot_dimension_numbers<[1], [0], [0], [1], [0, 0, 1, 1], [], []>} : vector<2x32xf32>, vector<32x32xf32>, vector<2x32xf32> -> vector<2x32xf32>
    %253 = arith.addf %251, %252 : vector<2x32xf32>
    %254 = arith.negf %253 : vector<2x32xf32>
    %255 = math.exp %254 : vector<2x32xf32>
    %cst_145 = arith.constant 1.000000e+00 : f32
    %256 = vector.broadcast %cst_145 : f32 to vector<2x32xf32>
    %257 = arith.addf %256, %255 : vector<2x32xf32>
    %258 = arith.divf %256, %257 : vector<2x32xf32>
    %259 = arith.mulf %244, %221 : vector<2x32xf32>
    %260 = arith.mulf %235, %249 : vector<2x32xf32>
    %261 = arith.addf %259, %260 : vector<2x32xf32>
    %262 = math.tanh %261 : vector<2x32xf32>
    %263 = arith.mulf %258, %262 : vector<2x32xf32>
    %c0_146 = arith.constant 0 : index
    %c1_147 = arith.constant 1 : index
    %c0_148 = arith.constant 0 : index
    %264 = vector.load %arg12[%c0_146, %c1_147, %c0_148] : memref<2x8x32xf32, #tpu.memory_space<vmem>>, vector<2x1x32xf32>
    %265 = vector.shape_cast %264 : vector<2x1x32xf32> to vector<2x32xf32>
    %266 = vector.shape_cast %263 : vector<2x32xf32> to vector<2x1x32xf32>
    tpu.vector_store %arg12[%c0_146, %c1_147, %c0_148], %266 {strides = array<i32>} : memref<2x8x32xf32, #tpu.memory_space<vmem>>, vector<2x1x32xf32>,
    %267 = vector.extract_strided_slice %152 {offsets = [0, 2, 0], sizes = [2, 1, 32], strides = [1, 1, 1]} : vector<2x8x32xf32> to vector<2x1x32xf32>
    %268 = vector.shape_cast %267 : vector<2x1x32xf32> to vector<2x32xf32>
    %cst_149 = arith.constant dense<0.000000e+00> : vector<2x32xf32>
    %269 = tpu.matmul %263, %178, %cst_149 {dimension_numbers = #tpu.dot_dimension_numbers<[1], [0], [0], [1], [0, 0, 1, 1], [], []>} : vector<2x32xf32>, vector<32x32xf32>, vector<2x32xf32> -> vector<2x32xf32>
    %270 = arith.addf %268, %269 : vector<2x32xf32>
    %271 = arith.negf %270 : vector<2x32xf32>
    %272 = math.exp %271 : vector<2x32xf32>
    %cst_150 = arith.constant 1.000000e+00 : f32
    %273 = vector.broadcast %cst_150 : f32 to vector<2x32xf32>
    %274 = arith.addf %273, %272 : vector<2x32xf32>
    %275 = arith.divf %273, %274 : vector<2x32xf32>
    %276 = vector.extract_strided_slice %160 {offsets = [0, 2, 0], sizes = [2, 1, 32], strides = [1, 1, 1]} : vector<2x8x32xf32> to vector<2x1x32xf32>
    %277 = vector.shape_cast %276 : vector<2x1x32xf32> to vector<2x32xf32>
    %cst_151 = arith.constant dense<0.000000e+00> : vector<2x32xf32>
    %278 = tpu.matmul %263, %180, %cst_151 {dimension_numbers = #tpu.dot_dimension_numbers<[1], [0], [0], [1], [0, 0, 1, 1], [], []>} : vector<2x32xf32>, vector<32x32xf32>, vector<2x32xf32> -> vector<2x32xf32>
    %279 = arith.addf %277, %278 : vector<2x32xf32>
    %280 = arith.negf %279 : vector<2x32xf32>
    %281 = math.exp %280 : vector<2x32xf32>
    %cst_152 = arith.constant 1.000000e+00 : f32
    %282 = vector.broadcast %cst_152 : f32 to vector<2x32xf32>
    %283 = arith.addf %282, %281 : vector<2x32xf32>
    %284 = arith.divf %282, %283 : vector<2x32xf32>
    %285 = vector.extract_strided_slice %168 {offsets = [0, 2, 0], sizes = [2, 1, 32], strides = [1, 1, 1]} : vector<2x8x32xf32> to vector<2x1x32xf32>
    %286 = vector.shape_cast %285 : vector<2x1x32xf32> to vector<2x32xf32>
    %cst_153 = arith.constant dense<0.000000e+00> : vector<2x32xf32>
    %287 = tpu.matmul %263, %182, %cst_153 {dimension_numbers = #tpu.dot_dimension_numbers<[1], [0], [0], [1], [0, 0, 1, 1], [], []>} : vector<2x32xf32>, vector<32x32xf32>, vector<2x32xf32> -> vector<2x32xf32>
    %288 = arith.addf %286, %287 : vector<2x32xf32>
    %289 = math.tanh %288 : vector<2x32xf32>
    %290 = vector.extract_strided_slice %176 {offsets = [0, 2, 0], sizes = [2, 1, 32], strides = [1, 1, 1]} : vector<2x8x32xf32> to vector<2x1x32xf32>
    %291 = vector.shape_cast %290 : vector<2x1x32xf32> to vector<2x32xf32>
    %cst_154 = arith.constant dense<0.000000e+00> : vector<2x32xf32>
    %292 = tpu.matmul %263, %184, %cst_154 {dimension_numbers = #tpu.dot_dimension_numbers<[1], [0], [0], [1], [0, 0, 1, 1], [], []>} : vector<2x32xf32>, vector<32x32xf32>, vector<2x32xf32> -> vector<2x32xf32>
    %293 = arith.addf %291, %292 : vector<2x32xf32>
    %294 = arith.negf %293 : vector<2x32xf32>
    %295 = math.exp %294 : vector<2x32xf32>
    %cst_155 = arith.constant 1.000000e+00 : f32
    %296 = vector.broadcast %cst_155 : f32 to vector<2x32xf32>
    %297 = arith.addf %296, %295 : vector<2x32xf32>
    %298 = arith.divf %296, %297 : vector<2x32xf32>
    %299 = arith.mulf %284, %261 : vector<2x32xf32>
    %300 = arith.mulf %275, %289 : vector<2x32xf32>
    %301 = arith.addf %299, %300 : vector<2x32xf32>
    %302 = math.tanh %301 : vector<2x32xf32>
    %303 = arith.mulf %298, %302 : vector<2x32xf32>
    %c0_156 = arith.constant 0 : index
    %c2_157 = arith.constant 2 : index
    %c0_158 = arith.constant 0 : index
    %304 = vector.load %arg12[%c0_156, %c2_157, %c0_158] : memref<2x8x32xf32, #tpu.memory_space<vmem>>, vector<2x1x32xf32>
    %305 = vector.shape_cast %304 : vector<2x1x32xf32> to vector<2x32xf32>
    %306 = vector.shape_cast %303 : vector<2x32xf32> to vector<2x1x32xf32>
    tpu.vector_store %arg12[%c0_156, %c2_157, %c0_158], %306 {strides = array<i32>} : memref<2x8x32xf32, #tpu.memory_space<vmem>>, vector<2x1x32xf32>,
    %307 = vector.extract_strided_slice %152 {offsets = [0, 3, 0], sizes = [2, 1, 32], strides = [1, 1, 1]} : vector<2x8x32xf32> to vector<2x1x32xf32>
    %308 = vector.shape_cast %307 : vector<2x1x32xf32> to vector<2x32xf32>
    %cst_159 = arith.constant dense<0.000000e+00> : vector<2x32xf32>
    %309 = tpu.matmul %303, %178, %cst_159 {dimension_numbers = #tpu.dot_dimension_numbers<[1], [0], [0], [1], [0, 0, 1, 1], [], []>} : vector<2x32xf32>, vector<32x32xf32>, vector<2x32xf32> -> vector<2x32xf32>
    %310 = arith.addf %308, %309 : vector<2x32xf32>
    %311 = arith.negf %310 : vector<2x32xf32>
    %312 = math.exp %311 : vector<2x32xf32>
    %cst_160 = arith.constant 1.000000e+00 : f32
    %313 = vector.broadcast %cst_160 : f32 to vector<2x32xf32>
    %314 = arith.addf %313, %312 : vector<2x32xf32>
    %315 = arith.divf %313, %314 : vector<2x32xf32>
    %316 = vector.extract_strided_slice %160 {offsets = [0, 3, 0], sizes = [2, 1, 32], strides = [1, 1, 1]} : vector<2x8x32xf32> to vector<2x1x32xf32>
    %317 = vector.shape_cast %316 : vector<2x1x32xf32> to vector<2x32xf32>
    %cst_161 = arith.constant dense<0.000000e+00> : vector<2x32xf32>
    %318 = tpu.matmul %303, %180, %cst_161 {dimension_numbers = #tpu.dot_dimension_numbers<[1], [0], [0], [1], [0, 0, 1, 1], [], []>} : vector<2x32xf32>, vector<32x32xf32>, vector<2x32xf32> -> vector<2x32xf32>
    %319 = arith.addf %317, %318 : vector<2x32xf32>
    %320 = arith.negf %319 : vector<2x32xf32>
    %321 = math.exp %320 : vector<2x32xf32>
    %cst_162 = arith.constant 1.000000e+00 : f32
    %322 = vector.broadcast %cst_162 : f32 to vector<2x32xf32>
    %323 = arith.addf %322, %321 : vector<2x32xf32>
    %324 = arith.divf %322, %323 : vector<2x32xf32>
    %325 = vector.extract_strided_slice %168 {offsets = [0, 3, 0], sizes = [2, 1, 32], strides = [1, 1, 1]} : vector<2x8x32xf32> to vector<2x1x32xf32>
    %326 = vector.shape_cast %325 : vector<2x1x32xf32> to vector<2x32xf32>
    %cst_163 = arith.constant dense<0.000000e+00> : vector<2x32xf32>
    %327 = tpu.matmul %303, %182, %cst_163 {dimension_numbers = #tpu.dot_dimension_numbers<[1], [0], [0], [1], [0, 0, 1, 1], [], []>} : vector<2x32xf32>, vector<32x32xf32>, vector<2x32xf32> -> vector<2x32xf32>
    %328 = arith.addf %326, %327 : vector<2x32xf32>
    %329 = math.tanh %328 : vector<2x32xf32>
    %330 = vector.extract_strided_slice %176 {offsets = [0, 3, 0], sizes = [2, 1, 32], strides = [1, 1, 1]} : vector<2x8x32xf32> to vector<2x1x32xf32>
    %331 = vector.shape_cast %330 : vector<2x1x32xf32> to vector<2x32xf32>
    %cst_164 = arith.constant dense<0.000000e+00> : vector<2x32xf32>
    %332 = tpu.matmul %303, %184, %cst_164 {dimension_numbers = #tpu.dot_dimension_numbers<[1], [0], [0], [1], [0, 0, 1, 1], [], []>} : vector<2x32xf32>, vector<32x32xf32>, vector<2x32xf32> -> vector<2x32xf32>
    %333 = arith.addf %331, %332 : vector<2x32xf32>
    %334 = arith.negf %333 : vector<2x32xf32>
    %335 = math.exp %334 : vector<2x32xf32>
    %cst_165 = arith.constant 1.000000e+00 : f32
    %336 = vector.broadcast %cst_165 : f32 to vector<2x32xf32>
    %337 = arith.addf %336, %335 : vector<2x32xf32>
    %338 = arith.divf %336, %337 : vector<2x32xf32>
    %339 = arith.mulf %324, %301 : vector<2x32xf32>
    %340 = arith.mulf %315, %329 : vector<2x32xf32>
    %341 = arith.addf %339, %340 : vector<2x32xf32>
    %342 = math.tanh %341 : vector<2x32xf32>
    %343 = arith.mulf %338, %342 : vector<2x32xf32>
    %c0_166 = arith.constant 0 : index
    %c3_167 = arith.constant 3 : index
    %c0_168 = arith.constant 0 : index
    %344 = vector.load %arg12[%c0_166, %c3_167, %c0_168] : memref<2x8x32xf32, #tpu.memory_space<vmem>>, vector<2x1x32xf32>
    %345 = vector.shape_cast %344 : vector<2x1x32xf32> to vector<2x32xf32>
    %346 = vector.shape_cast %343 : vector<2x32xf32> to vector<2x1x32xf32>
    tpu.vector_store %arg12[%c0_166, %c3_167, %c0_168], %346 {strides = array<i32>} : memref<2x8x32xf32, #tpu.memory_space<vmem>>, vector<2x1x32xf32>,
    %347 = vector.extract_strided_slice %152 {offsets = [0, 4, 0], sizes = [2, 1, 32], strides = [1, 1, 1]} : vector<2x8x32xf32> to vector<2x1x32xf32>
    %348 = vector.shape_cast %347 : vector<2x1x32xf32> to vector<2x32xf32>
    %cst_169 = arith.constant dense<0.000000e+00> : vector<2x32xf32>
    %349 = tpu.matmul %343, %178, %cst_169 {dimension_numbers = #tpu.dot_dimension_numbers<[1], [0], [0], [1], [0, 0, 1, 1], [], []>} : vector<2x32xf32>, vector<32x32xf32>, vector<2x32xf32> -> vector<2x32xf32>
    %350 = arith.addf %348, %349 : vector<2x32xf32>
    %351 = arith.negf %350 : vector<2x32xf32>
    %352 = math.exp %351 : vector<2x32xf32>
    %cst_170 = arith.constant 1.000000e+00 : f32
    %353 = vector.broadcast %cst_170 : f32 to vector<2x32xf32>
    %354 = arith.addf %353, %352 : vector<2x32xf32>
    %355 = arith.divf %353, %354 : vector<2x32xf32>
    %356 = vector.extract_strided_slice %160 {offsets = [0, 4, 0], sizes = [2, 1, 32], strides = [1, 1, 1]} : vector<2x8x32xf32> to vector<2x1x32xf32>
    %357 = vector.shape_cast %356 : vector<2x1x32xf32> to vector<2x32xf32>
    %cst_171 = arith.constant dense<0.000000e+00> : vector<2x32xf32>
    %358 = tpu.matmul %343, %180, %cst_171 {dimension_numbers = #tpu.dot_dimension_numbers<[1], [0], [0], [1], [0, 0, 1, 1], [], []>} : vector<2x32xf32>, vector<32x32xf32>, vector<2x32xf32> -> vector<2x32xf32>
    %359 = arith.addf %357, %358 : vector<2x32xf32>
    %360 = arith.negf %359 : vector<2x32xf32>
    %361 = math.exp %360 : vector<2x32xf32>
    %cst_172 = arith.constant 1.000000e+00 : f32
    %362 = vector.broadcast %cst_172 : f32 to vector<2x32xf32>
    %363 = arith.addf %362, %361 : vector<2x32xf32>
    %364 = arith.divf %362, %363 : vector<2x32xf32>
    %365 = vector.extract_strided_slice %168 {offsets = [0, 4, 0], sizes = [2, 1, 32], strides = [1, 1, 1]} : vector<2x8x32xf32> to vector<2x1x32xf32>
    %366 = vector.shape_cast %365 : vector<2x1x32xf32> to vector<2x32xf32>
    %cst_173 = arith.constant dense<0.000000e+00> : vector<2x32xf32>
    %367 = tpu.matmul %343, %182, %cst_173 {dimension_numbers = #tpu.dot_dimension_numbers<[1], [0], [0], [1], [0, 0, 1, 1], [], []>} : vector<2x32xf32>, vector<32x32xf32>, vector<2x32xf32> -> vector<2x32xf32>
    %368 = arith.addf %366, %367 : vector<2x32xf32>
    %369 = math.tanh %368 : vector<2x32xf32>
    %370 = vector.extract_strided_slice %176 {offsets = [0, 4, 0], sizes = [2, 1, 32], strides = [1, 1, 1]} : vector<2x8x32xf32> to vector<2x1x32xf32>
    %371 = vector.shape_cast %370 : vector<2x1x32xf32> to vector<2x32xf32>
    %cst_174 = arith.constant dense<0.000000e+00> : vector<2x32xf32>
    %372 = tpu.matmul %343, %184, %cst_174 {dimension_numbers = #tpu.dot_dimension_numbers<[1], [0], [0], [1], [0, 0, 1, 1], [], []>} : vector<2x32xf32>, vector<32x32xf32>, vector<2x32xf32> -> vector<2x32xf32>
    %373 = arith.addf %371, %372 : vector<2x32xf32>
    %374 = arith.negf %373 : vector<2x32xf32>
    %375 = math.exp %374 : vector<2x32xf32>
    %cst_175 = arith.constant 1.000000e+00 : f32
    %376 = vector.broadcast %cst_175 : f32 to vector<2x32xf32>
    %377 = arith.addf %376, %375 : vector<2x32xf32>
    %378 = arith.divf %376, %377 : vector<2x32xf32>
    %379 = arith.mulf %364, %341 : vector<2x32xf32>
    %380 = arith.mulf %355, %369 : vector<2x32xf32>
    %381 = arith.addf %379, %380 : vector<2x32xf32>
    %382 = math.tanh %381 : vector<2x32xf32>
    %383 = arith.mulf %378, %382 : vector<2x32xf32>
    %c0_176 = arith.constant 0 : index
    %c4 = arith.constant 4 : index
    %c0_177 = arith.constant 0 : index
    %384 = vector.load %arg12[%c0_176, %c4, %c0_177] : memref<2x8x32xf32, #tpu.memory_space<vmem>>, vector<2x1x32xf32>
    %385 = vector.shape_cast %384 : vector<2x1x32xf32> to vector<2x32xf32>
    %386 = vector.shape_cast %383 : vector<2x32xf32> to vector<2x1x32xf32>
    tpu.vector_store %arg12[%c0_176, %c4, %c0_177], %386 {strides = array<i32>} : memref<2x8x32xf32, #tpu.memory_space<vmem>>, vector<2x1x32xf32>,
    %387 = vector.extract_strided_slice %152 {offsets = [0, 5, 0], sizes = [2, 1, 32], strides = [1, 1, 1]} : vector<2x8x32xf32> to vector<2x1x32xf32>
    %388 = vector.shape_cast %387 : vector<2x1x32xf32> to vector<2x32xf32>
    %cst_178 = arith.constant dense<0.000000e+00> : vector<2x32xf32>
    %389 = tpu.matmul %383, %178, %cst_178 {dimension_numbers = #tpu.dot_dimension_numbers<[1], [0], [0], [1], [0, 0, 1, 1], [], []>} : vector<2x32xf32>, vector<32x32xf32>, vector<2x32xf32> -> vector<2x32xf32>
    %390 = arith.addf %388, %389 : vector<2x32xf32>
    %391 = arith.negf %390 : vector<2x32xf32>
    %392 = math.exp %391 : vector<2x32xf32>
    %cst_179 = arith.constant 1.000000e+00 : f32
    %393 = vector.broadcast %cst_179 : f32 to vector<2x32xf32>
    %394 = arith.addf %393, %392 : vector<2x32xf32>
    %395 = arith.divf %393, %394 : vector<2x32xf32>
    %396 = vector.extract_strided_slice %160 {offsets = [0, 5, 0], sizes = [2, 1, 32], strides = [1, 1, 1]} : vector<2x8x32xf32> to vector<2x1x32xf32>
    %397 = vector.shape_cast %396 : vector<2x1x32xf32> to vector<2x32xf32>
    %cst_180 = arith.constant dense<0.000000e+00> : vector<2x32xf32>
    %398 = tpu.matmul %383, %180, %cst_180 {dimension_numbers = #tpu.dot_dimension_numbers<[1], [0], [0], [1], [0, 0, 1, 1], [], []>} : vector<2x32xf32>, vector<32x32xf32>, vector<2x32xf32> -> vector<2x32xf32>
    %399 = arith.addf %397, %398 : vector<2x32xf32>
    %400 = arith.negf %399 : vector<2x32xf32>
    %401 = math.exp %400 : vector<2x32xf32>
    %cst_181 = arith.constant 1.000000e+00 : f32
    %402 = vector.broadcast %cst_181 : f32 to vector<2x32xf32>
    %403 = arith.addf %402, %401 : vector<2x32xf32>
    %404 = arith.divf %402, %403 : vector<2x32xf32>
    %405 = vector.extract_strided_slice %168 {offsets = [0, 5, 0], sizes = [2, 1, 32], strides = [1, 1, 1]} : vector<2x8x32xf32> to vector<2x1x32xf32>
    %406 = vector.shape_cast %405 : vector<2x1x32xf32> to vector<2x32xf32>
    %cst_182 = arith.constant dense<0.000000e+00> : vector<2x32xf32>
    %407 = tpu.matmul %383, %182, %cst_182 {dimension_numbers = #tpu.dot_dimension_numbers<[1], [0], [0], [1], [0, 0, 1, 1], [], []>} : vector<2x32xf32>, vector<32x32xf32>, vector<2x32xf32> -> vector<2x32xf32>
    %408 = arith.addf %406, %407 : vector<2x32xf32>
    %409 = math.tanh %408 : vector<2x32xf32>
    %410 = vector.extract_strided_slice %176 {offsets = [0, 5, 0], sizes = [2, 1, 32], strides = [1, 1, 1]} : vector<2x8x32xf32> to vector<2x1x32xf32>
    %411 = vector.shape_cast %410 : vector<2x1x32xf32> to vector<2x32xf32>
    %cst_183 = arith.constant dense<0.000000e+00> : vector<2x32xf32>
    %412 = tpu.matmul %383, %184, %cst_183 {dimension_numbers = #tpu.dot_dimension_numbers<[1], [0], [0], [1], [0, 0, 1, 1], [], []>} : vector<2x32xf32>, vector<32x32xf32>, vector<2x32xf32> -> vector<2x32xf32>
    %413 = arith.addf %411, %412 : vector<2x32xf32>
    %414 = arith.negf %413 : vector<2x32xf32>
    %415 = math.exp %414 : vector<2x32xf32>
    %cst_184 = arith.constant 1.000000e+00 : f32
    %416 = vector.broadcast %cst_184 : f32 to vector<2x32xf32>
    %417 = arith.addf %416, %415 : vector<2x32xf32>
    %418 = arith.divf %416, %417 : vector<2x32xf32>
    %419 = arith.mulf %404, %381 : vector<2x32xf32>
    %420 = arith.mulf %395, %409 : vector<2x32xf32>
    %421 = arith.addf %419, %420 : vector<2x32xf32>
    %422 = math.tanh %421 : vector<2x32xf32>
    %423 = arith.mulf %418, %422 : vector<2x32xf32>
    %c0_185 = arith.constant 0 : index
    %c5 = arith.constant 5 : index
    %c0_186 = arith.constant 0 : index
    %424 = vector.load %arg12[%c0_185, %c5, %c0_186] : memref<2x8x32xf32, #tpu.memory_space<vmem>>, vector<2x1x32xf32>
    %425 = vector.shape_cast %424 : vector<2x1x32xf32> to vector<2x32xf32>
    %426 = vector.shape_cast %423 : vector<2x32xf32> to vector<2x1x32xf32>
    tpu.vector_store %arg12[%c0_185, %c5, %c0_186], %426 {strides = array<i32>} : memref<2x8x32xf32, #tpu.memory_space<vmem>>, vector<2x1x32xf32>,
    %427 = vector.extract_strided_slice %152 {offsets = [0, 6, 0], sizes = [2, 1, 32], strides = [1, 1, 1]} : vector<2x8x32xf32> to vector<2x1x32xf32>
    %428 = vector.shape_cast %427 : vector<2x1x32xf32> to vector<2x32xf32>
    %cst_187 = arith.constant dense<0.000000e+00> : vector<2x32xf32>
    %429 = tpu.matmul %423, %178, %cst_187 {dimension_numbers = #tpu.dot_dimension_numbers<[1], [0], [0], [1], [0, 0, 1, 1], [], []>} : vector<2x32xf32>, vector<32x32xf32>, vector<2x32xf32> -> vector<2x32xf32>
    %430 = arith.addf %428, %429 : vector<2x32xf32>
    %431 = arith.negf %430 : vector<2x32xf32>
    %432 = math.exp %431 : vector<2x32xf32>
    %cst_188 = arith.constant 1.000000e+00 : f32
    %433 = vector.broadcast %cst_188 : f32 to vector<2x32xf32>
    %434 = arith.addf %433, %432 : vector<2x32xf32>
    %435 = arith.divf %433, %434 : vector<2x32xf32>
    %436 = vector.extract_strided_slice %160 {offsets = [0, 6, 0], sizes = [2, 1, 32], strides = [1, 1, 1]} : vector<2x8x32xf32> to vector<2x1x32xf32>
    %437 = vector.shape_cast %436 : vector<2x1x32xf32> to vector<2x32xf32>
    %cst_189 = arith.constant dense<0.000000e+00> : vector<2x32xf32>
    %438 = tpu.matmul %423, %180, %cst_189 {dimension_numbers = #tpu.dot_dimension_numbers<[1], [0], [0], [1], [0, 0, 1, 1], [], []>} : vector<2x32xf32>, vector<32x32xf32>, vector<2x32xf32> -> vector<2x32xf32>
    %439 = arith.addf %437, %438 : vector<2x32xf32>
    %440 = arith.negf %439 : vector<2x32xf32>
    %441 = math.exp %440 : vector<2x32xf32>
    %cst_190 = arith.constant 1.000000e+00 : f32
    %442 = vector.broadcast %cst_190 : f32 to vector<2x32xf32>
    %443 = arith.addf %442, %441 : vector<2x32xf32>
    %444 = arith.divf %442, %443 : vector<2x32xf32>
    %445 = vector.extract_strided_slice %168 {offsets = [0, 6, 0], sizes = [2, 1, 32], strides = [1, 1, 1]} : vector<2x8x32xf32> to vector<2x1x32xf32>
    %446 = vector.shape_cast %445 : vector<2x1x32xf32> to vector<2x32xf32>
    %cst_191 = arith.constant dense<0.000000e+00> : vector<2x32xf32>
    %447 = tpu.matmul %423, %182, %cst_191 {dimension_numbers = #tpu.dot_dimension_numbers<[1], [0], [0], [1], [0, 0, 1, 1], [], []>} : vector<2x32xf32>, vector<32x32xf32>, vector<2x32xf32> -> vector<2x32xf32>
    %448 = arith.addf %446, %447 : vector<2x32xf32>
    %449 = math.tanh %448 : vector<2x32xf32>
    %450 = vector.extract_strided_slice %176 {offsets = [0, 6, 0], sizes = [2, 1, 32], strides = [1, 1, 1]} : vector<2x8x32xf32> to vector<2x1x32xf32>
    %451 = vector.shape_cast %450 : vector<2x1x32xf32> to vector<2x32xf32>
    %cst_192 = arith.constant dense<0.000000e+00> : vector<2x32xf32>
    %452 = tpu.matmul %423, %184, %cst_192 {dimension_numbers = #tpu.dot_dimension_numbers<[1], [0], [0], [1], [0, 0, 1, 1], [], []>} : vector<2x32xf32>, vector<32x32xf32>, vector<2x32xf32> -> vector<2x32xf32>
    %453 = arith.addf %451, %452 : vector<2x32xf32>
    %454 = arith.negf %453 : vector<2x32xf32>
    %455 = math.exp %454 : vector<2x32xf32>
    %cst_193 = arith.constant 1.000000e+00 : f32
    %456 = vector.broadcast %cst_193 : f32 to vector<2x32xf32>
    %457 = arith.addf %456, %455 : vector<2x32xf32>
    %458 = arith.divf %456, %457 : vector<2x32xf32>
    %459 = arith.mulf %444, %421 : vector<2x32xf32>
    %460 = arith.mulf %435, %449 : vector<2x32xf32>
    %461 = arith.addf %459, %460 : vector<2x32xf32>
    %462 = math.tanh %461 : vector<2x32xf32>
    %463 = arith.mulf %458, %462 : vector<2x32xf32>
    %c0_194 = arith.constant 0 : index
    %c6 = arith.constant 6 : index
    %c0_195 = arith.constant 0 : index
    %464 = vector.load %arg12[%c0_194, %c6, %c0_195] : memref<2x8x32xf32, #tpu.memory_space<vmem>>, vector<2x1x32xf32>
    %465 = vector.shape_cast %464 : vector<2x1x32xf32> to vector<2x32xf32>
    %466 = vector.shape_cast %463 : vector<2x32xf32> to vector<2x1x32xf32>
    tpu.vector_store %arg12[%c0_194, %c6, %c0_195], %466 {strides = array<i32>} : memref<2x8x32xf32, #tpu.memory_space<vmem>>, vector<2x1x32xf32>,
    %467 = vector.extract_strided_slice %152 {offsets = [0, 7, 0], sizes = [2, 1, 32], strides = [1, 1, 1]} : vector<2x8x32xf32> to vector<2x1x32xf32>
    %468 = vector.shape_cast %467 : vector<2x1x32xf32> to vector<2x32xf32>
    %cst_196 = arith.constant dense<0.000000e+00> : vector<2x32xf32>
    %469 = tpu.matmul %463, %178, %cst_196 {dimension_numbers = #tpu.dot_dimension_numbers<[1], [0], [0], [1], [0, 0, 1, 1], [], []>} : vector<2x32xf32>, vector<32x32xf32>, vector<2x32xf32> -> vector<2x32xf32>
    %470 = arith.addf %468, %469 : vector<2x32xf32>
    %471 = arith.negf %470 : vector<2x32xf32>
    %472 = math.exp %471 : vector<2x32xf32>
    %cst_197 = arith.constant 1.000000e+00 : f32
    %473 = vector.broadcast %cst_197 : f32 to vector<2x32xf32>
    %474 = arith.addf %473, %472 : vector<2x32xf32>
    %475 = arith.divf %473, %474 : vector<2x32xf32>
    %476 = vector.extract_strided_slice %160 {offsets = [0, 7, 0], sizes = [2, 1, 32], strides = [1, 1, 1]} : vector<2x8x32xf32> to vector<2x1x32xf32>
    %477 = vector.shape_cast %476 : vector<2x1x32xf32> to vector<2x32xf32>
    %cst_198 = arith.constant dense<0.000000e+00> : vector<2x32xf32>
    %478 = tpu.matmul %463, %180, %cst_198 {dimension_numbers = #tpu.dot_dimension_numbers<[1], [0], [0], [1], [0, 0, 1, 1], [], []>} : vector<2x32xf32>, vector<32x32xf32>, vector<2x32xf32> -> vector<2x32xf32>
    %479 = arith.addf %477, %478 : vector<2x32xf32>
    %480 = arith.negf %479 : vector<2x32xf32>
    %481 = math.exp %480 : vector<2x32xf32>
    %cst_199 = arith.constant 1.000000e+00 : f32
    %482 = vector.broadcast %cst_199 : f32 to vector<2x32xf32>
    %483 = arith.addf %482, %481 : vector<2x32xf32>
    %484 = arith.divf %482, %483 : vector<2x32xf32>
    %485 = vector.extract_strided_slice %168 {offsets = [0, 7, 0], sizes = [2, 1, 32], strides = [1, 1, 1]} : vector<2x8x32xf32> to vector<2x1x32xf32>
    %486 = vector.shape_cast %485 : vector<2x1x32xf32> to vector<2x32xf32>
    %cst_200 = arith.constant dense<0.000000e+00> : vector<2x32xf32>
    %487 = tpu.matmul %463, %182, %cst_200 {dimension_numbers = #tpu.dot_dimension_numbers<[1], [0], [0], [1], [0, 0, 1, 1], [], []>} : vector<2x32xf32>, vector<32x32xf32>, vector<2x32xf32> -> vector<2x32xf32>
    %488 = arith.addf %486, %487 : vector<2x32xf32>
    %489 = math.tanh %488 : vector<2x32xf32>
    %490 = vector.extract_strided_slice %176 {offsets = [0, 7, 0], sizes = [2, 1, 32], strides = [1, 1, 1]} : vector<2x8x32xf32> to vector<2x1x32xf32>
    %491 = vector.shape_cast %490 : vector<2x1x32xf32> to vector<2x32xf32>
    %cst_201 = arith.constant dense<0.000000e+00> : vector<2x32xf32>
    %492 = tpu.matmul %463, %184, %cst_201 {dimension_numbers = #tpu.dot_dimension_numbers<[1], [0], [0], [1], [0, 0, 1, 1], [], []>} : vector<2x32xf32>, vector<32x32xf32>, vector<2x32xf32> -> vector<2x32xf32>
    %493 = arith.addf %491, %492 : vector<2x32xf32>
    %494 = arith.negf %493 : vector<2x32xf32>
    %495 = math.exp %494 : vector<2x32xf32>
    %cst_202 = arith.constant 1.000000e+00 : f32
    %496 = vector.broadcast %cst_202 : f32 to vector<2x32xf32>
    %497 = arith.addf %496, %495 : vector<2x32xf32>
    %498 = arith.divf %496, %497 : vector<2x32xf32>
    %499 = arith.mulf %484, %461 : vector<2x32xf32>
    %500 = arith.mulf %475, %489 : vector<2x32xf32>
    %501 = arith.addf %499, %500 : vector<2x32xf32>
    %502 = math.tanh %501 : vector<2x32xf32>
    %503 = arith.mulf %498, %502 : vector<2x32xf32>
    %c0_203 = arith.constant 0 : index
    %c7 = arith.constant 7 : index
    %c0_204 = arith.constant 0 : index
    %504 = vector.load %arg12[%c0_203, %c7, %c0_204] : memref<2x8x32xf32, #tpu.memory_space<vmem>>, vector<2x1x32xf32>
    %505 = vector.shape_cast %504 : vector<2x1x32xf32> to vector<2x32xf32>
    %506 = vector.shape_cast %503 : vector<2x32xf32> to vector<2x1x32xf32>
    tpu.vector_store %arg12[%c0_203, %c7, %c0_204], %506 {strides = array<i32>} : memref<2x8x32xf32, #tpu.memory_space<vmem>>, vector<2x1x32xf32>,
    %c0_205 = arith.constant 0 : index
    %c0_206 = arith.constant 0 : index
    %c0_207 = arith.constant 0 : index
    %507 = vector.load %arg12[%c0_205, %c0_206, %c0_207] : memref<2x8x32xf32, #tpu.memory_space<vmem>>, vector<2x8x32xf32>
    %508 = vector.shape_cast %507 : vector<2x8x32xf32> to vector<16x32xf32>
    %c1_208 = arith.constant 1 : index
    %c0_209 = arith.constant 0 : index
    %c0_210 = arith.constant 0 : index
    %c0_211 = arith.constant 0 : index
    %509 = vector.load %arg6[%c1_208, %c0_209, %c0_210, %c0_211] : memref<2x4x32x32xf32, #tpu.memory_space<vmem>>, vector<1x1x32x32xf32>
    %510 = vector.shape_cast %509 : vector<1x1x32x32xf32> to vector<32x32xf32>
    %cst_212 = arith.constant dense<0.000000e+00> : vector<16x32xf32>
    %511 = tpu.matmul %508, %510, %cst_212 {dimension_numbers = #tpu.dot_dimension_numbers<[1], [0], [0], [1], [0, 0, 1, 1], [], []>} : vector<16x32xf32>, vector<32x32xf32>, vector<16x32xf32> -> vector<16x32xf32>
    %c1_213 = arith.constant 1 : index
    %c0_214 = arith.constant 0 : index
    %c0_215 = arith.constant 0 : index
    %c0_216 = arith.constant 0 : index
    %512 = vector.load %arg8[%c1_213, %c0_214, %c0_215, %c0_216] : memref<2x4x1x32xf32, #tpu.memory_space<vmem>>, vector<1x1x1x32xf32>
    %513 = vector.shape_cast %512 : vector<1x1x1x32xf32> to vector<1x32xf32>
    %514 = vector.broadcast %513 : vector<1x32xf32> to vector<16x32xf32>
    %515 = arith.addf %511, %514 : vector<16x32xf32>
    %516 = vector.shape_cast %515 : vector<16x32xf32> to vector<2x8x32xf32>
    %c1_217 = arith.constant 1 : index
    %c1_218 = arith.constant 1 : index
    %c0_219 = arith.constant 0 : index
    %c0_220 = arith.constant 0 : index
    %517 = vector.load %arg6[%c1_217, %c1_218, %c0_219, %c0_220] : memref<2x4x32x32xf32, #tpu.memory_space<vmem>>, vector<1x1x32x32xf32>
    %518 = vector.shape_cast %517 : vector<1x1x32x32xf32> to vector<32x32xf32>
    %cst_221 = arith.constant dense<0.000000e+00> : vector<16x32xf32>
    %519 = tpu.matmul %508, %518, %cst_221 {dimension_numbers = #tpu.dot_dimension_numbers<[1], [0], [0], [1], [0, 0, 1, 1], [], []>} : vector<16x32xf32>, vector<32x32xf32>, vector<16x32xf32> -> vector<16x32xf32>
    %c1_222 = arith.constant 1 : index
    %c1_223 = arith.constant 1 : index
    %c0_224 = arith.constant 0 : index
    %c0_225 = arith.constant 0 : index
    %520 = vector.load %arg8[%c1_222, %c1_223, %c0_224, %c0_225] : memref<2x4x1x32xf32, #tpu.memory_space<vmem>>, vector<1x1x1x32xf32>
    %521 = vector.shape_cast %520 : vector<1x1x1x32xf32> to vector<1x32xf32>
    %522 = vector.broadcast %521 : vector<1x32xf32> to vector<16x32xf32>
    %523 = arith.addf %519, %522 : vector<16x32xf32>
    %524 = vector.shape_cast %523 : vector<16x32xf32> to vector<2x8x32xf32>
    %c1_226 = arith.constant 1 : index
    %c2_227 = arith.constant 2 : index
    %c0_228 = arith.constant 0 : index
    %c0_229 = arith.constant 0 : index
    %525 = vector.load %arg6[%c1_226, %c2_227, %c0_228, %c0_229] : memref<2x4x32x32xf32, #tpu.memory_space<vmem>>, vector<1x1x32x32xf32>
    %526 = vector.shape_cast %525 : vector<1x1x32x32xf32> to vector<32x32xf32>
    %cst_230 = arith.constant dense<0.000000e+00> : vector<16x32xf32>
    %527 = tpu.matmul %508, %526, %cst_230 {dimension_numbers = #tpu.dot_dimension_numbers<[1], [0], [0], [1], [0, 0, 1, 1], [], []>} : vector<16x32xf32>, vector<32x32xf32>, vector<16x32xf32> -> vector<16x32xf32>
    %c1_231 = arith.constant 1 : index
    %c2_232 = arith.constant 2 : index
    %c0_233 = arith.constant 0 : index
    %c0_234 = arith.constant 0 : index
    %528 = vector.load %arg8[%c1_231, %c2_232, %c0_233, %c0_234] : memref<2x4x1x32xf32, #tpu.memory_space<vmem>>, vector<1x1x1x32xf32>
    %529 = vector.shape_cast %528 : vector<1x1x1x32xf32> to vector<1x32xf32>
    %530 = vector.broadcast %529 : vector<1x32xf32> to vector<16x32xf32>
    %531 = arith.addf %527, %530 : vector<16x32xf32>
    %532 = vector.shape_cast %531 : vector<16x32xf32> to vector<2x8x32xf32>
    %c1_235 = arith.constant 1 : index
    %c3_236 = arith.constant 3 : index
    %c0_237 = arith.constant 0 : index
    %c0_238 = arith.constant 0 : index
    %533 = vector.load %arg6[%c1_235, %c3_236, %c0_237, %c0_238] : memref<2x4x32x32xf32, #tpu.memory_space<vmem>>, vector<1x1x32x32xf32>
    %534 = vector.shape_cast %533 : vector<1x1x32x32xf32> to vector<32x32xf32>
    %cst_239 = arith.constant dense<0.000000e+00> : vector<16x32xf32>
    %535 = tpu.matmul %508, %534, %cst_239 {dimension_numbers = #tpu.dot_dimension_numbers<[1], [0], [0], [1], [0, 0, 1, 1], [], []>} : vector<16x32xf32>, vector<32x32xf32>, vector<16x32xf32> -> vector<16x32xf32>
    %c1_240 = arith.constant 1 : index
    %c3_241 = arith.constant 3 : index
    %c0_242 = arith.constant 0 : index
    %c0_243 = arith.constant 0 : index
    %536 = vector.load %arg8[%c1_240, %c3_241, %c0_242, %c0_243] : memref<2x4x1x32xf32, #tpu.memory_space<vmem>>, vector<1x1x1x32xf32>
    %537 = vector.shape_cast %536 : vector<1x1x1x32xf32> to vector<1x32xf32>
    %538 = vector.broadcast %537 : vector<1x32xf32> to vector<16x32xf32>
    %539 = arith.addf %535, %538 : vector<16x32xf32>
    %540 = vector.shape_cast %539 : vector<16x32xf32> to vector<2x8x32xf32>
    %c1_244 = arith.constant 1 : index
    %c0_245 = arith.constant 0 : index
    %c0_246 = arith.constant 0 : index
    %c0_247 = arith.constant 0 : index
    %541 = vector.load %arg7[%c1_244, %c0_245, %c0_246, %c0_247] : memref<2x4x32x32xf32, #tpu.memory_space<vmem>>, vector<1x1x32x32xf32>
    %542 = vector.shape_cast %541 : vector<1x1x32x32xf32> to vector<32x32xf32>
    %c1_248 = arith.constant 1 : index
    %c1_249 = arith.constant 1 : index
    %c0_250 = arith.constant 0 : index
    %c0_251 = arith.constant 0 : index
    %543 = vector.load %arg7[%c1_248, %c1_249, %c0_250, %c0_251] : memref<2x4x32x32xf32, #tpu.memory_space<vmem>>, vector<1x1x32x32xf32>
    %544 = vector.shape_cast %543 : vector<1x1x32x32xf32> to vector<32x32xf32>
    %c1_252 = arith.constant 1 : index
    %c2_253 = arith.constant 2 : index
    %c0_254 = arith.constant 0 : index
    %c0_255 = arith.constant 0 : index
    %545 = vector.load %arg7[%c1_252, %c2_253, %c0_254, %c0_255] : memref<2x4x32x32xf32, #tpu.memory_space<vmem>>, vector<1x1x32x32xf32>
    %546 = vector.shape_cast %545 : vector<1x1x32x32xf32> to vector<32x32xf32>
    %c1_256 = arith.constant 1 : index
    %c3_257 = arith.constant 3 : index
    %c0_258 = arith.constant 0 : index
    %c0_259 = arith.constant 0 : index
    %547 = vector.load %arg7[%c1_256, %c3_257, %c0_258, %c0_259] : memref<2x4x32x32xf32, #tpu.memory_space<vmem>>, vector<1x1x32x32xf32>
    %548 = vector.shape_cast %547 : vector<1x1x32x32xf32> to vector<32x32xf32>
    %cst_260 = arith.constant 0.000000e+00 : f32
    %549 = vector.broadcast %cst_260 : f32 to vector<2x32xf32>
    %cst_261 = arith.constant 0.000000e+00 : f32
    %550 = vector.broadcast %cst_261 : f32 to vector<2x32xf32>
    %551 = vector.extract_strided_slice %516 {offsets = [0, 0, 0], sizes = [2, 1, 32], strides = [1, 1, 1]} : vector<2x8x32xf32> to vector<2x1x32xf32>
    %552 = vector.shape_cast %551 : vector<2x1x32xf32> to vector<2x32xf32>
    %cst_262 = arith.constant dense<0.000000e+00> : vector<2x32xf32>
    %553 = tpu.matmul %549, %542, %cst_262 {dimension_numbers = #tpu.dot_dimension_numbers<[1], [0], [0], [1], [0, 0, 1, 1], [], []>} : vector<2x32xf32>, vector<32x32xf32>, vector<2x32xf32> -> vector<2x32xf32>
    %554 = arith.addf %552, %553 : vector<2x32xf32>
    %555 = arith.negf %554 : vector<2x32xf32>
    %556 = math.exp %555 : vector<2x32xf32>
    %cst_263 = arith.constant 1.000000e+00 : f32
    %557 = vector.broadcast %cst_263 : f32 to vector<2x32xf32>
    %558 = arith.addf %557, %556 : vector<2x32xf32>
    %559 = arith.divf %557, %558 : vector<2x32xf32>
    %560 = vector.extract_strided_slice %524 {offsets = [0, 0, 0], sizes = [2, 1, 32], strides = [1, 1, 1]} : vector<2x8x32xf32> to vector<2x1x32xf32>
    %561 = vector.shape_cast %560 : vector<2x1x32xf32> to vector<2x32xf32>
    %cst_264 = arith.constant dense<0.000000e+00> : vector<2x32xf32>
    %562 = tpu.matmul %549, %544, %cst_264 {dimension_numbers = #tpu.dot_dimension_numbers<[1], [0], [0], [1], [0, 0, 1, 1], [], []>} : vector<2x32xf32>, vector<32x32xf32>, vector<2x32xf32> -> vector<2x32xf32>
    %563 = arith.addf %561, %562 : vector<2x32xf32>
    %564 = arith.negf %563 : vector<2x32xf32>
    %565 = math.exp %564 : vector<2x32xf32>
    %cst_265 = arith.constant 1.000000e+00 : f32
    %566 = vector.broadcast %cst_265 : f32 to vector<2x32xf32>
    %567 = arith.addf %566, %565 : vector<2x32xf32>
    %568 = arith.divf %566, %567 : vector<2x32xf32>
    %569 = vector.extract_strided_slice %532 {offsets = [0, 0, 0], sizes = [2, 1, 32], strides = [1, 1, 1]} : vector<2x8x32xf32> to vector<2x1x32xf32>
    %570 = vector.shape_cast %569 : vector<2x1x32xf32> to vector<2x32xf32>
    %cst_266 = arith.constant dense<0.000000e+00> : vector<2x32xf32>
    %571 = tpu.matmul %549, %546, %cst_266 {dimension_numbers = #tpu.dot_dimension_numbers<[1], [0], [0], [1], [0, 0, 1, 1], [], []>} : vector<2x32xf32>, vector<32x32xf32>, vector<2x32xf32> -> vector<2x32xf32>
    %572 = arith.addf %570, %571 : vector<2x32xf32>
    %573 = math.tanh %572 : vector<2x32xf32>
    %574 = vector.extract_strided_slice %540 {offsets = [0, 0, 0], sizes = [2, 1, 32], strides = [1, 1, 1]} : vector<2x8x32xf32> to vector<2x1x32xf32>
    %575 = vector.shape_cast %574 : vector<2x1x32xf32> to vector<2x32xf32>
    %cst_267 = arith.constant dense<0.000000e+00> : vector<2x32xf32>
    %576 = tpu.matmul %549, %548, %cst_267 {dimension_numbers = #tpu.dot_dimension_numbers<[1], [0], [0], [1], [0, 0, 1, 1], [], []>} : vector<2x32xf32>, vector<32x32xf32>, vector<2x32xf32> -> vector<2x32xf32>
    %577 = arith.addf %575, %576 : vector<2x32xf32>
    %578 = arith.negf %577 : vector<2x32xf32>
    %579 = math.exp %578 : vector<2x32xf32>
    %cst_268 = arith.constant 1.000000e+00 : f32
    %580 = vector.broadcast %cst_268 : f32 to vector<2x32xf32>
    %581 = arith.addf %580, %579 : vector<2x32xf32>
    %582 = arith.divf %580, %581 : vector<2x32xf32>
    %583 = arith.mulf %568, %550 : vector<2x32xf32>
    %584 = arith.mulf %559, %573 : vector<2x32xf32>
    %585 = arith.addf %583, %584 : vector<2x32xf32>
    %586 = math.tanh %585 : vector<2x32xf32>
    %587 = arith.mulf %582, %586 : vector<2x32xf32>
    %c0_269 = arith.constant 0 : index
    %c0_270 = arith.constant 0 : index
    %c0_271 = arith.constant 0 : index
    %588 = vector.load %arg12[%c0_269, %c0_270, %c0_271] : memref<2x8x32xf32, #tpu.memory_space<vmem>>, vector<2x1x32xf32>
    %589 = vector.shape_cast %588 : vector<2x1x32xf32> to vector<2x32xf32>
    %590 = vector.shape_cast %587 : vector<2x32xf32> to vector<2x1x32xf32>
    tpu.vector_store %arg12[%c0_269, %c0_270, %c0_271], %590 {strides = array<i32>} : memref<2x8x32xf32, #tpu.memory_space<vmem>>, vector<2x1x32xf32>,
    %591 = vector.extract_strided_slice %516 {offsets = [0, 1, 0], sizes = [2, 1, 32], strides = [1, 1, 1]} : vector<2x8x32xf32> to vector<2x1x32xf32>
    %592 = vector.shape_cast %591 : vector<2x1x32xf32> to vector<2x32xf32>
    %cst_272 = arith.constant dense<0.000000e+00> : vector<2x32xf32>
    %593 = tpu.matmul %587, %542, %cst_272 {dimension_numbers = #tpu.dot_dimension_numbers<[1], [0], [0], [1], [0, 0, 1, 1], [], []>} : vector<2x32xf32>, vector<32x32xf32>, vector<2x32xf32> -> vector<2x32xf32>
    %594 = arith.addf %592, %593 : vector<2x32xf32>
    %595 = arith.negf %594 : vector<2x32xf32>
    %596 = math.exp %595 : vector<2x32xf32>
    %cst_273 = arith.constant 1.000000e+00 : f32
    %597 = vector.broadcast %cst_273 : f32 to vector<2x32xf32>
    %598 = arith.addf %597, %596 : vector<2x32xf32>
    %599 = arith.divf %597, %598 : vector<2x32xf32>
    %600 = vector.extract_strided_slice %524 {offsets = [0, 1, 0], sizes = [2, 1, 32], strides = [1, 1, 1]} : vector<2x8x32xf32> to vector<2x1x32xf32>
    %601 = vector.shape_cast %600 : vector<2x1x32xf32> to vector<2x32xf32>
    %cst_274 = arith.constant dense<0.000000e+00> : vector<2x32xf32>
    %602 = tpu.matmul %587, %544, %cst_274 {dimension_numbers = #tpu.dot_dimension_numbers<[1], [0], [0], [1], [0, 0, 1, 1], [], []>} : vector<2x32xf32>, vector<32x32xf32>, vector<2x32xf32> -> vector<2x32xf32>
    %603 = arith.addf %601, %602 : vector<2x32xf32>
    %604 = arith.negf %603 : vector<2x32xf32>
    %605 = math.exp %604 : vector<2x32xf32>
    %cst_275 = arith.constant 1.000000e+00 : f32
    %606 = vector.broadcast %cst_275 : f32 to vector<2x32xf32>
    %607 = arith.addf %606, %605 : vector<2x32xf32>
    %608 = arith.divf %606, %607 : vector<2x32xf32>
    %609 = vector.extract_strided_slice %532 {offsets = [0, 1, 0], sizes = [2, 1, 32], strides = [1, 1, 1]} : vector<2x8x32xf32> to vector<2x1x32xf32>
    %610 = vector.shape_cast %609 : vector<2x1x32xf32> to vector<2x32xf32>
    %cst_276 = arith.constant dense<0.000000e+00> : vector<2x32xf32>
    %611 = tpu.matmul %587, %546, %cst_276 {dimension_numbers = #tpu.dot_dimension_numbers<[1], [0], [0], [1], [0, 0, 1, 1], [], []>} : vector<2x32xf32>, vector<32x32xf32>, vector<2x32xf32> -> vector<2x32xf32>
    %612 = arith.addf %610, %611 : vector<2x32xf32>
    %613 = math.tanh %612 : vector<2x32xf32>
    %614 = vector.extract_strided_slice %540 {offsets = [0, 1, 0], sizes = [2, 1, 32], strides = [1, 1, 1]} : vector<2x8x32xf32> to vector<2x1x32xf32>
    %615 = vector.shape_cast %614 : vector<2x1x32xf32> to vector<2x32xf32>
    %cst_277 = arith.constant dense<0.000000e+00> : vector<2x32xf32>
    %616 = tpu.matmul %587, %548, %cst_277 {dimension_numbers = #tpu.dot_dimension_numbers<[1], [0], [0], [1], [0, 0, 1, 1], [], []>} : vector<2x32xf32>, vector<32x32xf32>, vector<2x32xf32> -> vector<2x32xf32>
    %617 = arith.addf %615, %616 : vector<2x32xf32>
    %618 = arith.negf %617 : vector<2x32xf32>
    %619 = math.exp %618 : vector<2x32xf32>
    %cst_278 = arith.constant 1.000000e+00 : f32
    %620 = vector.broadcast %cst_278 : f32 to vector<2x32xf32>
    %621 = arith.addf %620, %619 : vector<2x32xf32>
    %622 = arith.divf %620, %621 : vector<2x32xf32>
    %623 = arith.mulf %608, %585 : vector<2x32xf32>
    %624 = arith.mulf %599, %613 : vector<2x32xf32>
    %625 = arith.addf %623, %624 : vector<2x32xf32>
    %626 = math.tanh %625 : vector<2x32xf32>
    %627 = arith.mulf %622, %626 : vector<2x32xf32>
    %c0_279 = arith.constant 0 : index
    %c1_280 = arith.constant 1 : index
    %c0_281 = arith.constant 0 : index
    %628 = vector.load %arg12[%c0_279, %c1_280, %c0_281] : memref<2x8x32xf32, #tpu.memory_space<vmem>>, vector<2x1x32xf32>
    %629 = vector.shape_cast %628 : vector<2x1x32xf32> to vector<2x32xf32>
    %630 = vector.shape_cast %627 : vector<2x32xf32> to vector<2x1x32xf32>
    tpu.vector_store %arg12[%c0_279, %c1_280, %c0_281], %630 {strides = array<i32>} : memref<2x8x32xf32, #tpu.memory_space<vmem>>, vector<2x1x32xf32>,
    %631 = vector.extract_strided_slice %516 {offsets = [0, 2, 0], sizes = [2, 1, 32], strides = [1, 1, 1]} : vector<2x8x32xf32> to vector<2x1x32xf32>
    %632 = vector.shape_cast %631 : vector<2x1x32xf32> to vector<2x32xf32>
    %cst_282 = arith.constant dense<0.000000e+00> : vector<2x32xf32>
    %633 = tpu.matmul %627, %542, %cst_282 {dimension_numbers = #tpu.dot_dimension_numbers<[1], [0], [0], [1], [0, 0, 1, 1], [], []>} : vector<2x32xf32>, vector<32x32xf32>, vector<2x32xf32> -> vector<2x32xf32>
    %634 = arith.addf %632, %633 : vector<2x32xf32>
    %635 = arith.negf %634 : vector<2x32xf32>
    %636 = math.exp %635 : vector<2x32xf32>
    %cst_283 = arith.constant 1.000000e+00 : f32
    %637 = vector.broadcast %cst_283 : f32 to vector<2x32xf32>
    %638 = arith.addf %637, %636 : vector<2x32xf32>
    %639 = arith.divf %637, %638 : vector<2x32xf32>
    %640 = vector.extract_strided_slice %524 {offsets = [0, 2, 0], sizes = [2, 1, 32], strides = [1, 1, 1]} : vector<2x8x32xf32> to vector<2x1x32xf32>
    %641 = vector.shape_cast %640 : vector<2x1x32xf32> to vector<2x32xf32>
    %cst_284 = arith.constant dense<0.000000e+00> : vector<2x32xf32>
    %642 = tpu.matmul %627, %544, %cst_284 {dimension_numbers = #tpu.dot_dimension_numbers<[1], [0], [0], [1], [0, 0, 1, 1], [], []>} : vector<2x32xf32>, vector<32x32xf32>, vector<2x32xf32> -> vector<2x32xf32>
    %643 = arith.addf %641, %642 : vector<2x32xf32>
    %644 = arith.negf %643 : vector<2x32xf32>
    %645 = math.exp %644 : vector<2x32xf32>
    %cst_285 = arith.constant 1.000000e+00 : f32
    %646 = vector.broadcast %cst_285 : f32 to vector<2x32xf32>
    %647 = arith.addf %646, %645 : vector<2x32xf32>
    %648 = arith.divf %646, %647 : vector<2x32xf32>
    %649 = vector.extract_strided_slice %532 {offsets = [0, 2, 0], sizes = [2, 1, 32], strides = [1, 1, 1]} : vector<2x8x32xf32> to vector<2x1x32xf32>
    %650 = vector.shape_cast %649 : vector<2x1x32xf32> to vector<2x32xf32>
    %cst_286 = arith.constant dense<0.000000e+00> : vector<2x32xf32>
    %651 = tpu.matmul %627, %546, %cst_286 {dimension_numbers = #tpu.dot_dimension_numbers<[1], [0], [0], [1], [0, 0, 1, 1], [], []>} : vector<2x32xf32>, vector<32x32xf32>, vector<2x32xf32> -> vector<2x32xf32>
    %652 = arith.addf %650, %651 : vector<2x32xf32>
    %653 = math.tanh %652 : vector<2x32xf32>
    %654 = vector.extract_strided_slice %540 {offsets = [0, 2, 0], sizes = [2, 1, 32], strides = [1, 1, 1]} : vector<2x8x32xf32> to vector<2x1x32xf32>
    %655 = vector.shape_cast %654 : vector<2x1x32xf32> to vector<2x32xf32>
    %cst_287 = arith.constant dense<0.000000e+00> : vector<2x32xf32>
    %656 = tpu.matmul %627, %548, %cst_287 {dimension_numbers = #tpu.dot_dimension_numbers<[1], [0], [0], [1], [0, 0, 1, 1], [], []>} : vector<2x32xf32>, vector<32x32xf32>, vector<2x32xf32> -> vector<2x32xf32>
    %657 = arith.addf %655, %656 : vector<2x32xf32>
    %658 = arith.negf %657 : vector<2x32xf32>
    %659 = math.exp %658 : vector<2x32xf32>
    %cst_288 = arith.constant 1.000000e+00 : f32
    %660 = vector.broadcast %cst_288 : f32 to vector<2x32xf32>
    %661 = arith.addf %660, %659 : vector<2x32xf32>
    %662 = arith.divf %660, %661 : vector<2x32xf32>
    %663 = arith.mulf %648, %625 : vector<2x32xf32>
    %664 = arith.mulf %639, %653 : vector<2x32xf32>
    %665 = arith.addf %663, %664 : vector<2x32xf32>
    %666 = math.tanh %665 : vector<2x32xf32>
    %667 = arith.mulf %662, %666 : vector<2x32xf32>
    %c0_289 = arith.constant 0 : index
    %c2_290 = arith.constant 2 : index
    %c0_291 = arith.constant 0 : index
    %668 = vector.load %arg12[%c0_289, %c2_290, %c0_291] : memref<2x8x32xf32, #tpu.memory_space<vmem>>, vector<2x1x32xf32>
    %669 = vector.shape_cast %668 : vector<2x1x32xf32> to vector<2x32xf32>
    %670 = vector.shape_cast %667 : vector<2x32xf32> to vector<2x1x32xf32>
    tpu.vector_store %arg12[%c0_289, %c2_290, %c0_291], %670 {strides = array<i32>} : memref<2x8x32xf32, #tpu.memory_space<vmem>>, vector<2x1x32xf32>,
    %671 = vector.extract_strided_slice %516 {offsets = [0, 3, 0], sizes = [2, 1, 32], strides = [1, 1, 1]} : vector<2x8x32xf32> to vector<2x1x32xf32>
    %672 = vector.shape_cast %671 : vector<2x1x32xf32> to vector<2x32xf32>
    %cst_292 = arith.constant dense<0.000000e+00> : vector<2x32xf32>
    %673 = tpu.matmul %667, %542, %cst_292 {dimension_numbers = #tpu.dot_dimension_numbers<[1], [0], [0], [1], [0, 0, 1, 1], [], []>} : vector<2x32xf32>, vector<32x32xf32>, vector<2x32xf32> -> vector<2x32xf32>
    %674 = arith.addf %672, %673 : vector<2x32xf32>
    %675 = arith.negf %674 : vector<2x32xf32>
    %676 = math.exp %675 : vector<2x32xf32>
    %cst_293 = arith.constant 1.000000e+00 : f32
    %677 = vector.broadcast %cst_293 : f32 to vector<2x32xf32>
    %678 = arith.addf %677, %676 : vector<2x32xf32>
    %679 = arith.divf %677, %678 : vector<2x32xf32>
    %680 = vector.extract_strided_slice %524 {offsets = [0, 3, 0], sizes = [2, 1, 32], strides = [1, 1, 1]} : vector<2x8x32xf32> to vector<2x1x32xf32>
    %681 = vector.shape_cast %680 : vector<2x1x32xf32> to vector<2x32xf32>
    %cst_294 = arith.constant dense<0.000000e+00> : vector<2x32xf32>
    %682 = tpu.matmul %667, %544, %cst_294 {dimension_numbers = #tpu.dot_dimension_numbers<[1], [0], [0], [1], [0, 0, 1, 1], [], []>} : vector<2x32xf32>, vector<32x32xf32>, vector<2x32xf32> -> vector<2x32xf32>
    %683 = arith.addf %681, %682 : vector<2x32xf32>
    %684 = arith.negf %683 : vector<2x32xf32>
    %685 = math.exp %684 : vector<2x32xf32>
    %cst_295 = arith.constant 1.000000e+00 : f32
    %686 = vector.broadcast %cst_295 : f32 to vector<2x32xf32>
    %687 = arith.addf %686, %685 : vector<2x32xf32>
    %688 = arith.divf %686, %687 : vector<2x32xf32>
    %689 = vector.extract_strided_slice %532 {offsets = [0, 3, 0], sizes = [2, 1, 32], strides = [1, 1, 1]} : vector<2x8x32xf32> to vector<2x1x32xf32>
    %690 = vector.shape_cast %689 : vector<2x1x32xf32> to vector<2x32xf32>
    %cst_296 = arith.constant dense<0.000000e+00> : vector<2x32xf32>
    %691 = tpu.matmul %667, %546, %cst_296 {dimension_numbers = #tpu.dot_dimension_numbers<[1], [0], [0], [1], [0, 0, 1, 1], [], []>} : vector<2x32xf32>, vector<32x32xf32>, vector<2x32xf32> -> vector<2x32xf32>
    %692 = arith.addf %690, %691 : vector<2x32xf32>
    %693 = math.tanh %692 : vector<2x32xf32>
    %694 = vector.extract_strided_slice %540 {offsets = [0, 3, 0], sizes = [2, 1, 32], strides = [1, 1, 1]} : vector<2x8x32xf32> to vector<2x1x32xf32>
    %695 = vector.shape_cast %694 : vector<2x1x32xf32> to vector<2x32xf32>
    %cst_297 = arith.constant dense<0.000000e+00> : vector<2x32xf32>
    %696 = tpu.matmul %667, %548, %cst_297 {dimension_numbers = #tpu.dot_dimension_numbers<[1], [0], [0], [1], [0, 0, 1, 1], [], []>} : vector<2x32xf32>, vector<32x32xf32>, vector<2x32xf32> -> vector<2x32xf32>
    %697 = arith.addf %695, %696 : vector<2x32xf32>
    %698 = arith.negf %697 : vector<2x32xf32>
    %699 = math.exp %698 : vector<2x32xf32>
    %cst_298 = arith.constant 1.000000e+00 : f32
    %700 = vector.broadcast %cst_298 : f32 to vector<2x32xf32>
    %701 = arith.addf %700, %699 : vector<2x32xf32>
    %702 = arith.divf %700, %701 : vector<2x32xf32>
    %703 = arith.mulf %688, %665 : vector<2x32xf32>
    %704 = arith.mulf %679, %693 : vector<2x32xf32>
    %705 = arith.addf %703, %704 : vector<2x32xf32>
    %706 = math.tanh %705 : vector<2x32xf32>
    %707 = arith.mulf %702, %706 : vector<2x32xf32>
    %c0_299 = arith.constant 0 : index
    %c3_300 = arith.constant 3 : index
    %c0_301 = arith.constant 0 : index
    %708 = vector.load %arg12[%c0_299, %c3_300, %c0_301] : memref<2x8x32xf32, #tpu.memory_space<vmem>>, vector<2x1x32xf32>
    %709 = vector.shape_cast %708 : vector<2x1x32xf32> to vector<2x32xf32>
    %710 = vector.shape_cast %707 : vector<2x32xf32> to vector<2x1x32xf32>
    tpu.vector_store %arg12[%c0_299, %c3_300, %c0_301], %710 {strides = array<i32>} : memref<2x8x32xf32, #tpu.memory_space<vmem>>, vector<2x1x32xf32>,
    %711 = vector.extract_strided_slice %516 {offsets = [0, 4, 0], sizes = [2, 1, 32], strides = [1, 1, 1]} : vector<2x8x32xf32> to vector<2x1x32xf32>
    %712 = vector.shape_cast %711 : vector<2x1x32xf32> to vector<2x32xf32>
    %cst_302 = arith.constant dense<0.000000e+00> : vector<2x32xf32>
    %713 = tpu.matmul %707, %542, %cst_302 {dimension_numbers = #tpu.dot_dimension_numbers<[1], [0], [0], [1], [0, 0, 1, 1], [], []>} : vector<2x32xf32>, vector<32x32xf32>, vector<2x32xf32> -> vector<2x32xf32>
    %714 = arith.addf %712, %713 : vector<2x32xf32>
    %715 = arith.negf %714 : vector<2x32xf32>
    %716 = math.exp %715 : vector<2x32xf32>
    %cst_303 = arith.constant 1.000000e+00 : f32
    %717 = vector.broadcast %cst_303 : f32 to vector<2x32xf32>
    %718 = arith.addf %717, %716 : vector<2x32xf32>
    %719 = arith.divf %717, %718 : vector<2x32xf32>
    %720 = vector.extract_strided_slice %524 {offsets = [0, 4, 0], sizes = [2, 1, 32], strides = [1, 1, 1]} : vector<2x8x32xf32> to vector<2x1x32xf32>
    %721 = vector.shape_cast %720 : vector<2x1x32xf32> to vector<2x32xf32>
    %cst_304 = arith.constant dense<0.000000e+00> : vector<2x32xf32>
    %722 = tpu.matmul %707, %544, %cst_304 {dimension_numbers = #tpu.dot_dimension_numbers<[1], [0], [0], [1], [0, 0, 1, 1], [], []>} : vector<2x32xf32>, vector<32x32xf32>, vector<2x32xf32> -> vector<2x32xf32>
    %723 = arith.addf %721, %722 : vector<2x32xf32>
    %724 = arith.negf %723 : vector<2x32xf32>
    %725 = math.exp %724 : vector<2x32xf32>
    %cst_305 = arith.constant 1.000000e+00 : f32
    %726 = vector.broadcast %cst_305 : f32 to vector<2x32xf32>
    %727 = arith.addf %726, %725 : vector<2x32xf32>
    %728 = arith.divf %726, %727 : vector<2x32xf32>
    %729 = vector.extract_strided_slice %532 {offsets = [0, 4, 0], sizes = [2, 1, 32], strides = [1, 1, 1]} : vector<2x8x32xf32> to vector<2x1x32xf32>
    %730 = vector.shape_cast %729 : vector<2x1x32xf32> to vector<2x32xf32>
    %cst_306 = arith.constant dense<0.000000e+00> : vector<2x32xf32>
    %731 = tpu.matmul %707, %546, %cst_306 {dimension_numbers = #tpu.dot_dimension_numbers<[1], [0], [0], [1], [0, 0, 1, 1], [], []>} : vector<2x32xf32>, vector<32x32xf32>, vector<2x32xf32> -> vector<2x32xf32>
    %732 = arith.addf %730, %731 : vector<2x32xf32>
    %733 = math.tanh %732 : vector<2x32xf32>
    %734 = vector.extract_strided_slice %540 {offsets = [0, 4, 0], sizes = [2, 1, 32], strides = [1, 1, 1]} : vector<2x8x32xf32> to vector<2x1x32xf32>
    %735 = vector.shape_cast %734 : vector<2x1x32xf32> to vector<2x32xf32>
    %cst_307 = arith.constant dense<0.000000e+00> : vector<2x32xf32>
    %736 = tpu.matmul %707, %548, %cst_307 {dimension_numbers = #tpu.dot_dimension_numbers<[1], [0], [0], [1], [0, 0, 1, 1], [], []>} : vector<2x32xf32>, vector<32x32xf32>, vector<2x32xf32> -> vector<2x32xf32>
    %737 = arith.addf %735, %736 : vector<2x32xf32>
    %738 = arith.negf %737 : vector<2x32xf32>
    %739 = math.exp %738 : vector<2x32xf32>
    %cst_308 = arith.constant 1.000000e+00 : f32
    %740 = vector.broadcast %cst_308 : f32 to vector<2x32xf32>
    %741 = arith.addf %740, %739 : vector<2x32xf32>
    %742 = arith.divf %740, %741 : vector<2x32xf32>
    %743 = arith.mulf %728, %705 : vector<2x32xf32>
    %744 = arith.mulf %719, %733 : vector<2x32xf32>
    %745 = arith.addf %743, %744 : vector<2x32xf32>
    %746 = math.tanh %745 : vector<2x32xf32>
    %747 = arith.mulf %742, %746 : vector<2x32xf32>
    %c0_309 = arith.constant 0 : index
    %c4_310 = arith.constant 4 : index
    %c0_311 = arith.constant 0 : index
    %748 = vector.load %arg12[%c0_309, %c4_310, %c0_311] : memref<2x8x32xf32, #tpu.memory_space<vmem>>, vector<2x1x32xf32>
    %749 = vector.shape_cast %748 : vector<2x1x32xf32> to vector<2x32xf32>
    %750 = vector.shape_cast %747 : vector<2x32xf32> to vector<2x1x32xf32>
    tpu.vector_store %arg12[%c0_309, %c4_310, %c0_311], %750 {strides = array<i32>} : memref<2x8x32xf32, #tpu.memory_space<vmem>>, vector<2x1x32xf32>,
    %751 = vector.extract_strided_slice %516 {offsets = [0, 5, 0], sizes = [2, 1, 32], strides = [1, 1, 1]} : vector<2x8x32xf32> to vector<2x1x32xf32>
    %752 = vector.shape_cast %751 : vector<2x1x32xf32> to vector<2x32xf32>
    %cst_312 = arith.constant dense<0.000000e+00> : vector<2x32xf32>
    %753 = tpu.matmul %747, %542, %cst_312 {dimension_numbers = #tpu.dot_dimension_numbers<[1], [0], [0], [1], [0, 0, 1, 1], [], []>} : vector<2x32xf32>, vector<32x32xf32>, vector<2x32xf32> -> vector<2x32xf32>
    %754 = arith.addf %752, %753 : vector<2x32xf32>
    %755 = arith.negf %754 : vector<2x32xf32>
    %756 = math.exp %755 : vector<2x32xf32>
    %cst_313 = arith.constant 1.000000e+00 : f32
    %757 = vector.broadcast %cst_313 : f32 to vector<2x32xf32>
    %758 = arith.addf %757, %756 : vector<2x32xf32>
    %759 = arith.divf %757, %758 : vector<2x32xf32>
    %760 = vector.extract_strided_slice %524 {offsets = [0, 5, 0], sizes = [2, 1, 32], strides = [1, 1, 1]} : vector<2x8x32xf32> to vector<2x1x32xf32>
    %761 = vector.shape_cast %760 : vector<2x1x32xf32> to vector<2x32xf32>
    %cst_314 = arith.constant dense<0.000000e+00> : vector<2x32xf32>
    %762 = tpu.matmul %747, %544, %cst_314 {dimension_numbers = #tpu.dot_dimension_numbers<[1], [0], [0], [1], [0, 0, 1, 1], [], []>} : vector<2x32xf32>, vector<32x32xf32>, vector<2x32xf32> -> vector<2x32xf32>
    %763 = arith.addf %761, %762 : vector<2x32xf32>
    %764 = arith.negf %763 : vector<2x32xf32>
    %765 = math.exp %764 : vector<2x32xf32>
    %cst_315 = arith.constant 1.000000e+00 : f32
    %766 = vector.broadcast %cst_315 : f32 to vector<2x32xf32>
    %767 = arith.addf %766, %765 : vector<2x32xf32>
    %768 = arith.divf %766, %767 : vector<2x32xf32>
    %769 = vector.extract_strided_slice %532 {offsets = [0, 5, 0], sizes = [2, 1, 32], strides = [1, 1, 1]} : vector<2x8x32xf32> to vector<2x1x32xf32>
    %770 = vector.shape_cast %769 : vector<2x1x32xf32> to vector<2x32xf32>
    %cst_316 = arith.constant dense<0.000000e+00> : vector<2x32xf32>
    %771 = tpu.matmul %747, %546, %cst_316 {dimension_numbers = #tpu.dot_dimension_numbers<[1], [0], [0], [1], [0, 0, 1, 1], [], []>} : vector<2x32xf32>, vector<32x32xf32>, vector<2x32xf32> -> vector<2x32xf32>
    %772 = arith.addf %770, %771 : vector<2x32xf32>
    %773 = math.tanh %772 : vector<2x32xf32>
    %774 = vector.extract_strided_slice %540 {offsets = [0, 5, 0], sizes = [2, 1, 32], strides = [1, 1, 1]} : vector<2x8x32xf32> to vector<2x1x32xf32>
    %775 = vector.shape_cast %774 : vector<2x1x32xf32> to vector<2x32xf32>
    %cst_317 = arith.constant dense<0.000000e+00> : vector<2x32xf32>
    %776 = tpu.matmul %747, %548, %cst_317 {dimension_numbers = #tpu.dot_dimension_numbers<[1], [0], [0], [1], [0, 0, 1, 1], [], []>} : vector<2x32xf32>, vector<32x32xf32>, vector<2x32xf32> -> vector<2x32xf32>
    %777 = arith.addf %775, %776 : vector<2x32xf32>
    %778 = arith.negf %777 : vector<2x32xf32>
    %779 = math.exp %778 : vector<2x32xf32>
    %cst_318 = arith.constant 1.000000e+00 : f32
    %780 = vector.broadcast %cst_318 : f32 to vector<2x32xf32>
    %781 = arith.addf %780, %779 : vector<2x32xf32>
    %782 = arith.divf %780, %781 : vector<2x32xf32>
    %783 = arith.mulf %768, %745 : vector<2x32xf32>
    %784 = arith.mulf %759, %773 : vector<2x32xf32>
    %785 = arith.addf %783, %784 : vector<2x32xf32>
    %786 = math.tanh %785 : vector<2x32xf32>
    %787 = arith.mulf %782, %786 : vector<2x32xf32>
    %c0_319 = arith.constant 0 : index
    %c5_320 = arith.constant 5 : index
    %c0_321 = arith.constant 0 : index
    %788 = vector.load %arg12[%c0_319, %c5_320, %c0_321] : memref<2x8x32xf32, #tpu.memory_space<vmem>>, vector<2x1x32xf32>
    %789 = vector.shape_cast %788 : vector<2x1x32xf32> to vector<2x32xf32>
    %790 = vector.shape_cast %787 : vector<2x32xf32> to vector<2x1x32xf32>
    tpu.vector_store %arg12[%c0_319, %c5_320, %c0_321], %790 {strides = array<i32>} : memref<2x8x32xf32, #tpu.memory_space<vmem>>, vector<2x1x32xf32>,
    %791 = vector.extract_strided_slice %516 {offsets = [0, 6, 0], sizes = [2, 1, 32], strides = [1, 1, 1]} : vector<2x8x32xf32> to vector<2x1x32xf32>
    %792 = vector.shape_cast %791 : vector<2x1x32xf32> to vector<2x32xf32>
    %cst_322 = arith.constant dense<0.000000e+00> : vector<2x32xf32>
    %793 = tpu.matmul %787, %542, %cst_322 {dimension_numbers = #tpu.dot_dimension_numbers<[1], [0], [0], [1], [0, 0, 1, 1], [], []>} : vector<2x32xf32>, vector<32x32xf32>, vector<2x32xf32> -> vector<2x32xf32>
    %794 = arith.addf %792, %793 : vector<2x32xf32>
    %795 = arith.negf %794 : vector<2x32xf32>
    %796 = math.exp %795 : vector<2x32xf32>
    %cst_323 = arith.constant 1.000000e+00 : f32
    %797 = vector.broadcast %cst_323 : f32 to vector<2x32xf32>
    %798 = arith.addf %797, %796 : vector<2x32xf32>
    %799 = arith.divf %797, %798 : vector<2x32xf32>
    %800 = vector.extract_strided_slice %524 {offsets = [0, 6, 0], sizes = [2, 1, 32], strides = [1, 1, 1]} : vector<2x8x32xf32> to vector<2x1x32xf32>
    %801 = vector.shape_cast %800 : vector<2x1x32xf32> to vector<2x32xf32>
    %cst_324 = arith.constant dense<0.000000e+00> : vector<2x32xf32>
    %802 = tpu.matmul %787, %544, %cst_324 {dimension_numbers = #tpu.dot_dimension_numbers<[1], [0], [0], [1], [0, 0, 1, 1], [], []>} : vector<2x32xf32>, vector<32x32xf32>, vector<2x32xf32> -> vector<2x32xf32>
    %803 = arith.addf %801, %802 : vector<2x32xf32>
    %804 = arith.negf %803 : vector<2x32xf32>
    %805 = math.exp %804 : vector<2x32xf32>
    %cst_325 = arith.constant 1.000000e+00 : f32
    %806 = vector.broadcast %cst_325 : f32 to vector<2x32xf32>
    %807 = arith.addf %806, %805 : vector<2x32xf32>
    %808 = arith.divf %806, %807 : vector<2x32xf32>
    %809 = vector.extract_strided_slice %532 {offsets = [0, 6, 0], sizes = [2, 1, 32], strides = [1, 1, 1]} : vector<2x8x32xf32> to vector<2x1x32xf32>
    %810 = vector.shape_cast %809 : vector<2x1x32xf32> to vector<2x32xf32>
    %cst_326 = arith.constant dense<0.000000e+00> : vector<2x32xf32>
    %811 = tpu.matmul %787, %546, %cst_326 {dimension_numbers = #tpu.dot_dimension_numbers<[1], [0], [0], [1], [0, 0, 1, 1], [], []>} : vector<2x32xf32>, vector<32x32xf32>, vector<2x32xf32> -> vector<2x32xf32>
    %812 = arith.addf %810, %811 : vector<2x32xf32>
    %813 = math.tanh %812 : vector<2x32xf32>
    %814 = vector.extract_strided_slice %540 {offsets = [0, 6, 0], sizes = [2, 1, 32], strides = [1, 1, 1]} : vector<2x8x32xf32> to vector<2x1x32xf32>
    %815 = vector.shape_cast %814 : vector<2x1x32xf32> to vector<2x32xf32>
    %cst_327 = arith.constant dense<0.000000e+00> : vector<2x32xf32>
    %816 = tpu.matmul %787, %548, %cst_327 {dimension_numbers = #tpu.dot_dimension_numbers<[1], [0], [0], [1], [0, 0, 1, 1], [], []>} : vector<2x32xf32>, vector<32x32xf32>, vector<2x32xf32> -> vector<2x32xf32>
    %817 = arith.addf %815, %816 : vector<2x32xf32>
    %818 = arith.negf %817 : vector<2x32xf32>
    %819 = math.exp %818 : vector<2x32xf32>
    %cst_328 = arith.constant 1.000000e+00 : f32
    %820 = vector.broadcast %cst_328 : f32 to vector<2x32xf32>
    %821 = arith.addf %820, %819 : vector<2x32xf32>
    %822 = arith.divf %820, %821 : vector<2x32xf32>
    %823 = arith.mulf %808, %785 : vector<2x32xf32>
    %824 = arith.mulf %799, %813 : vector<2x32xf32>
    %825 = arith.addf %823, %824 : vector<2x32xf32>
    %826 = math.tanh %825 : vector<2x32xf32>
    %827 = arith.mulf %822, %826 : vector<2x32xf32>
    %c0_329 = arith.constant 0 : index
    %c6_330 = arith.constant 6 : index
    %c0_331 = arith.constant 0 : index
    %828 = vector.load %arg12[%c0_329, %c6_330, %c0_331] : memref<2x8x32xf32, #tpu.memory_space<vmem>>, vector<2x1x32xf32>
    %829 = vector.shape_cast %828 : vector<2x1x32xf32> to vector<2x32xf32>
    %830 = vector.shape_cast %827 : vector<2x32xf32> to vector<2x1x32xf32>
    tpu.vector_store %arg12[%c0_329, %c6_330, %c0_331], %830 {strides = array<i32>} : memref<2x8x32xf32, #tpu.memory_space<vmem>>, vector<2x1x32xf32>,
    %831 = vector.extract_strided_slice %516 {offsets = [0, 7, 0], sizes = [2, 1, 32], strides = [1, 1, 1]} : vector<2x8x32xf32> to vector<2x1x32xf32>
    %832 = vector.shape_cast %831 : vector<2x1x32xf32> to vector<2x32xf32>
    %cst_332 = arith.constant dense<0.000000e+00> : vector<2x32xf32>
    %833 = tpu.matmul %827, %542, %cst_332 {dimension_numbers = #tpu.dot_dimension_numbers<[1], [0], [0], [1], [0, 0, 1, 1], [], []>} : vector<2x32xf32>, vector<32x32xf32>, vector<2x32xf32> -> vector<2x32xf32>
    %834 = arith.addf %832, %833 : vector<2x32xf32>
    %835 = arith.negf %834 : vector<2x32xf32>
    %836 = math.exp %835 : vector<2x32xf32>
    %cst_333 = arith.constant 1.000000e+00 : f32
    %837 = vector.broadcast %cst_333 : f32 to vector<2x32xf32>
    %838 = arith.addf %837, %836 : vector<2x32xf32>
    %839 = arith.divf %837, %838 : vector<2x32xf32>
    %840 = vector.extract_strided_slice %524 {offsets = [0, 7, 0], sizes = [2, 1, 32], strides = [1, 1, 1]} : vector<2x8x32xf32> to vector<2x1x32xf32>
    %841 = vector.shape_cast %840 : vector<2x1x32xf32> to vector<2x32xf32>
    %cst_334 = arith.constant dense<0.000000e+00> : vector<2x32xf32>
    %842 = tpu.matmul %827, %544, %cst_334 {dimension_numbers = #tpu.dot_dimension_numbers<[1], [0], [0], [1], [0, 0, 1, 1], [], []>} : vector<2x32xf32>, vector<32x32xf32>, vector<2x32xf32> -> vector<2x32xf32>
    %843 = arith.addf %841, %842 : vector<2x32xf32>
    %844 = arith.negf %843 : vector<2x32xf32>
    %845 = math.exp %844 : vector<2x32xf32>
    %cst_335 = arith.constant 1.000000e+00 : f32
    %846 = vector.broadcast %cst_335 : f32 to vector<2x32xf32>
    %847 = arith.addf %846, %845 : vector<2x32xf32>
    %848 = arith.divf %846, %847 : vector<2x32xf32>
    %849 = vector.extract_strided_slice %532 {offsets = [0, 7, 0], sizes = [2, 1, 32], strides = [1, 1, 1]} : vector<2x8x32xf32> to vector<2x1x32xf32>
    %850 = vector.shape_cast %849 : vector<2x1x32xf32> to vector<2x32xf32>
    %cst_336 = arith.constant dense<0.000000e+00> : vector<2x32xf32>
    %851 = tpu.matmul %827, %546, %cst_336 {dimension_numbers = #tpu.dot_dimension_numbers<[1], [0], [0], [1], [0, 0, 1, 1], [], []>} : vector<2x32xf32>, vector<32x32xf32>, vector<2x32xf32> -> vector<2x32xf32>
    %852 = arith.addf %850, %851 : vector<2x32xf32>
    %853 = math.tanh %852 : vector<2x32xf32>
    %854 = vector.extract_strided_slice %540 {offsets = [0, 7, 0], sizes = [2, 1, 32], strides = [1, 1, 1]} : vector<2x8x32xf32> to vector<2x1x32xf32>
    %855 = vector.shape_cast %854 : vector<2x1x32xf32> to vector<2x32xf32>
    %cst_337 = arith.constant dense<0.000000e+00> : vector<2x32xf32>
    %856 = tpu.matmul %827, %548, %cst_337 {dimension_numbers = #tpu.dot_dimension_numbers<[1], [0], [0], [1], [0, 0, 1, 1], [], []>} : vector<2x32xf32>, vector<32x32xf32>, vector<2x32xf32> -> vector<2x32xf32>
    %857 = arith.addf %855, %856 : vector<2x32xf32>
    %858 = arith.negf %857 : vector<2x32xf32>
    %859 = math.exp %858 : vector<2x32xf32>
    %cst_338 = arith.constant 1.000000e+00 : f32
    %860 = vector.broadcast %cst_338 : f32 to vector<2x32xf32>
    %861 = arith.addf %860, %859 : vector<2x32xf32>
    %862 = arith.divf %860, %861 : vector<2x32xf32>
    %863 = arith.mulf %848, %825 : vector<2x32xf32>
    %864 = arith.mulf %839, %853 : vector<2x32xf32>
    %865 = arith.addf %863, %864 : vector<2x32xf32>
    %866 = math.tanh %865 : vector<2x32xf32>
    %867 = arith.mulf %862, %866 : vector<2x32xf32>
    %c0_339 = arith.constant 0 : index
    %c7_340 = arith.constant 7 : index
    %c0_341 = arith.constant 0 : index
    %868 = vector.load %arg12[%c0_339, %c7_340, %c0_341] : memref<2x8x32xf32, #tpu.memory_space<vmem>>, vector<2x1x32xf32>
    %869 = vector.shape_cast %868 : vector<2x1x32xf32> to vector<2x32xf32>
    %870 = vector.shape_cast %867 : vector<2x32xf32> to vector<2x1x32xf32>
    tpu.vector_store %arg12[%c0_339, %c7_340, %c0_341], %870 {strides = array<i32>} : memref<2x8x32xf32, #tpu.memory_space<vmem>>, vector<2x1x32xf32>,
    %c0_342 = arith.constant 0 : index
    %c0_343 = arith.constant 0 : index
    %c0_344 = arith.constant 0 : index
    %871 = vector.load %arg12[%c0_342, %c0_343, %c0_344] : memref<2x8x32xf32, #tpu.memory_space<vmem>>, vector<2x8x32xf32>
    %c0_345 = arith.constant 0 : index
    %c0_346 = arith.constant 0 : index
    %872 = vector.load %arg9[%c0_345, %c0_346] : memref<1x32xf32, #tpu.memory_space<vmem>>, vector<1x32xf32>
    %873 = vector.shape_cast %872 : vector<1x32xf32> to vector<1x1x32xf32>
    %874 = vector.broadcast %873 : vector<1x1x32xf32> to vector<2x8x32xf32>
    %875 = arith.mulf %871, %874 : vector<2x8x32xf32>
    %cst_347 = arith.constant dense<0.000000e+00> : vector<2x8xf32>
    %876 = vector.multi_reduction <add>, %875, %cst_347 [2] : vector<2x8x32xf32> to vector<2x8xf32>
    %c0_348 = arith.constant 0 : index
    %c0_349 = arith.constant 0 : index
    %877 = vector.load %arg10[%c0_348, %c0_349] : memref<1x1xf32, #tpu.memory_space<vmem>>, vector<1x1xf32>
    %878 = vector.broadcast %877 : vector<1x1xf32> to vector<2x8xf32>
    %879 = arith.addf %876, %878 : vector<2x8xf32>
    %c0_350 = arith.constant 0 : index
    %c0_351 = arith.constant 0 : index
    %880 = vector.load %arg11[%c0_350, %c0_351] : memref<2x8xf32, #tpu.memory_space<vmem>>, vector<2x8xf32>
    tpu.vector_store %arg11[%c0_350, %c0_351], %879 {strides = array<i32>} : memref<2x8xf32, #tpu.memory_space<vmem>>, vector<2x8xf32>,
    return
  }
  func.func @transform_0(%arg0: i32) -> (i32, i32, i32) {
    %c0_i32 = arith.constant 0 : i32
    %c0_i32_0 = arith.constant 0 : i32
    %c0_i32_1 = arith.constant 0 : i32
    return %arg0, %c0_i32, %c0_i32_0 : i32, i32, i32
  }
  func.func @transform_1(%arg0: i32) -> (i32, i32, i32) {
    %c0_i32 = arith.constant 0 : i32
    %c0_i32_0 = arith.constant 0 : i32
    %c0_i32_1 = arith.constant 0 : i32
    %c0_i32_2 = arith.constant 0 : i32
    return %c0_i32, %c0_i32_0, %c0_i32_1 : i32, i32, i32
  }
  func.func @transform_2(%arg0: i32) -> (i32, i32, i32) {
    %c0_i32 = arith.constant 0 : i32
    %c0_i32_0 = arith.constant 0 : i32
    %c0_i32_1 = arith.constant 0 : i32
    %c0_i32_2 = arith.constant 0 : i32
    return %c0_i32, %c0_i32_0, %c0_i32_1 : i32, i32, i32
  }
  func.func @transform_3(%arg0: i32) -> (i32, i32, i32) {
    %c0_i32 = arith.constant 0 : i32
    %c0_i32_0 = arith.constant 0 : i32
    %c0_i32_1 = arith.constant 0 : i32
    %c0_i32_2 = arith.constant 0 : i32
    return %c0_i32, %c0_i32_0, %c0_i32_1 : i32, i32, i32
  }
  func.func @transform_4(%arg0: i32) -> (i32, i32, i32) {
    %c0_i32 = arith.constant 0 : i32
    %c0_i32_0 = arith.constant 0 : i32
    %c0_i32_1 = arith.constant 0 : i32
    %c0_i32_2 = arith.constant 0 : i32
    return %c0_i32, %c0_i32_0, %c0_i32_1 : i32, i32, i32
  }
  func.func @transform_5(%arg0: i32) -> (i32, i32, i32, i32) {
    %c0_i32 = arith.constant 0 : i32
    %c0_i32_0 = arith.constant 0 : i32
    %c0_i32_1 = arith.constant 0 : i32
    %c0_i32_2 = arith.constant 0 : i32
    %c0_i32_3 = arith.constant 0 : i32
    return %c0_i32, %c0_i32_0, %c0_i32_1, %c0_i32_2 : i32, i32, i32, i32
  }
  func.func @transform_6(%arg0: i32) -> (i32, i32, i32, i32) {
    %c0_i32 = arith.constant 0 : i32
    %c0_i32_0 = arith.constant 0 : i32
    %c0_i32_1 = arith.constant 0 : i32
    %c0_i32_2 = arith.constant 0 : i32
    %c0_i32_3 = arith.constant 0 : i32
    return %c0_i32, %c0_i32_0, %c0_i32_1, %c0_i32_2 : i32, i32, i32, i32
  }
  func.func @transform_7(%arg0: i32) -> (i32, i32, i32, i32) {
    %c0_i32 = arith.constant 0 : i32
    %c0_i32_0 = arith.constant 0 : i32
    %c0_i32_1 = arith.constant 0 : i32
    %c0_i32_2 = arith.constant 0 : i32
    %c0_i32_3 = arith.constant 0 : i32
    return %c0_i32, %c0_i32_0, %c0_i32_1, %c0_i32_2 : i32, i32, i32, i32
  }
  func.func @transform_8(%arg0: i32) -> (i32, i32) {
    %c0_i32 = arith.constant 0 : i32
    %c0_i32_0 = arith.constant 0 : i32
    %c0_i32_1 = arith.constant 0 : i32
    return %c0_i32, %c0_i32_0 : i32, i32
  }
  func.func @transform_9(%arg0: i32) -> (i32, i32) {
    %c0_i32 = arith.constant 0 : i32
    %c0_i32_0 = arith.constant 0 : i32
    %c0_i32_1 = arith.constant 0 : i32
    return %c0_i32, %c0_i32_0 : i32, i32
  }
  func.func @transform_10(%arg0: i32) -> (i32, i32) {
    %c0_i32 = arith.constant 0 : i32
    %c0_i32_0 = arith.constant 0 : i32
    return %arg0, %c0_i32 : i32, i32
  }
}

</mosaic_0001>

<bundles_post_ra>
// kernel: tpu_custom_call.1
= control target key start
LH: loop header
LB: loop body
LE: loop exit
PB: predicated region body
PF: predicated region fallthrough
CT: control target
= control target key end

     0   :  { %s12424_s0 = inlined_call_operand.vmem [shape: f32[2,8,32], index: 0, kind: input, shape index: {}]   ;;  %s12425_s1 = inlined_call_operand.vmem [shape: f32[4,32,8], index: 1, kind: input, shape index: {}]   ;;  %s12426_s2 = inlined_call_operand.vmem [shape: f32[4,32,8], index: 2, kind: input, shape index: {}]   ;;  %s12427_s3 = inlined_call_operand.vmem [shape: f32[4,1,8], index: 3, kind: input, shape index: {}]   ;;  %s12428_s4 = inlined_call_operand.vmem [shape: f32[4,1,8], index: 4, kind: input, shape index: {}]   ;;  %s12429_s5 = inlined_call_operand.vmem [shape: f32[2,4,32,32], index: 5, kind: input, shape index: {}]   ;;  %s12430_s6 = inlined_call_operand.hbm [shape: f32[2,4,32,32], index: 6, kind: input, shape index: {}]   ;;  %s12431_s7 = inlined_call_operand.vmem [shape: f32[2,4,1,32], index: 7, kind: input, shape index: {}]   ;;  %s12432_s8 = inlined_call_operand.vmem [shape: f32[1,32], index: 8, kind: input, shape index: {}]   ;;  %s12433_s9 = inlined_call_operand.<no memory space> [shape: f32[1,1], index: 9, kind: input, shape index: {}]   ;;  %s12434_s10 = inlined_call_operand.hbm [shape: f32[2,8], index: 10, kind: output, shape index: {}]  }
   0x1   :  { %v15_v0 = vstv %s12433_s9 }
   0x2   :  { %16 = vst [vmem:[#allocation3] sm:$0x1] %v15_v0 }
   0x3   :  { %17 = vsyncpa [#allocation5], 0 }
   0x4   :  { %18 = vsyncpa [#allocation6], 0  ;;  %s11115_s15 = smov [#allocation4]   ;;  %s11067_s19 = scalar_lea.hbm %s12430_s6, 4096 }
   0x5   :  { %s36_s16 = sshll.u32 %s11115_s15, 4  ;;  %p11068_p0 = scmp.ne.s32.totalorder %s12430_s6, %s11067_s19  ;;  %s37_s16 = int_to_ptr.vmem [resolvable:$true] %s36_s16 }
   0x6   :  { %p11071_p1 = scmp.lt.u32.totalorder %s11067_s19, %s12430_s6 }
   0x8   :  { %p11073_p2 = pnand %p11071_p1, %p11068_p0 }
   0xa   :  { %11076 = shalt.err (!%p11073_p2)
}
   0xb   :  { %s11077_s9 = scalar_lea.vmem %s37_s16, 4096  ;;  %p11082_p4 = scmp.lt.s32.totalorder %s37_s16, %s37_s16 }
   0xc   :  { %p11078_p3 = scmp.ne.s32.totalorder %s37_s16, %s11077_s9  ;;  %p11083_p5 = scmp.lt.s32.totalorder %s11077_s9, %s11077_s9 }
   0xe   :  { %p11084_p6 = por %p11083_p5, %p11082_p4 }
  0x10   :  { %p11085_p7 = pnand %p11084_p6, %p11078_p3 }
  0x12   :  { %11088 = shalt.err (!%p11085_p7)
}
  0x13   :  { %s11116_s24 = smov 128   ;;  %s11117_s25 = smov 8  }
  0x14   :  { %42 = dma.hbm_to_vmem [thread:$0]  %s12430_s6, 4096, %s37_s16, [#allocation5], %s11116_s24, %s11116_s24, %s11117_s25  }
  0x15   :  { %11111 = dma.done.wait [#allocation5], 4096  }
  0x16   :  { %11112 = vsyncadd [#allocation5], 4294963200  ;;  %v153_v1 = vld [vmem:[%s12426_s2] sm:$0xff]  ;;  %v154_v2 = vld [vmem:[%s12426_s2 + $0x8] sm:$0xff]  ;;  %vm71_vm0 = vcmask 261120   ;;  %v11118_v15 = vmov 0.0   ;;  %v54_v38 = vlaneseq }
  0x17   :  { %v60_v3 = vld [vmem:[%s12425_s1] sm:$0xff]  ;;  %v10010_v4 = vpack.c.bf16 %v154_v2, %v153_v1  ;;  %v61_v5 = vld [vmem:[%s12425_s1 + $0x8] sm:$0xff]  ;;  %v155_v6 = vld [vmem:[%s12426_s2 + $0x10] sm:$0xff]  ;;  %vm11119_vm1 = vmmov 0   ;;  %vm239_vm2 = vcmask 64512   ;;  %vm2366_vm4 = vcmask 253952  }
  0x18   :  { %v156_v7 = vld [vmem:[%s12426_s2 + $0x18] sm:$0xff]  ;;  %v10002_v8 = vpack.c.bf16 %v61_v5, %v60_v3  ;;  %v62_v10 = vld [vmem:[%s12425_s1 + $0x10] sm:$0xff]  ;;  %v11220_v12 = vld [vmem:[%s12424_s0] sm:$0xff]  ;;  %v11289_v39 = vshrl.u32 %v54_v38, 7  ;;  %v11291_v40 = vand.u32 127, %v54_v38  ;;  %vm2372_vm5 = vcmask 1041409  }
  0x19   :  { %v10014_v9 = vpack.c.bf16 %v156_v7, %v155_v6  ;;  %v63_v11 = vld [vmem:[%s12425_s1 + $0x18] sm:$0xff]  ;;  %10011 = vmatprep.subr.bf16.mxu1 %v10010_v4  ;;  %9091 = vmatprep.mubr.msk.f32.mxu1 %vm71_vm0, %v11220_v12  ;;  %v11229_v14 = vld [vmem:[%s12424_s0 + $0x8] sm:$0xff]  ;;  %v8369_v16 = vld [vmem:[%s12426_s2 + $0x20] sm:$0xff]  ;;  %vm2734_vm6 = vcmask 254977   ;;  %vm3105_vm7 = vcmask 256002   ;;  %vm3477_vm8 = vcmask 257027  }
  0x1a   :  { %v10006_v13 = vpack.c.bf16 %v63_v11, %v62_v10  ;;  %10013 = vmatpush3.bf16.msra.mxu1 %v10010_v4  ;;  %10003 = vmatprep.subr.bf16.mxu0 %v10002_v8  ;;  %v8370_v17 = vld [vmem:[%s12426_s2 + $0x28] sm:$0xff]  ;;  %v8354_v18 = vld [vmem:[%s12428_s4] ss:$0 sm:$0xff]  ;;  %v8371_v28 = vld [vmem:[%s12426_s2 + $0x30] sm:$0xff]  ;;  %vm58_vm3 = vcmp.gt.s32.totalorder %v11291_v40, %v11289_v39  ;;  %vm3849_vm9 = vcmask 258052   ;;  %vm4221_vm10 = vcmask 259077  }
  0x1b   :  { %10005 = vmatpush3.bf16.msra.mxu0 %v10002_v8  ;;  %10015 = vmatprep.subr.bf16.mxu1 %v10014_v9  ;;  %v8361_v19 = vld [vmem:[%s12425_s1 + $0x20] sm:$0xff]  ;;  %v8362_v20 = vld [vmem:[%s12425_s1 + $0x28] sm:$0xff]  ;;  %v10026_v23 = vpack.c.bf16 %v8370_v17, %v8369_v16  ;;  %v8372_v29 = vld [vmem:[%s12426_s2 + $0x38] sm:$0xff]  ;;  %v11296_v42 = vsel %vm58_vm3, -1e+09, %v11118_v15  ;;  %vm4593_vm11 = vcmask 260102  }
  0x1c   :  { %10007 = vmatprep.subr.bf16.mxu0 %v10006_v13  ;;  %9080 = vmatprep.mubr.msk.f32.mxu0 %vm71_vm0, %v11220_v12  ;;  %v8351_v21 = vld [vmem:[%s12427_s3] ss:$0 sm:$0xff]  ;;  %v10018_v27 = vpack.c.bf16 %v8362_v20, %v8361_v19  ;;  %v8363_v33 = vld [vmem:[%s12425_s1 + $0x30] sm:$0xff]  ;;  %v8364_v34 = vld [vmem:[%s12425_s1 + $0x38] sm:$0xff]  ;;  %v10030_v36 = vpack.c.bf16 %v8372_v29, %v8371_v28  ;;  %vm4965_vm12 = vcmask 261127   ;;  %vm8334_vm13 = vcmask 58368  }
  0x1d   :  { %v10022_v37 = vpack.c.bf16 %v8364_v34, %v8363_v33  ;;  %v8389_v51 = vld [vmem:[%s12426_s2 + $0x40] sm:$0xff]  ;;  %v8390_v52 = vld [vmem:[%s12426_s2 + $0x48] sm:$0xff]  ;;  %v8391_v0 = vld [vmem:[%s12426_s2 + $0x50] sm:$0xff] }
  0x1e   :  { %10017 = vmatpush3.bf16.msra.mxu1 %v10014_v9  ;;  %v8374_v54 = vld [vmem:[%s12428_s4 + $0x1] ss:$0 sm:$0xff]  ;;  %v8382_v56 = vld [vmem:[%s12425_s1 + $0x48] sm:$0xff]  ;;  %v10042_v59 = vpack.c.bf16 %v8390_v52, %v8389_v51  ;;  %v8392_v1 = vld [vmem:[%s12426_s2 + $0x58] sm:$0xff] }
  0x1f   :  { %10009 = vmatpush3.bf16.msra.mxu0 %v10006_v13  ;;  %9099 = vmatprep.subr.mxu1 %v11118_v15  ;;  %v8381_v55 = vld [vmem:[%s12425_s1 + $0x40] sm:$0xff]  ;;  %v8383_v5 = vld [vmem:[%s12425_s1 + $0x50] sm:$0xff]  ;;  %v8384_v6 = vld [vmem:[%s12425_s1 + $0x58] sm:$0xff]  ;;  %v10046_v8 = vpack.c.bf16 %v8392_v1, %v8391_v0 }
  0x20   :  { %9094 = vmatprep.subr.mxu0 %v11118_v15  ;;  %v8366_v57 = vld [vmem:[%s12427_s3 + $0x1] ss:$0 sm:$0xff]  ;;  %v10034_v63 = vpack.c.bf16 %v8382_v56, %v8381_v55  ;;  %v10038_v9 = vpack.c.bf16 %v8384_v6, %v8383_v5  ;;  %v8386_v28 = vld [vmem:[%s12427_s3 + $0x2] ss:$0 sm:$0xff] }
  0x21   :  { %9092 = vmatmul.mubr.msk.f32.vlgmr.msra.gmra.mrb[0].mxu1 %vm71_vm0, %v11229_v14 }
  0x22   :  { %9081 = vmatmul.mubr.msk.f32.vlgmr.msra.gmra.mrb[0].mxu0 %vm71_vm0, %v11229_v14  ;;  %9101 = vmatprep.mubr.msk.f32.mxu1 %vm11119_vm1, %v11118_v15 }
  0x23   :  { %9096 = vmatprep.mubr.msk.f32.mxu0 %vm11119_vm1, %v11118_v15 }
  0xf4   :  { %v9093_v22 = vpop.f32.mrb[0].mxu1 }
  0xf5   :  { %v236_v24 = vadd.f32 %v9093_v22, %v8354_v18  ;;  %v230_v25 = vpop.f32.mrb[1].mxu1  ;;  %v9082_v26 = vpop.f32.mrb[0].mxu0  ;;  %v8409_v22 = vld [vmem:[%s12426_s2 + $0x60] sm:$0xff] }
  0xf6   :  { %v231_v30 = vadd.f32 %v8354_v18, %v230_v25  ;;  %v150_v31 = vadd.f32 %v9082_v26, %v8351_v21  ;;  %v144_v32 = vpop.f32.mrb[1].mxu0  ;;  %v8394_v25 = vld [vmem:[%s12428_s4 + $0x2] ss:$0 sm:$0xff] }
  0xf7   :  { %9100 = vmatpush3.xpose.msk.msra.mxu1 %vm239_vm2, %v236_v24  ;;  %v145_v35 = vadd.f32 %v8351_v21, %v144_v32  ;;  %v8401_v26 = vld [vmem:[%s12425_s1 + $0x60] sm:$0xff] }
  0xf8   :  { %9095 = vmatpush3.xpose.msk.msra.mxu0 %vm239_vm2, %v231_v30  ;;  %10027 = vmatprep.subr.bf16.mxu1 %v10026_v23 }
  0xf9   :  { %10019 = vmatprep.subr.bf16.mxu0 %v10018_v27 }
  0xfa   :  { %9102 = vmatmul.mubr.msk.f32.vlgmr.msra.gmra.mrb[2].mxu1 %vm239_vm2, %v150_v31 }
  0xfb   :  { %9097 = vmatmul.mubr.msk.f32.vlgmr.msra.gmra.mrb[2].mxu0 %vm239_vm2, %v145_v35  ;;  %10029 = vmatpush3.bf16.msra.mxu1 %v10026_v23  ;;  %v8410_v23 = vld [vmem:[%s12426_s2 + $0x68] sm:$0xff]  ;;  %v8411_v35 = vld [vmem:[%s12426_s2 + $0x70] sm:$0xff] }
  0xfc   :  { %10021 = vmatpush3.bf16.msra.mxu0 %v10018_v27  ;;  %10031 = vmatprep.subr.bf16.mxu1 %v10030_v36  ;;  %v8402_v27 = vld [vmem:[%s12425_s1 + $0x68] sm:$0xff]  ;;  %v10058_v30 = vpack.c.bf16 %v8410_v23, %v8409_v22 }
  0xfd   :  { %10023 = vmatprep.subr.bf16.mxu0 %v10022_v37  ;;  %9123 = vmatprep.mubr.msk.f32.mxu1 %vm71_vm0, %v11220_v12  ;;  %v10050_v34 = vpack.c.bf16 %v8402_v27, %v8401_v26 }
  0xfe   :  { %9112 = vmatprep.mubr.msk.f32.mxu0 %vm71_vm0, %v11220_v12 }
  0xff   :  { %10033 = vmatpush3.bf16.msra.mxu1 %v10030_v36  ;;  %v8412_v36 = vld [vmem:[%s12426_s2 + $0x78] sm:$0xff] }
 0x100   :  { %10025 = vmatpush3.bf16.msra.mxu0 %v10022_v37  ;;  %9131 = vmatprep.subr.mxu1 %v11118_v15 }
 0x101   :  { %9126 = vmatprep.subr.mxu0 %v11118_v15 }
 0x102   :  { %9124 = vmatmul.mubr.msk.f32.vlgmr.msra.gmra.mrb[4].mxu1 %vm71_vm0, %v11229_v14 }
 0x103   :  { %9113 = vmatmul.mubr.msk.f32.vlgmr.msra.gmra.mrb[4].mxu0 %vm71_vm0, %v11229_v14  ;;  %9133 = vmatprep.mubr.msk.f32.mxu1 %vm11119_vm1, %v11118_v15 }
 0x104   :  { %9128 = vmatprep.mubr.msk.f32.mxu0 %vm11119_vm1, %v11118_v15 }
 0x1cd   :  { %v388_v41 = vpop.f32.mrb[2].mxu1 }
 0x1ce   :  { %v393_v43 = vmul.f32 0.35355338, %v388_v41  ;;  %v312_v44 = vpop.f32.mrb[2].mxu0  ;;  %v9103_v45 = vpop.f32.mrb[3].mxu1 }
 0x1cf   :  { %v392_v46 = vmul.f32 0.35355338, %v312_v44  ;;  %v9098_v47 = vpop.f32.mrb[3].mxu0  ;;  %v8404_v44 = vld [vmem:[%s12425_s1 + $0x78] sm:$0xff] }
 0x1d0   :  { %v11299_v48 = vadd.f32 %v393_v43, %v11296_v42  ;;  %v8403_v43 = vld [vmem:[%s12425_s1 + $0x70] sm:$0xff] }
 0x1d1   :  { %v11302_v49 = vadd.f32 %v392_v46, %v11296_v42  ;;  %v10062_v46 = vpack.c.bf16 %v8412_v36, %v8411_v35  ;;  %v10054_v47 = vpack.c.bf16 %v8404_v44, %v8403_v43 }
 0x1d2   :  { %v399_v50 = vsel %vm239_vm2, %v11299_v48, -inf }
 0x1d3   :  { %400 = vmax.xlane.f32.xlu1 %v399_v50  ;;  %v396_v53 = vsel %vm239_vm2, %v11302_v49, -inf }
 0x1d4   :  { %397 = vmax.xlane.f32.xlu0 %v396_v53 }
 0x1d5   :  { %v9125_v58 = vpop.f32.mrb[4].mxu1 }
 0x1d6   :  { %v593_v60 = vadd.f32 %v9125_v58, %v8374_v54  ;;  %v587_v61 = vpop.f32.mrb[5].mxu1  ;;  %v9114_v62 = vpop.f32.mrb[4].mxu0 }
 0x1d7   :  { %v588_v2 = vadd.f32 %v8374_v54, %v587_v61  ;;  %v505_v3 = vadd.f32 %v9114_v62, %v8366_v57  ;;  %v499_v4 = vpop.f32.mrb[5].mxu0  ;;  %v8406_v61 = vld [vmem:[%s12427_s3 + $0x3] ss:$0 sm:$0xff] }
 0x1d8   :  { %9132 = vmatpush3.xpose.msk.msra.mxu1 %vm239_vm2, %v593_v60  ;;  %v500_v7 = vadd.f32 %v8366_v57, %v499_v4  ;;  %v8414_v60 = vld [vmem:[%s12428_s4 + $0x3] ss:$0 sm:$0xff] }
 0x1d9   :  { %9127 = vmatpush3.xpose.msk.msra.mxu0 %vm239_vm2, %v588_v2  ;;  %10043 = vmatprep.subr.bf16.mxu1 %v10042_v59 }
 0x1da   :  { %10035 = vmatprep.subr.bf16.mxu0 %v10034_v63 }
 0x1db   :  { %9134 = vmatmul.mubr.msk.f32.vlgmr.msra.gmra.mrb[6].mxu1 %vm239_vm2, %v505_v3 }
 0x1dc   :  { %9129 = vmatmul.mubr.msk.f32.vlgmr.msra.gmra.mrb[6].mxu0 %vm239_vm2, %v500_v7  ;;  %10045 = vmatpush3.bf16.msra.mxu1 %v10042_v59 }
 0x1dd   :  { %10037 = vmatpush3.bf16.msra.mxu0 %v10034_v63  ;;  %10047 = vmatprep.subr.bf16.mxu1 %v10046_v8 }
 0x1de   :  { %10039 = vmatprep.subr.bf16.mxu0 %v10038_v9  ;;  %9155 = vmatprep.mubr.msk.f32.mxu1 %vm71_vm0, %v11220_v12 }
 0x1df   :  { %9144 = vmatprep.mubr.msk.f32.mxu0 %vm71_vm0, %v11220_v12 }
 0x1e0   :  { %10049 = vmatpush3.bf16.msra.mxu1 %v10046_v8 }
 0x1e1   :  { %10041 = vmatpush3.bf16.msra.mxu0 %v10038_v9  ;;  %9163 = vmatprep.subr.mxu1 %v11118_v15 }
 0x1e2   :  { %9158 = vmatprep.subr.mxu0 %v11118_v15 }
 0x1e3   :  { %9156 = vmatmul.mubr.msk.f32.vlgmr.msra.gmra.mrb[8].mxu1 %vm71_vm0, %v11229_v14 }
 0x1e4   :  { %9145 = vmatmul.mubr.msk.f32.vlgmr.msra.gmra.mrb[8].mxu0 %vm71_vm0, %v11229_v14  ;;  %9165 = vmatprep.mubr.msk.f32.mxu1 %vm11119_vm1, %v11118_v15 }
 0x1e5   :  { %9160 = vmatprep.mubr.msk.f32.mxu0 %vm11119_vm1, %v11118_v15 }
 0x260   :  { %v401_v7 = vpop.xlane.xlu1 %400 }
 0x261   :  { %v398_v6 = vpop.xlane.xlu0 %397 }
 0x2ae   :  { %v744_v10 = vpop.f32.mrb[6].mxu1 }
 0x2af   :  { %v749_v11 = vmul.f32 0.35355338, %v744_v10  ;;  %v668_v13 = vpop.f32.mrb[6].mxu0  ;;  %v9135_v16 = vpop.f32.mrb[7].mxu1  ;;  %v402_v10 = vsub.f32 %v11302_v49, %v398_v6 }
 0x2b0   :  { %v748_v17 = vmul.f32 0.35355338, %v668_v13  ;;  %v9130_v18 = vpop.f32.mrb[7].mxu0 }
 0x2b1   :  { %v11357_v19 = vadd.f32 %v749_v11, %v11296_v42 }
 0x2b2   :  { %v11360_v20 = vadd.f32 %v748_v17, %v11296_v42 }
 0x2b3   :  { %v755_v21 = vsel %vm239_vm2, %v11357_v19, -inf }
 0x2b4   :  { %756 = vmax.xlane.f32.xlu1 %v755_v21  ;;  %v752_v24 = vsel %vm239_vm2, %v11360_v20, -inf }
 0x2b5   :  { %753 = vmax.xlane.f32.xlu0 %v752_v24 }
 0x2b6   :  { %v9157_v29 = vpop.f32.mrb[8].mxu1 }
 0x2b7   :  { %v949_v31 = vadd.f32 %v9157_v29, %v8394_v25  ;;  %v943_v32 = vpop.f32.mrb[9].mxu1  ;;  %v9146_v33 = vpop.f32.mrb[8].mxu0 }
 0x2b8   :  { %v944_v37 = vadd.f32 %v8394_v25, %v943_v32  ;;  %v861_v38 = vadd.f32 %v9146_v33, %v8386_v28  ;;  %v855_v41 = vpop.f32.mrb[9].mxu0 }
 0x2b9   :  { %9164 = vmatpush3.xpose.msk.msra.mxu1 %vm239_vm2, %v949_v31  ;;  %v856_v45 = vadd.f32 %v8386_v28, %v855_v41 }
 0x2ba   :  { %9159 = vmatpush3.xpose.msk.msra.mxu0 %vm239_vm2, %v944_v37  ;;  %10059 = vmatprep.subr.bf16.mxu1 %v10058_v30 }
 0x2bb   :  { %10051 = vmatprep.subr.bf16.mxu0 %v10050_v34 }
 0x2bc   :  { %9166 = vmatmul.mubr.msk.f32.vlgmr.msra.gmra.mrb[10].mxu1 %vm239_vm2, %v861_v38 }
 0x2bd   :  { %9161 = vmatmul.mubr.msk.f32.vlgmr.msra.gmra.mrb[10].mxu0 %vm239_vm2, %v856_v45  ;;  %10061 = vmatpush3.bf16.msra.mxu1 %v10058_v30 }
 0x2be   :  { %10053 = vmatpush3.bf16.msra.mxu0 %v10050_v34  ;;  %10063 = vmatprep.subr.bf16.mxu1 %v10062_v46 }
 0x2bf   :  { %10055 = vmatprep.subr.bf16.mxu0 %v10054_v47  ;;  %9187 = vmatprep.mubr.msk.f32.mxu1 %vm71_vm0, %v11220_v12 }
 0x2c0   :  { %9176 = vmatprep.mubr.msk.f32.mxu0 %vm71_vm0, %v11220_v12 }
 0x2c1   :  { %10065 = vmatpush3.bf16.msra.mxu1 %v10062_v46 }
 0x2c2   :  { %10057 = vmatpush3.bf16.msra.mxu0 %v10054_v47  ;;  %9195 = vmatprep.subr.mxu1 %v11118_v15 }
 0x2c3   :  { %9190 = vmatprep.subr.mxu0 %v11118_v15 }
 0x2c4   :  { %9188 = vmatmul.mubr.msk.f32.vlgmr.msra.gmra.mrb[12].mxu1 %vm71_vm0, %v11229_v14 }
 0x2c5   :  { %9177 = vmatmul.mubr.msk.f32.vlgmr.msra.gmra.mrb[12].mxu0 %vm71_vm0, %v11229_v14  ;;  %9197 = vmatprep.mubr.msk.f32.mxu1 %vm11119_vm1, %v11118_v15 }
 0x2c6   :  { %9192 = vmatprep.mubr.msk.f32.mxu0 %vm11119_vm1, %v11118_v15 }
 0x341   :  { %v757_v11 = vpop.xlane.xlu1 %756 }
 0x342   :  { %v754_v8 = vpop.xlane.xlu0 %753  ;;  %v759_v13 = vsub.f32 %v11357_v19, %v757_v11 }
 0x343   :  { %v758_v9 = vsub.f32 %v11360_v20, %v754_v8 }
 0x344   :  { %v762_v21 = vmul.f32 1.442695, %v759_v13 }
 0x345   :  { %v760_v16 = vmul.f32 1.442695, %v758_v9 }
 0x347   :  { %10523 = vpow2.f32 %v760_v16 }
 0x351   :  { %v11443_v32 = vpop.eup %10523 }
 0x352   :  { %v764_v35 = vsel %vm239_vm2, %v11443_v32, 0.0 }
 0x38f   :  { %v1100_v50 = vpop.f32.mrb[10].mxu1 }
 0x390   :  { %v1105_v51 = vmul.f32 0.35355338, %v1100_v50  ;;  %v1024_v52 = vpop.f32.mrb[10].mxu0  ;;  %v9167_v53 = vpop.f32.mrb[11].mxu1 }
 0x391   :  { %v1104_v54 = vmul.f32 0.35355338, %v1024_v52  ;;  %v9162_v55 = vpop.f32.mrb[11].mxu0 }
 0x392   :  { %v1107_v56 = vadd.f32 %v1105_v51, %v11296_v42 }
 0x393   :  { %v1106_v57 = vadd.f32 %v1104_v54, %v11296_v42 }
 0x394   :  { %v1111_v58 = vsel %vm239_vm2, %v1107_v56, -inf }
 0x395   :  { %1112 = vmax.xlane.f32.xlu1 %v1111_v58  ;;  %v1108_v59 = vsel %vm239_vm2, %v1106_v57, -inf }
 0x396   :  { %1109 = vmax.xlane.f32.xlu0 %v1108_v59  ;;  %v1636_v59 = vld [vmem:[%s12429_s5] sm:$0xff] }
 0x397   :  { %v9189_v62 = vpop.f32.mrb[12].mxu1 }
 0x398   :  { %v1305_v63 = vadd.f32 %v9189_v62, %v8414_v60  ;;  %v1299_v0 = vpop.f32.mrb[13].mxu1  ;;  %v9178_v1 = vpop.f32.mrb[12].mxu0 }
 0x399   :  { %v1300_v2 = vadd.f32 %v8414_v60, %v1299_v0  ;;  %v1217_v3 = vadd.f32 %v9178_v1, %v8406_v61  ;;  %v1211_v4 = vpop.f32.mrb[13].mxu0  ;;  %v1637_v60 = vld [vmem:[%s12429_s5 + $0x8] sm:$0xff] }
 0x39a   :  { %9196 = vmatpush3.xpose.msk.msra.mxu1 %vm239_vm2, %v1305_v63  ;;  %v1212_v5 = vadd.f32 %v8406_v61, %v1211_v4  ;;  %v8426_v61 = vld [vmem:[%s12429_s5 + $0x20] sm:$0xff]  ;;  %v10066_v62 = vpack.c.bf16 %v1637_v60, %v1636_v59  ;;  %v8427_v63 = vld [vmem:[%s12429_s5 + $0x28] sm:$0xff]  ;;  %v1997_v60 = vld [vmem:[#allocation4 + $0x20] sm:$0xff] }
 0x39b   :  { %9191 = vmatpush3.xpose.msk.msra.mxu0 %vm239_vm2, %v1300_v2  ;;  %9205 = vmatprep.subr.mxu1 %v11118_v15  ;;  %v10074_v0 = vpack.c.bf16 %v8427_v63, %v8426_v61  ;;  %v1993_v59 = vld [vmem:[#allocation4 + $0x8] sm:$0xff] }
 0x39c   :  { %9200 = vmatprep.subr.mxu0 %v11118_v15  ;;  %v1998_v61 = vld [vmem:[#allocation4 + $0x28] sm:$0xff] }
 0x39d   :  { %9198 = vmatmul.mubr.msk.f32.vlgmr.msra.gmra.mrb[14].mxu1 %vm239_vm2, %v1217_v3  ;;  %v11518_v63 = vpack.c.bf16 %v1998_v61, %v1997_v60 }
 0x39e   :  { %9193 = vmatmul.mubr.msk.f32.vlgmr.msra.gmra.mrb[14].mxu0 %vm239_vm2, %v1212_v5  ;;  %9206 = vmatpush3.msra.mxu1 %v11229_v14  ;;  %v403_v14 = vsub.f32 %v11299_v48, %v401_v7 }
 0x39f   :  { %9201 = vmatpush3.msra.mxu0 %v11220_v12  ;;  %9207 = vmatprep.mubr.msk.f32.mxu1 %vm11119_vm1, %v11118_v15  ;;  %v404_v12 = vmul.f32 1.442695, %v402_v10 }
 0x3a0   :  { %9202 = vmatprep.mubr.msk.f32.mxu0 %vm11119_vm1, %v11118_v15  ;;  %v406_v23 = vmul.f32 1.442695, %v403_v14  ;;  %10067 = vmatprep.subr.bf16.mxu0 %v10066_v62 }
 0x3a1   :  { %10525 = vpow2.f32 %v404_v12  ;;  %10075 = vmatprep.subr.bf16.mxu1 %v10074_v0 }
 0x3a2   :  { %10527 = vpow2.f32 %v762_v21 }
 0x3a3   :  { %10529 = vpow2.f32 %v406_v23 }
 0x3ab   :  { %v11446_v34 = vpop.eup %10525 }
 0x3ac   :  { %v10528_v36 = vpop.eup %10527  ;;  %v408_v37 = vsel %vm239_vm2, %v11446_v34, 0.0 }
 0x3ad   :  { %v767_v38 = vsel %vm239_vm2, %v10528_v36, 0.0 }
 0x422   :  { %v1113_v17 = vpop.xlane.xlu1 %1112 }
 0x423   :  { %v1110_v18 = vpop.xlane.xlu0 %1109  ;;  %v1115_v22 = vsub.f32 %v1107_v56, %v1113_v17 }
 0x424   :  { %v1114_v24 = vsub.f32 %v1106_v57, %v1110_v18 }
 0x425   :  { %v1118_v25 = vmul.f32 1.442695, %v1115_v22 }
 0x426   :  { %v1116_v49 = vmul.f32 1.442695, %v1114_v24 }
 0x427   :  { %10531 = vpow2.f32 %v1118_v25 }
 0x428   :  { %10533 = vpow2.f32 %v1116_v49 }
 0x470   :  { %v1456_v20 = vpop.f32.mrb[14].mxu1 }
 0x471   :  { %v1461_v26 = vmul.f32 0.35355338, %v1456_v20  ;;  %v1380_v27 = vpop.f32.mrb[14].mxu0  ;;  %v9199_v19 = vpop.f32.mrb[15].mxu1 }
 0x472   :  { %v1460_v28 = vmul.f32 0.35355338, %v1380_v27  ;;  %v9194_v29 = vpop.f32.mrb[15].mxu0 }
 0x473   :  { %v1463_v48 = vadd.f32 %v1461_v26, %v11296_v42 }
 0x474   :  { %v1462_v30 = vadd.f32 %v1460_v28, %v11296_v42  ;;  %v10530_v42 = vpop.eup %10529 }
 0x475   :  { %v1467_v31 = vsel %vm239_vm2, %v1463_v48, -inf  ;;  %v10532_v41 = vpop.eup %10531  ;;  %v411_v43 = vsel %vm239_vm2, %v10530_v42, 0.0 }
 0x476   :  { %1468 = vmax.xlane.f32.xlu1 %v1467_v31  ;;  %v1464_v33 = vsel %vm239_vm2, %v1462_v30, -inf  ;;  %v10534_v44 = vpop.eup %10533  ;;  %v1123_v45 = vsel %vm239_vm2, %v10532_v41, 0.0  ;;  %v1639_v31 = vld [vmem:[%s12429_s5 + $0x18] sm:$0xff] }
 0x477   :  { %1465 = vmax.xlane.f32.xlu0 %v1464_v33  ;;  %v1120_v46 = vsel %vm239_vm2, %v10534_v44, 0.0 }
 0x47a   :  { %765 = vadd.xlane.f32.xlu1 %v764_v35 }
 0x47b   :  { %409 = vadd.xlane.f32.xlu0 %v408_v37  ;;  %v8435_v37 = vld [vmem:[%s12429_s5 + $0x48] sm:$0xff] }
 0x47e   :  { %768 = vadd.xlane.f32.xlu1 %v767_v38 }
 0x47f   :  { %412 = vadd.xlane.f32.xlu0 %v411_v43 }
 0x482   :  { %1124 = vadd.xlane.f32.xlu1 %v1123_v45  ;;  %v8436_v45 = vld [vmem:[%s12429_s5 + $0x50] sm:$0xff] }
 0x483   :  { %1121 = vadd.xlane.f32.xlu0 %v1120_v46 }
 0x503   :  { %v1469_v47 = vpop.xlane.xlu1 %1468 }
 0x504   :  { %v1471_v50 = vsub.f32 %v1463_v48, %v1469_v47  ;;  %v1466_v51 = vpop.xlane.xlu0 %1465 }
 0x505   :  { %v1470_v52 = vsub.f32 %v1462_v30, %v1466_v51  ;;  %v1638_v30 = vld [vmem:[%s12429_s5 + $0x10] sm:$0xff] }
 0x506   :  { %v1474_v53 = vmul.f32 1.442695, %v1471_v50  ;;  %v10070_v33 = vpack.c.bf16 %v1639_v31, %v1638_v30  ;;  %v8437_v50 = vld [vmem:[%s12429_s5 + $0x58] sm:$0xff]  ;;  %v8444_v51 = vld [vmem:[%s12429_s5 + $0x70] sm:$0xff] }
 0x507   :  { %v1472_v54 = vmul.f32 1.442695, %v1470_v52  ;;  %v766_v1 = vpop.xlane.xlu1 %765  ;;  %v8445_v52 = vld [vmem:[%s12429_s5 + $0x78] sm:$0xff] }
 0x508   :  { %10535 = vpow2.f32 %v1474_v53  ;;  %v410_v2 = vpop.xlane.xlu0 %409 }
 0x509   :  { %10537 = vpow2.f32 %v1472_v54 }
 0x50b   :  { %v769_v3 = vpop.xlane.xlu1 %768 }
 0x50c   :  { %v413_v4 = vpop.xlane.xlu0 %412  ;;  %10539 = vrcp.f32 %v769_v3  ;;  %v1999_v3 = vld [vmem:[#allocation4 + $0x30] sm:$0xff] }
 0x50d   :  { %10541 = vrcp.f32 %v413_v4  ;;  %v2000_v4 = vld [vmem:[#allocation4 + $0x38] sm:$0xff] }
 0x50e   :  { %10543 = vrcp.f32 %v766_v1  ;;  %v11120_v1 = vmov 0.0|0.0  }
 0x50f   :  { %v1125_v5 = vpop.xlane.xlu1 %1124  ;;  %10545 = vrcp.f32 %v410_v2  ;;  %v1995_v2 = vld [vmem:[#allocation4 + $0x18] sm:$0xff] }
 0x510   :  { %v1122_v6 = vpop.xlane.xlu0 %1121  ;;  %10547 = vrcp.f32 %v1125_v5 }
 0x511   :  { %10549 = vrcp.f32 %v1122_v6  ;;  %v11528_v6 = vpack.c.bf16 %v2000_v4, %v1999_v3 }
 0x512   :  { %v10536_v55 = vpop.eup %10535 }
 0x513   :  { %v10538_v56 = vpop.eup %10537  ;;  %v1479_v57 = vsel %vm239_vm2, %v10536_v55, 0.0 }
 0x514   :  { %1480 = vadd.xlane.f32.xlu1 %v1479_v57  ;;  %v1476_v58 = vsel %vm239_vm2, %v10538_v56, 0.0  ;;  %v10094_v57 = vpack.c.bf16 %v8445_v52, %v8444_v51 }
 0x515   :  { %1477 = vadd.xlane.f32.xlu0 %v1476_v58  ;;  %v1992_v58 = vld [vmem:[#allocation4] sm:$0xff] }
 0x516   :  { %v10540_v7 = vpop.eup %10539 }
 0x517   :  { %v10542_v9 = vpop.eup %10541  ;;  %v773_v16 = vmul.f32 %v10540_v7, %v10528_v36  ;;  %v8434_v36 = vld [vmem:[%s12429_s5 + $0x40] sm:$0xff]  ;;  %v2002_v7 = vld [vmem:[#allocation4 + $0x40] sm:$0xff] }
 0x518   :  { %v10544_v11 = vpop.eup %10543  ;;  %v417_v14 = vmul.f32 %v10542_v9, %v10530_v42  ;;  %v8442_v42 = vld [vmem:[%s12429_s5 + $0x60] sm:$0xff]  ;;  %v10082_v38 = vpack.c.bf16 %v8435_v37, %v8434_v36  ;;  %v2007_v9 = vld [vmem:[#allocation4 + $0x60] sm:$0xff] }
 0x519   :  { %v10546_v13 = vpop.eup %10545  ;;  %v772_v18 = vmul.f32 %v10544_v11, %v11443_v32  ;;  %v8428_v32 = vld [vmem:[%s12429_s5 + $0x30] sm:$0xff] }
 0x51a   :  { %v10548_v12 = vpop.eup %10547  ;;  %v416_v21 = vmul.f32 %v10546_v13, %v11446_v34  ;;  %v775_v22 = vadd.f32 %v773_v16, %v417_v14  ;;  %v8429_v34 = vld [vmem:[%s12429_s5 + $0x38] sm:$0xff]  ;;  %v2004_v16 = vld [vmem:[#allocation4 + $0x50] sm:$0xff]  ;;  %v2005_v14 = vld [vmem:[#allocation4 + $0x58] sm:$0xff] }
 0x51b   :  { %v10550_v17 = vpop.eup %10549  ;;  %v1129_v23 = vmul.f32 %v10548_v12, %v10532_v41  ;;  %v10078_v35 = vpack.c.bf16 %v8429_v34, %v8428_v32  ;;  %v8443_v41 = vld [vmem:[%s12429_s5 + $0x68] sm:$0xff] }
 0x51c   :  { %v1128_v24 = vmul.f32 %v10550_v17, %v10534_v44  ;;  %v774_v20 = vadd.f32 %v772_v18, %v416_v21  ;;  %v10090_v43 = vpack.c.bf16 %v8443_v41, %v8442_v42  ;;  %v2009_v12 = vld [vmem:[#allocation4 + $0x70] sm:$0xff]  ;;  %v2010_v17 = vld [vmem:[#allocation4 + $0x78] sm:$0xff]  ;;  %v11548_v18 = vpack.c.bf16 %v2005_v14, %v2004_v16 }
 0x51d   :  { %v1131_v26 = vadd.f32 %v1129_v23, %v775_v22  ;;  %v11550_v21 = vpack.c.bf16 %v2010_v17, %v2009_v12 }
 0x51e   :  { %v1130_v19 = vadd.f32 %v1128_v24, %v774_v20 }
 0x5a1   :  { %v1481_v8 = vpop.xlane.xlu1 %1480 }
 0x5a2   :  { %10551 = vrcp.f32 %v1481_v8  ;;  %v1478_v10 = vpop.xlane.xlu0 %1477  ;;  %v2003_v8 = vld [vmem:[#allocation4 + $0x48] sm:$0xff] }
 0x5a3   :  { %10553 = vrcp.f32 %v1478_v10  ;;  %v2008_v10 = vld [vmem:[#allocation4 + $0x68] sm:$0xff]  ;;  %v11538_v11 = vpack.c.bf16 %v2003_v8, %v2002_v7 }
 0x5a4   :  { %v11540_v13 = vpack.c.bf16 %v2008_v10, %v2007_v9 }
 0x5ac   :  { %v10552_v25 = vpop.eup %10551 }
 0x5ad   :  { %v10554_v49 = vpop.eup %10553  ;;  %v1485_v27 = vmul.f32 %v10552_v25, %v10536_v55 }
 0x5ae   :  { %v1484_v28 = vmul.f32 %v10554_v49, %v10538_v56  ;;  %v10086_v56 = vpack.c.bf16 %v8437_v50, %v8436_v45 }
 0x5af   :  { %v1487_v29 = vadd.f32 %v1485_v27, %v1131_v26 }
 0x5b0   :  { %v1486_v48 = vadd.f32 %v1484_v28, %v1130_v19  ;;  %v8423_v19 = vld [vmem:[%s12431_s7] ss:$0 sm:$0xff]  ;;  %v8431_v28 = vld [vmem:[%s12431_s7 + $0x1] ss:$0 sm:$0xff] }
 0x5b1   :  { %9208 = vmatmul.mubr.msk.f32.vlgmr.msra.gmra.mrb[16].mxu1 %vm239_vm2, %v1487_v29 }
 0x5b2   :  { %9203 = vmatmul.mubr.msk.f32.vlgmr.msra.gmra.mrb[16].mxu0 %vm239_vm2, %v1486_v48  ;;  %10077 = vmatpush3.bf16.msra.mxu1 %v10074_v0  ;;  %v1994_v0 = vld [vmem:[#allocation4 + $0x10] sm:$0xff] }
 0x5b3   :  { %10069 = vmatpush3.bf16.msra.mxu0 %v10066_v62  ;;  %10079 = vmatprep.subr.bf16.mxu1 %v10078_v35  ;;  %v11516_v62 = vpack.c.bf16 %v1993_v59, %v1992_v58  ;;  %v11526_v5 = vpack.c.bf16 %v1995_v2, %v1994_v0 }
 0x5b4   :  { %10071 = vmatprep.subr.bf16.mxu0 %v10070_v33 }
 0x5b6   :  { %10081 = vmatpush3.bf16.msra.mxu1 %v10078_v35 }
 0x5b7   :  { %10073 = vmatpush3.bf16.msra.mxu0 %v10070_v33  ;;  %10091 = vmatprep.subr.bf16.mxu1 %v10090_v43 }
 0x5b8   :  { %10083 = vmatprep.subr.bf16.mxu0 %v10082_v38 }
 0x684   :  { %v1630_v44 = vpop.f32.mrb[16].mxu1 }
 0x685   :  { %v1557_v46 = vpop.f32.mrb[16].mxu0  ;;  %v9209_v47 = vpop.f32.mrb[17].mxu1  ;;  %v1635_v55 = vmul.f32 0.25, %v1630_v44 }
 0x686   :  { %v1634_v53 = vmul.f32 0.25, %v1557_v46  ;;  %v9204_v54 = vpop.f32.mrb[17].mxu0  ;;  %v8447_v46 = vld [vmem:[%s12431_s7 + $0x3] ss:$0 sm:$0xff]  ;;  %v8439_v47 = vld [vmem:[%s12431_s7 + $0x2] ss:$0 sm:$0xff] }
 0x688   :  { %9218 = vmatprep.mubr.msk.f32.mxu0 %vm71_vm0, %v1634_v53  ;;  %9229 = vmatprep.mubr.msk.f32.mxu1 %vm71_vm0, %v1634_v53 }
 0x689   :  { %9219 = vmatmul.mubr.msk.f32.vlgmr.msra.gmra.mrb[18].mxu0 %vm71_vm0, %v1635_v55  ;;  %9230 = vmatmul.mubr.msk.f32.vlgmr.msra.gmra.mrb[18].mxu1 %vm71_vm0, %v1635_v55 }
 0x68a   :  { %10085 = vmatpush3.bf16.msra.mxu0 %v10082_v38  ;;  %10093 = vmatpush3.bf16.msra.mxu1 %v10090_v43 }
 0x68b   :  { %9240 = vmatprep.mubr.msk.f32.mxu0 %vm71_vm0, %v1634_v53  ;;  %9251 = vmatprep.mubr.msk.f32.mxu1 %vm71_vm0, %v1634_v53 }
 0x68c   :  { %10087 = vmatprep.subr.bf16.mxu0 %v10086_v56  ;;  %10095 = vmatprep.subr.bf16.mxu1 %v10094_v57 }
 0x68e   :  { %10089 = vmatpush3.bf16.msra.mxu0 %v10086_v56  ;;  %10097 = vmatpush3.bf16.msra.mxu1 %v10094_v57 }
 0x68f   :  { %10098 = vmatprep.subr.bf16.mxu0 %v11120_v1  ;;  %10104 = vmatprep.subr.bf16.mxu1 %v11120_v1 }
 0x691   :  { %9241 = vmatmul.mubr.msk.f32.vlgmr.msra.gmra.mrb[20].mxu0 %vm71_vm0, %v1635_v55  ;;  %9252 = vmatmul.mubr.msk.f32.vlgmr.msra.gmra.mrb[20].mxu1 %vm71_vm0, %v1635_v55 }
 0x692   :  { %10100 = vmatpush3.bf16.msra.mxu0 %v11516_v62  ;;  %10106 = vmatpush3.bf16.msra.mxu1 %v11518_v63 }
 0x693   :  { %10101 = vmatprep.subr.bf16.mxu0 %v11120_v1  ;;  %10107 = vmatprep.subr.bf16.mxu1 %v11120_v1 }
 0x694   :  { %9262 = vmatprep.mubr.msk.f32.mxu0 %vm11119_vm1, %v11118_v15  ;;  %9273 = vmatprep.mubr.msk.f32.mxu1 %vm11119_vm1, %v11118_v15 }
 0x696   :  { %10103 = vmatpush3.bf16.msra.mxu0 %v11526_v5  ;;  %10109 = vmatpush3.bf16.msra.mxu1 %v11528_v6 }
 0x697   :  { %10110 = vmatprep.subr.bf16.mxu0 %v11120_v1  ;;  %10116 = vmatprep.subr.bf16.mxu1 %v11120_v1 }
 0x699   :  { %9263 = vmatmul.mubr.f32.vlgmr.msra.gmra.mrb[22].mxu0 %v11118_v15  ;;  %9274 = vmatmul.mubr.f32.vlgmr.msra.gmra.mrb[22].mxu1 %v11118_v15 }
 0x69a   :  { %10112 = vmatpush3.bf16.msra.mxu0 %v11538_v11  ;;  %10118 = vmatpush3.bf16.msra.mxu1 %v11540_v13 }
 0x69b   :  { %10113 = vmatprep.subr.bf16.mxu0 %v11120_v1  ;;  %10119 = vmatprep.subr.bf16.mxu1 %v11120_v1 }
 0x69c   :  { %9284 = vmatprep.mubr.msk.f32.mxu0 %vm11119_vm1, %v11118_v15  ;;  %9295 = vmatprep.mubr.msk.f32.mxu1 %vm11119_vm1, %v11118_v15 }
 0x69e   :  { %10115 = vmatpush3.bf16.msra.mxu0 %v11548_v18  ;;  %10121 = vmatpush3.bf16.msra.mxu1 %v11550_v21 }
 0x69f   :  { %10122 = vmatprep.subr.bf16.mxu0 %v11120_v1  ;;  %10128 = vmatprep.subr.bf16.mxu1 %v11120_v1 }
 0x6a1   :  { %9285 = vmatmul.mubr.f32.vlgmr.msra.gmra.mrb[24].mxu0 %v11118_v15  ;;  %9296 = vmatmul.mubr.f32.vlgmr.msra.gmra.mrb[24].mxu1 %v11118_v15 }
 0x6a2   :  { %10124 = vmatpush3.bf16.msra.mxu0 %v11516_v62  ;;  %10130 = vmatpush3.bf16.msra.mxu1 %v11518_v63 }
 0x6a3   :  { %10125 = vmatprep.subr.bf16.mxu0 %v11120_v1  ;;  %10131 = vmatprep.subr.bf16.mxu1 %v11120_v1 }
 0x6a4   :  { %9306 = vmatprep.mubr.msk.f32.mxu0 %vm11119_vm1, %v11118_v15  ;;  %9317 = vmatprep.mubr.msk.f32.mxu1 %vm11119_vm1, %v11118_v15 }
 0x6a6   :  { %10127 = vmatpush3.bf16.msra.mxu0 %v11526_v5  ;;  %10133 = vmatpush3.bf16.msra.mxu1 %v11528_v6 }
 0x6a7   :  { %10134 = vmatprep.subr.bf16.mxu0 %v11120_v1  ;;  %10140 = vmatprep.subr.bf16.mxu1 %v11120_v1 }
 0x75c   :  { %v9220_v22 = vpop.f32.mrb[18].mxu0  ;;  %v9231_v23 = vpop.f32.mrb[18].mxu1 }
 0x75d   :  { %v1719_v24 = vpop.f32.mrb[19].mxu0  ;;  %v1807_v25 = vpop.f32.mrb[19].mxu1  ;;  %v11586_v30 = vadd.f32 %v9220_v22, %v8423_v19  ;;  %v11588_v31 = vadd.f32 %v9231_v23, %v8431_v28 }
 0x75e   :  { %v11582_v29 = vadd.f32 %v8423_v19, %v1719_v24  ;;  %v11584_v48 = vadd.f32 %v8431_v28, %v1807_v25 }
 0x764   :  { %v9242_v20 = vpop.f32.mrb[20].mxu0  ;;  %v9253_v49 = vpop.f32.mrb[20].mxu1 }
 0x765   :  { %v1895_v26 = vpop.f32.mrb[21].mxu0  ;;  %v1983_v27 = vpop.f32.mrb[21].mxu1  ;;  %v11602_v53 = vadd.f32 %v9242_v20, %v8439_v47  ;;  %v11606_v57 = vadd.f32 %v9253_v49, %v8447_v46 }
 0x766   :  { %v11600_v52 = vadd.f32 %v8447_v46, %v1983_v27  ;;  %v11604_v54 = vadd.f32 %v8439_v47, %v1895_v26 }
 0x76c   :  { %v2080_v32 = vpop.f32.mrb[22].mxu0  ;;  %v2168_v33 = vpop.f32.mrb[22].mxu1 }
 0x76d   :  { %v2085_v34 = vrot.slane %v2080_v32, 1  ;;  %v2088_v35 = vadd.f32 %v2080_v32, %v11582_v29  ;;  %v2173_v36 = vrot.slane %v2168_v33, 1  ;;  %v2176_v37 = vadd.f32 %v2168_v33, %v11584_v48  ;;  %v9264_v42 = vpop.f32.mrb[23].mxu0  ;;  %v9275_v38 = vpop.f32.mrb[23].mxu1 }
 0x76f   :  { %v2089_v41 = vadd.f32 %v2085_v34, %v11586_v30  ;;  %v8450_v43 = vmul.f32 -1.442695, %v2088_v35  ;;  %v2177_v44 = vadd.f32 %v2173_v36, %v11588_v31  ;;  %v8452_v45 = vmul.f32 -1.442695, %v2176_v37 }
 0x771   :  { %10555 = vpow2.f32 %v8450_v43  ;;  %v8451_v50 = vmul.f32 -1.442695, %v2089_v41  ;;  %v8453_v51 = vmul.f32 -1.442695, %v2177_v44 }
 0x772   :  { %10557 = vpow2.f32 %v8452_v45 }
 0x773   :  { %10559 = vpow2.f32 %v8451_v50 }
 0x774   :  { %10561 = vpow2.f32 %v8453_v51  ;;  %v2256_v55 = vpop.f32.mrb[24].mxu0  ;;  %v2334_v56 = vpop.f32.mrb[24].mxu1 }
 0x775   :  { %v2261_v58 = vrot.slane %v2256_v55, 1  ;;  %v2339_v59 = vrot.slane %v2334_v56, 1  ;;  %v2342_v60 = vadd.f32 %v2334_v56, %v11600_v52  ;;  %v9286_v61 = vpop.f32.mrb[25].mxu0  ;;  %v9297_v0 = vpop.f32.mrb[25].mxu1  ;;  %v2264_v2 = vadd.f32 %v2256_v55, %v11604_v54 }
 0x777   :  { %v2265_v3 = vadd.f32 %v2261_v58, %v11602_v53  ;;  %v2343_v4 = vadd.f32 %v2339_v59, %v11606_v57  ;;  %v8454_v7 = vmul.f32 -1.442695, %v2342_v60  ;;  %10563 = vtanh.f32 %v2264_v2 }
 0x779   :  { %v8455_v8 = vmul.f32 -1.442695, %v2343_v4  ;;  %10565 = vtanh.f32 %v2265_v3 }
 0x77a   :  { %10567 = vpow2.f32 %v8454_v7 }
 0x77b   :  { %v10556_v9 = vpop.eup %10555  ;;  %10569 = vpow2.f32 %v8455_v8 }
 0x77c   :  { %v10558_v10 = vpop.eup %10557  ;;  %v2096_v16 = vadd.f32 1.0, %v10556_v9 }
 0x77d   :  { %v10560_v14 = vpop.eup %10559  ;;  %v2184_v12 = vadd.f32 1.0, %v10558_v10 }
 0x77e   :  { %v10562_v17 = vpop.eup %10561  ;;  %v2097_v22 = vadd.f32 1.0, %v10560_v14  ;;  %10571 = vrcp.f32 %v2096_v16 }
 0x77f   :  { %v2185_v23 = vadd.f32 1.0, %v10562_v17  ;;  %10573 = vrcp.f32 %v2184_v12 }
 0x780   :  { %10575 = vrcp.f32 %v2097_v22 }
 0x781   :  { %10577 = vrcp.f32 %v2185_v23  ;;  %v10564_v24 = vpop.eup %10563 }
 0x783   :  { %v10566_v25 = vpop.eup %10565 }
 0x784   :  { %v10568_v20 = vpop.eup %10567 }
 0x785   :  { %v10570_v49 = vpop.eup %10569  ;;  %v2350_v28 = vadd.f32 1.0, %v10568_v20 }
 0x786   :  { %v2351_v36 = vadd.f32 1.0, %v10570_v49 }
 0x787   :  { %10579 = vrcp.f32 %v2350_v28 }
 0x788   :  { %v10572_v26 = vpop.eup %10571 }
 0x789   :  { %v10574_v27 = vpop.eup %10573  ;;  %v2358_v19 = vmul.f32 %v10572_v26, %v10564_v24 }
 0x78a   :  { %v10576_v32 = vpop.eup %10575  ;;  %v2356_v33 = vmul.f32 0.0, %v10574_v27 }
 0x78b   :  { %v10578_v34 = vpop.eup %10577  ;;  %v2359_v35 = vmul.f32 %v10576_v32, %v10566_v25 }
 0x78c   :  { %v2357_v37 = vmul.f32 0.0, %v10578_v34  ;;  %v11612_v42 = vadd.f32 %v2358_v19, %v2356_v33 }
 0x78e   :  { %v11614_v38 = vadd.f32 %v2359_v35, %v2357_v37  ;;  %10581 = vtanh.f32 %v11612_v42 }
 0x78f   :  { %10583 = vrcp.f32 %v2351_v36 }
 0x790   :  { %10585 = vtanh.f32 %v11614_v38 }
 0x791   :  { %v10580_v41 = vpop.eup %10579 }
 0x798   :  { %v10582_v43 = vpop.eup %10581 }
 0x799   :  { %v10584_v44 = vpop.eup %10583  ;;  %v2364_v45 = vmul.f32 %v10582_v43, %v10580_v41 }
 0x79a   :  { %v10586_v46 = vpop.eup %10585 }
 0x79b   :  { %v2365_v47 = vmul.f32 %v10586_v46, %v10584_v44  ;;  %2367 = vst.msk [vmem:[#allocation2] sm:$0x1] %vm2366_vm4, %v2364_v45 }
 0x79d   :  { %2368 = vst.msk [vmem:[#allocation2 + $0x8] sm:$0x1] %vm2366_vm4, %v2365_v47  ;;  %v2371_v50 = vrot.slane %v2365_v47, 7  ;;  %v2721_v47 = vrot.slane %v11614_v38, 7 }
 0x79f   :  { %v2373_v51 = vsel %vm2372_vm5, %v2371_v50, %v2364_v45 }
 0x7a0   :  { %9307 = vmatmul.mubr.msk.f32.vlgmr.msra.gmra.mrb[26].mxu0 %vm71_vm0, %v2373_v51  ;;  %9318 = vmatmul.mubr.msk.f32.vlgmr.msra.gmra.mrb[26].mxu1 %vm71_vm0, %v2373_v51 }
 0x7a1   :  { %10136 = vmatpush3.bf16.msra.mxu0 %v11538_v11  ;;  %10142 = vmatpush3.bf16.msra.mxu1 %v11540_v13 }
 0x7a2   :  { %10137 = vmatprep.subr.bf16.mxu0 %v11120_v1  ;;  %10143 = vmatprep.subr.bf16.mxu1 %v11120_v1 }
 0x7a3   :  { %9328 = vmatprep.mubr.msk.f32.mxu0 %vm11119_vm1, %v11118_v15  ;;  %9339 = vmatprep.mubr.msk.f32.mxu1 %vm11119_vm1, %v11118_v15 }
 0x7a5   :  { %10139 = vmatpush3.bf16.msra.mxu0 %v11548_v18  ;;  %10145 = vmatpush3.bf16.msra.mxu1 %v11550_v21 }
 0x7a6   :  { %10146 = vmatprep.subr.bf16.mxu0 %v11120_v1  ;;  %10152 = vmatprep.subr.bf16.mxu1 %v11120_v1 }
 0x7a8   :  { %9329 = vmatmul.mubr.msk.f32.vlgmr.msra.gmra.mrb[28].mxu0 %vm71_vm0, %v2373_v51  ;;  %9340 = vmatmul.mubr.msk.f32.vlgmr.msra.gmra.mrb[28].mxu1 %vm71_vm0, %v2373_v51 }
 0x7a9   :  { %10148 = vmatpush3.bf16.msra.mxu0 %v11516_v62  ;;  %10154 = vmatpush3.bf16.msra.mxu1 %v11518_v63 }
 0x7aa   :  { %10149 = vmatprep.subr.bf16.mxu0 %v11120_v1  ;;  %10155 = vmatprep.subr.bf16.mxu1 %v11120_v1 }
 0x7ab   :  { %9350 = vmatprep.mubr.msk.f32.mxu0 %vm11119_vm1, %v11118_v15  ;;  %9361 = vmatprep.mubr.msk.f32.mxu1 %vm11119_vm1, %v11118_v15 }
 0x7ad   :  { %10151 = vmatpush3.bf16.msra.mxu0 %v11526_v5  ;;  %10157 = vmatpush3.bf16.msra.mxu1 %v11528_v6 }
 0x7ae   :  { %10158 = vmatprep.subr.bf16.mxu0 %v11120_v1  ;;  %10164 = vmatprep.subr.bf16.mxu1 %v11120_v1 }
 0x873   :  { %v2442_v55 = vpop.f32.mrb[26].mxu0  ;;  %v2530_v56 = vpop.f32.mrb[26].mxu1 }
 0x874   :  { %v2447_v58 = vrot.slane %v2442_v55, 7  ;;  %v2451_v59 = vadd.f32 %v2442_v55, %v11586_v30  ;;  %v2535_v60 = vrot.slane %v2530_v56, 7  ;;  %v2539_v61 = vadd.f32 %v2530_v56, %v11588_v31  ;;  %v9308_v0 = vpop.f32.mrb[27].mxu0  ;;  %v9319_v2 = vpop.f32.mrb[27].mxu1 }
 0x876   :  { %v2450_v3 = vadd.f32 %v2447_v58, %v11582_v29  ;;  %v8458_v4 = vmul.f32 -1.442695, %v2451_v59  ;;  %v2538_v7 = vadd.f32 %v2535_v60, %v11584_v48  ;;  %v8461_v8 = vmul.f32 -1.442695, %v2539_v61 }
 0x877   :  { %v2720_v58 = vrot.slane %v11612_v42, 7 }
 0x878   :  { %v8457_v9 = vmul.f32 -1.442695, %v2450_v3  ;;  %10587 = vpow2.f32 %v8458_v4  ;;  %v8460_v10 = vmul.f32 -1.442695, %v2538_v7 }
 0x879   :  { %10589 = vpow2.f32 %v8461_v8 }
 0x87a   :  { %10591 = vpow2.f32 %v8457_v9 }
 0x87b   :  { %10593 = vpow2.f32 %v8460_v10  ;;  %v2618_v16 = vpop.f32.mrb[28].mxu0  ;;  %v2696_v14 = vpop.f32.mrb[28].mxu1 }
 0x87c   :  { %v2623_v12 = vrot.slane %v2618_v16, 7  ;;  %v2701_v17 = vrot.slane %v2696_v14, 7  ;;  %v2705_v22 = vadd.f32 %v2696_v14, %v11606_v57  ;;  %v9330_v23 = vpop.f32.mrb[29].mxu0  ;;  %v9341_v24 = vpop.f32.mrb[29].mxu1  ;;  %v2627_v25 = vadd.f32 %v2618_v16, %v11602_v53 }
 0x87e   :  { %v2626_v20 = vadd.f32 %v2623_v12, %v11604_v54  ;;  %v2704_v49 = vadd.f32 %v2701_v17, %v11600_v52  ;;  %v8465_v26 = vmul.f32 -1.442695, %v2705_v22  ;;  %10595 = vtanh.f32 %v2627_v25 }
 0x880   :  { %v8464_v27 = vmul.f32 -1.442695, %v2704_v49  ;;  %10597 = vtanh.f32 %v2626_v20 }
 0x881   :  { %10599 = vpow2.f32 %v8465_v26 }
 0x882   :  { %v10588_v19 = vpop.eup %10587  ;;  %10601 = vpow2.f32 %v8464_v27 }
 0x883   :  { %v10590_v28 = vpop.eup %10589  ;;  %v2459_v32 = vadd.f32 1.0, %v10588_v19 }
 0x884   :  { %v10592_v33 = vpop.eup %10591  ;;  %v2547_v34 = vadd.f32 1.0, %v10590_v28 }
 0x885   :  { %v10594_v35 = vpop.eup %10593  ;;  %v2458_v36 = vadd.f32 1.0, %v10592_v33  ;;  %10603 = vrcp.f32 %v2459_v32 }
 0x886   :  { %v2546_v37 = vadd.f32 1.0, %v10594_v35  ;;  %10605 = vrcp.f32 %v2547_v34 }
 0x887   :  { %10607 = vrcp.f32 %v2458_v36 }
 0x888   :  { %10609 = vrcp.f32 %v2546_v37  ;;  %v10596_v41 = vpop.eup %10595 }
 0x88a   :  { %v10598_v43 = vpop.eup %10597 }
 0x88b   :  { %v10600_v44 = vpop.eup %10599 }
 0x88c   :  { %v10602_v45 = vpop.eup %10601  ;;  %v2713_v55 = vadd.f32 1.0, %v10600_v44 }
 0x88d   :  { %v2712_v0 = vadd.f32 1.0, %v10602_v45 }
 0x88e   :  { %10611 = vrcp.f32 %v2713_v55 }
 0x88f   :  { %v10604_v46 = vpop.eup %10603 }
 0x890   :  { %v10606_v50 = vpop.eup %10605  ;;  %v2727_v51 = vmul.f32 %v10604_v46, %v10596_v41 }
 0x891   :  { %v10608_v56 = vpop.eup %10607  ;;  %v2725_v59 = vmul.f32 %v10606_v50, %v2721_v47 }
 0x892   :  { %v10610_v60 = vpop.eup %10609  ;;  %v2726_v61 = vmul.f32 %v10608_v56, %v10598_v43 }
 0x893   :  { %v2724_v2 = vmul.f32 %v10610_v60, %v2720_v58  ;;  %v11659_v3 = vadd.f32 %v2727_v51, %v2725_v59 }
 0x895   :  { %v11661_v4 = vadd.f32 %v2726_v61, %v2724_v2  ;;  %10613 = vtanh.f32 %v11659_v3 }
 0x896   :  { %10615 = vrcp.f32 %v2712_v0 }
 0x897   :  { %10617 = vtanh.f32 %v11661_v4 }
 0x898   :  { %v10612_v38 = vpop.eup %10611 }
 0x89f   :  { %v10614_v7 = vpop.eup %10613 }
 0x8a0   :  { %v10616_v8 = vpop.eup %10615  ;;  %v2733_v42 = vmul.f32 %v10614_v7, %v10612_v38 }
 0x8a1   :  { %v10618_v9 = vpop.eup %10617 }
 0x8a2   :  { %v2732_v10 = vmul.f32 %v10618_v9, %v10616_v8  ;;  %2736 = vst.msk [vmem:[#allocation2 + $0x8] sm:$0x2] %vm2734_vm6, %v2733_v42 }
 0x8a4   :  { %2735 = vst.msk [vmem:[#allocation2] sm:$0x2] %vm2734_vm6, %v2732_v10  ;;  %v2739_v16 = vrot.slane %v2732_v10, 1 }
 0x8a6   :  { %v2740_v14 = vsel %vm2372_vm5, %v2733_v42, %v2739_v16 }
 0x8a7   :  { %9351 = vmatmul.mubr.msk.f32.vlgmr.msra.gmra.mrb[30].mxu0 %vm71_vm0, %v2740_v14  ;;  %9362 = vmatmul.mubr.msk.f32.vlgmr.msra.gmra.mrb[30].mxu1 %vm71_vm0, %v2740_v14 }
 0x8a8   :  { %10160 = vmatpush3.bf16.msra.mxu0 %v11538_v11  ;;  %10166 = vmatpush3.bf16.msra.mxu1 %v11540_v13 }
 0x8a9   :  { %10161 = vmatprep.subr.bf16.mxu0 %v11120_v1  ;;  %10167 = vmatprep.subr.bf16.mxu1 %v11120_v1 }
 0x8aa   :  { %9372 = vmatprep.mubr.msk.f32.mxu0 %vm11119_vm1, %v11118_v15  ;;  %9383 = vmatprep.mubr.msk.f32.mxu1 %vm11119_vm1, %v11118_v15 }
 0x8ac   :  { %10163 = vmatpush3.bf16.msra.mxu0 %v11548_v18  ;;  %10169 = vmatpush3.bf16.msra.mxu1 %v11550_v21 }
 0x8ad   :  { %10170 = vmatprep.subr.bf16.mxu0 %v11120_v1  ;;  %10176 = vmatprep.subr.bf16.mxu1 %v11120_v1 }
 0x8af   :  { %9373 = vmatmul.mubr.msk.f32.vlgmr.msra.gmra.mrb[32].mxu0 %vm71_vm0, %v2740_v14  ;;  %9384 = vmatmul.mubr.msk.f32.vlgmr.msra.gmra.mrb[32].mxu1 %vm71_vm0, %v2740_v14 }
 0x8b0   :  { %10172 = vmatpush3.bf16.msra.mxu0 %v11516_v62  ;;  %10178 = vmatpush3.bf16.msra.mxu1 %v11518_v63 }
 0x8b1   :  { %10173 = vmatprep.subr.bf16.mxu0 %v11120_v1  ;;  %10179 = vmatprep.subr.bf16.mxu1 %v11120_v1 }
 0x8b2   :  { %9394 = vmatprep.mubr.msk.f32.mxu0 %vm11119_vm1, %v11118_v15  ;;  %9405 = vmatprep.mubr.msk.f32.mxu1 %vm11119_vm1, %v11118_v15 }
 0x8b4   :  { %10175 = vmatpush3.bf16.msra.mxu0 %v11526_v5  ;;  %10181 = vmatpush3.bf16.msra.mxu1 %v11528_v6 }
 0x8b5   :  { %10182 = vmatprep.subr.bf16.mxu0 %v11120_v1  ;;  %10188 = vmatprep.subr.bf16.mxu1 %v11120_v1 }
 0x97a   :  { %v2809_v12 = vpop.f32.mrb[30].mxu0  ;;  %v2898_v17 = vpop.f32.mrb[30].mxu1 }
 0x97b   :  { %v2814_v22 = vrot.slane %v2809_v12, 6  ;;  %v2815_v23 = vrot.slane %v2809_v12, 7  ;;  %v2903_v24 = vrot.slane %v2898_v17, 6  ;;  %v2904_v25 = vrot.slane %v2898_v17, 7  ;;  %v9352_v20 = vpop.f32.mrb[31].mxu0  ;;  %v9363_v49 = vpop.f32.mrb[31].mxu1 }
 0x97c   :  { %v3092_v20 = vrot.slane %v11659_v3, 7 }
 0x97d   :  { %v2818_v26 = vadd.f32 %v2814_v22, %v11582_v29  ;;  %v2819_v27 = vadd.f32 %v2815_v23, %v11586_v30  ;;  %v2907_v19 = vadd.f32 %v2903_v24, %v11584_v48  ;;  %v2908_v28 = vadd.f32 %v2904_v25, %v11588_v31 }
 0x97e   :  { %v3091_v22 = vrot.slane %v11661_v4, 7 }
 0x97f   :  { %v8467_v32 = vmul.f32 -1.442695, %v2818_v26  ;;  %v8468_v33 = vmul.f32 -1.442695, %v2819_v27  ;;  %v8470_v34 = vmul.f32 -1.442695, %v2907_v19 }
 0x980   :  { %v8471_v35 = vmul.f32 -1.442695, %v2908_v28 }
 0x981   :  { %10619 = vpow2.f32 %v8467_v32 }
 0x982   :  { %10621 = vpow2.f32 %v8468_v33  ;;  %v2987_v36 = vpop.f32.mrb[32].mxu0  ;;  %v3066_v37 = vpop.f32.mrb[32].mxu1 }
 0x983   :  { %10623 = vpow2.f32 %v8470_v34  ;;  %v2992_v41 = vrot.slane %v2987_v36, 6  ;;  %v2993_v43 = vrot.slane %v2987_v36, 7  ;;  %v3071_v44 = vrot.slane %v3066_v37, 6  ;;  %v9374_v45 = vpop.f32.mrb[33].mxu0  ;;  %v9385_v46 = vpop.f32.mrb[33].mxu1 }
 0x984   :  { %10625 = vpow2.f32 %v8471_v35  ;;  %v3072_v47 = vrot.slane %v3066_v37, 7 }
 0x985   :  { %v3075_v50 = vadd.f32 %v3071_v44, %v11600_v52  ;;  %v2996_v51 = vadd.f32 %v2992_v41, %v11604_v54  ;;  %v2997_v56 = vadd.f32 %v2993_v43, %v11602_v53 }
 0x986   :  { %v3076_v55 = vadd.f32 %v3072_v47, %v11606_v57 }
 0x987   :  { %v8474_v58 = vmul.f32 -1.442695, %v3075_v50  ;;  %10627 = vtanh.f32 %v2996_v51 }
 0x988   :  { %v8475_v59 = vmul.f32 -1.442695, %v3076_v55  ;;  %10629 = vtanh.f32 %v2997_v56 }
 0x989   :  { %10631 = vpow2.f32 %v8474_v58 }
 0x98a   :  { %10633 = vpow2.f32 %v8475_v59 }
 0x98b   :  { %v10620_v60 = vpop.eup %10619 }
 0x98c   :  { %v10622_v61 = vpop.eup %10621  ;;  %v2826_v0 = vadd.f32 1.0, %v10620_v60 }
 0x98d   :  { %v10624_v2 = vpop.eup %10623  ;;  %v2827_v38 = vadd.f32 1.0, %v10622_v61 }
 0x98e   :  { %v10626_v7 = vpop.eup %10625  ;;  %10635 = vrcp.f32 %v2826_v0  ;;  %v2915_v8 = vadd.f32 1.0, %v10624_v2 }
 0x98f   :  { %10637 = vrcp.f32 %v2827_v38  ;;  %v2916_v42 = vadd.f32 1.0, %v10626_v7 }
 0x990   :  { %10639 = vrcp.f32 %v2915_v8 }
 0x991   :  { %10641 = vrcp.f32 %v2916_v42  ;;  %v10628_v9 = vpop.eup %10627 }
 0x992   :  { %v10630_v10 = vpop.eup %10629 }
 0x993   :  { %v10632_v16 = vpop.eup %10631 }
 0x994   :  { %v10634_v14 = vpop.eup %10633  ;;  %v3083_v24 = vadd.f32 1.0, %v10632_v16 }
 0x995   :  { %v3084_v26 = vadd.f32 1.0, %v10634_v14 }
 0x996   :  { %10643 = vrcp.f32 %v3083_v24 }
 0x997   :  { %10645 = vrcp.f32 %v3084_v26 }
 0x998   :  { %v10636_v12 = vpop.eup %10635 }
 0x999   :  { %v10638_v17 = vpop.eup %10637  ;;  %v3097_v23 = vmul.f32 %v10636_v12, %v10628_v9 }
 0x99a   :  { %v10640_v25 = vpop.eup %10639  ;;  %v3098_v49 = vmul.f32 %v10638_v17, %v10630_v10 }
 0x99b   :  { %v10642_v27 = vpop.eup %10641  ;;  %v3095_v19 = vmul.f32 %v10640_v25, %v3091_v22 }
 0x99c   :  { %v3096_v28 = vmul.f32 %v10642_v27, %v3092_v20 }
 0x99d   :  { %v11706_v32 = vadd.f32 %v3097_v23, %v3095_v19 }
 0x99e   :  { %v11708_v33 = vadd.f32 %v3098_v49, %v3096_v28 }
 0x99f   :  { %10647 = vtanh.f32 %v11706_v32 }
 0x9a0   :  { %10649 = vtanh.f32 %v11708_v33  ;;  %v10644_v4 = vpop.eup %10643 }
 0x9a1   :  { %v10646_v34 = vpop.eup %10645 }
 0x9a9   :  { %v10648_v35 = vpop.eup %10647 }
 0x9aa   :  { %v10650_v3 = vpop.eup %10649  ;;  %v3103_v36 = vmul.f32 %v10648_v35, %v10644_v4 }
 0x9ab   :  { %v3104_v37 = vmul.f32 %v10650_v3, %v10646_v34 }
 0x9ac   :  { %3106 = vst.msk [vmem:[#allocation2] sm:$0x4] %vm3105_vm7, %v3103_v36  ;;  %v3110_v41 = vrot.slane %v3103_v36, 2 }
 0x9ad   :  { %3107 = vst.msk [vmem:[#allocation2 + $0x8] sm:$0x4] %vm3105_vm7, %v3104_v37  ;;  %v3111_v43 = vrot.slane %v3104_v37, 1 }
 0x9af   :  { %v3112_v44 = vsel %vm2372_vm5, %v3111_v43, %v3110_v41 }
 0x9b0   :  { %9395 = vmatmul.mubr.msk.f32.vlgmr.msra.gmra.mrb[34].mxu0 %vm71_vm0, %v3112_v44  ;;  %9406 = vmatmul.mubr.msk.f32.vlgmr.msra.gmra.mrb[34].mxu1 %vm71_vm0, %v3112_v44 }
 0x9b1   :  { %10184 = vmatpush3.bf16.msra.mxu0 %v11538_v11  ;;  %10190 = vmatpush3.bf16.msra.mxu1 %v11540_v13 }
 0x9b2   :  { %10185 = vmatprep.subr.bf16.mxu0 %v11120_v1  ;;  %10191 = vmatprep.subr.bf16.mxu1 %v11120_v1 }
 0x9b3   :  { %9416 = vmatprep.mubr.msk.f32.mxu0 %vm11119_vm1, %v11118_v15  ;;  %9427 = vmatprep.mubr.msk.f32.mxu1 %vm11119_vm1, %v11118_v15 }
 0x9b5   :  { %10187 = vmatpush3.bf16.msra.mxu0 %v11548_v18  ;;  %10193 = vmatpush3.bf16.msra.mxu1 %v11550_v21 }
 0x9b6   :  { %10194 = vmatprep.subr.bf16.mxu0 %v11120_v1  ;;  %10200 = vmatprep.subr.bf16.mxu1 %v11120_v1 }
 0x9b8   :  { %9417 = vmatmul.mubr.msk.f32.vlgmr.msra.gmra.mrb[36].mxu0 %vm71_vm0, %v3112_v44  ;;  %9428 = vmatmul.mubr.msk.f32.vlgmr.msra.gmra.mrb[36].mxu1 %vm71_vm0, %v3112_v44 }
 0x9b9   :  { %10196 = vmatpush3.bf16.msra.mxu0 %v11516_v62  ;;  %10202 = vmatpush3.bf16.msra.mxu1 %v11518_v63 }
 0x9ba   :  { %10197 = vmatprep.subr.bf16.mxu0 %v11120_v1  ;;  %10203 = vmatprep.subr.bf16.mxu1 %v11120_v1 }
 0x9bb   :  { %9438 = vmatprep.mubr.msk.f32.mxu0 %vm11119_vm1, %v11118_v15  ;;  %9449 = vmatprep.mubr.msk.f32.mxu1 %vm11119_vm1, %v11118_v15 }
 0x9bd   :  { %10199 = vmatpush3.bf16.msra.mxu0 %v11526_v5  ;;  %10205 = vmatpush3.bf16.msra.mxu1 %v11528_v6 }
 0x9be   :  { %10206 = vmatprep.subr.bf16.mxu0 %v11120_v1  ;;  %10212 = vmatprep.subr.bf16.mxu1 %v11120_v1 }
 0xa83   :  { %v3181_v45 = vpop.f32.mrb[34].mxu0  ;;  %v3270_v46 = vpop.f32.mrb[34].mxu1 }
 0xa84   :  { %v3186_v47 = vrot.slane %v3181_v45, 5  ;;  %v3187_v50 = vrot.slane %v3181_v45, 6  ;;  %v3275_v51 = vrot.slane %v3270_v46, 5  ;;  %v3276_v55 = vrot.slane %v3270_v46, 6  ;;  %v9396_v56 = vpop.f32.mrb[35].mxu0  ;;  %v9407_v58 = vpop.f32.mrb[35].mxu1 }
 0xa85   :  { %v3464_v56 = vrot.slane %v11708_v33, 7 }
 0xa86   :  { %v3190_v59 = vadd.f32 %v3186_v47, %v11582_v29  ;;  %v3191_v60 = vadd.f32 %v3187_v50, %v11586_v30  ;;  %v3279_v61 = vadd.f32 %v3275_v51, %v11584_v48  ;;  %v3280_v0 = vadd.f32 %v3276_v55, %v11588_v31 }
 0xa87   :  { %v3463_v47 = vrot.slane %v11706_v32, 7 }
 0xa88   :  { %v8477_v2 = vmul.f32 -1.442695, %v3190_v59  ;;  %v8478_v38 = vmul.f32 -1.442695, %v3191_v60  ;;  %v8480_v7 = vmul.f32 -1.442695, %v3279_v61 }
 0xa89   :  { %v8481_v8 = vmul.f32 -1.442695, %v3280_v0 }
 0xa8a   :  { %10651 = vpow2.f32 %v8477_v2 }
 0xa8b   :  { %10653 = vpow2.f32 %v8478_v38  ;;  %v3359_v42 = vpop.f32.mrb[36].mxu0  ;;  %v3438_v9 = vpop.f32.mrb[36].mxu1 }
 0xa8c   :  { %10655 = vpow2.f32 %v8480_v7  ;;  %v3364_v10 = vrot.slane %v3359_v42, 5  ;;  %v3365_v16 = vrot.slane %v3359_v42, 6  ;;  %v3443_v14 = vrot.slane %v3438_v9, 5  ;;  %v9418_v12 = vpop.f32.mrb[37].mxu0  ;;  %v9429_v17 = vpop.f32.mrb[37].mxu1 }
 0xa8d   :  { %10657 = vpow2.f32 %v8481_v8  ;;  %v3444_v22 = vrot.slane %v3438_v9, 6 }
 0xa8e   :  { %v3447_v23 = vadd.f32 %v3443_v14, %v11600_v52  ;;  %v3368_v24 = vadd.f32 %v3364_v10, %v11604_v54  ;;  %v3369_v20 = vadd.f32 %v3365_v16, %v11602_v53 }
 0xa8f   :  { %v3448_v25 = vadd.f32 %v3444_v22, %v11606_v57 }
 0xa90   :  { %v8484_v49 = vmul.f32 -1.442695, %v3447_v23  ;;  %10659 = vtanh.f32 %v3368_v24 }
 0xa91   :  { %v8485_v26 = vmul.f32 -1.442695, %v3448_v25  ;;  %10661 = vtanh.f32 %v3369_v20 }
 0xa92   :  { %10663 = vpow2.f32 %v8484_v49 }
 0xa93   :  { %10665 = vpow2.f32 %v8485_v26 }
 0xa94   :  { %v10652_v27 = vpop.eup %10651 }
 0xa95   :  { %v10654_v19 = vpop.eup %10653  ;;  %v3198_v28 = vadd.f32 1.0, %v10652_v27 }
 0xa96   :  { %v10656_v4 = vpop.eup %10655  ;;  %v3199_v34 = vadd.f32 1.0, %v10654_v19 }
 0xa97   :  { %v10658_v35 = vpop.eup %10657  ;;  %10667 = vrcp.f32 %v3198_v28  ;;  %v3287_v3 = vadd.f32 1.0, %v10656_v4 }
 0xa98   :  { %10669 = vrcp.f32 %v3199_v34  ;;  %v3288_v36 = vadd.f32 1.0, %v10658_v35 }
 0xa99   :  { %10671 = vrcp.f32 %v3287_v3 }
 0xa9a   :  { %10673 = vrcp.f32 %v3288_v36  ;;  %v10660_v37 = vpop.eup %10659 }
 0xa9b   :  { %v10662_v41 = vpop.eup %10661 }
 0xa9c   :  { %v10664_v43 = vpop.eup %10663 }
 0xa9d   :  { %v10666_v44 = vpop.eup %10665  ;;  %v3455_v51 = vadd.f32 1.0, %v10664_v43 }
 0xa9e   :  { %v3456_v59 = vadd.f32 1.0, %v10666_v44 }
 0xa9f   :  { %10675 = vrcp.f32 %v3455_v51 }
 0xaa0   :  { %10677 = vrcp.f32 %v3456_v59 }
 0xaa1   :  { %v10668_v45 = vpop.eup %10667 }
 0xaa2   :  { %v10670_v46 = vpop.eup %10669  ;;  %v3469_v50 = vmul.f32 %v10668_v45, %v10660_v37 }
 0xaa3   :  { %v10672_v55 = vpop.eup %10671  ;;  %v3470_v58 = vmul.f32 %v10670_v46, %v10662_v41 }
 0xaa4   :  { %v10674_v60 = vpop.eup %10673  ;;  %v3467_v61 = vmul.f32 %v10672_v55, %v3463_v47 }
 0xaa5   :  { %v3468_v0 = vmul.f32 %v10674_v60, %v3464_v56 }
 0xaa6   :  { %v11753_v2 = vadd.f32 %v3469_v50, %v3467_v61 }
 0xaa7   :  { %v11755_v38 = vadd.f32 %v3470_v58, %v3468_v0 }
 0xaa8   :  { %10679 = vtanh.f32 %v11753_v2 }
 0xaa9   :  { %10681 = vtanh.f32 %v11755_v38  ;;  %v10676_v32 = vpop.eup %10675 }
 0xaaa   :  { %v10678_v7 = vpop.eup %10677 }
 0xab2   :  { %v10680_v8 = vpop.eup %10679 }
 0xab3   :  { %v10682_v33 = vpop.eup %10681  ;;  %v3475_v42 = vmul.f32 %v10680_v8, %v10676_v32 }
 0xab4   :  { %v3476_v9 = vmul.f32 %v10682_v33, %v10678_v7 }
 0xab5   :  { %3478 = vst.msk [vmem:[#allocation2] sm:$0x8] %vm3477_vm8, %v3475_v42  ;;  %v3482_v10 = vrot.slane %v3475_v42, 3 }
 0xab6   :  { %3479 = vst.msk [vmem:[#allocation2 + $0x8] sm:$0x8] %vm3477_vm8, %v3476_v9  ;;  %v3483_v16 = vrot.slane %v3476_v9, 2 }
 0xab8   :  { %v3484_v14 = vsel %vm2372_vm5, %v3483_v16, %v3482_v10 }
 0xab9   :  { %9439 = vmatmul.mubr.msk.f32.vlgmr.msra.gmra.mrb[38].mxu0 %vm71_vm0, %v3484_v14  ;;  %9450 = vmatmul.mubr.msk.f32.vlgmr.msra.gmra.mrb[38].mxu1 %vm71_vm0, %v3484_v14 }
 0xaba   :  { %10208 = vmatpush3.bf16.msra.mxu0 %v11538_v11  ;;  %10214 = vmatpush3.bf16.msra.mxu1 %v11540_v13 }
 0xabb   :  { %10209 = vmatprep.subr.bf16.mxu0 %v11120_v1  ;;  %10215 = vmatprep.subr.bf16.mxu1 %v11120_v1 }
 0xabc   :  { %9460 = vmatprep.mubr.msk.f32.mxu0 %vm11119_vm1, %v11118_v15  ;;  %9471 = vmatprep.mubr.msk.f32.mxu1 %vm11119_vm1, %v11118_v15 }
 0xabe   :  { %10211 = vmatpush3.bf16.msra.mxu0 %v11548_v18  ;;  %10217 = vmatpush3.bf16.msra.mxu1 %v11550_v21 }
 0xabf   :  { %10218 = vmatprep.subr.bf16.mxu0 %v11120_v1  ;;  %10224 = vmatprep.subr.bf16.mxu1 %v11120_v1 }
 0xac1   :  { %9461 = vmatmul.mubr.msk.f32.vlgmr.msra.gmra.mrb[40].mxu0 %vm71_vm0, %v3484_v14  ;;  %9472 = vmatmul.mubr.msk.f32.vlgmr.msra.gmra.mrb[40].mxu1 %vm71_vm0, %v3484_v14 }
 0xac2   :  { %10220 = vmatpush3.bf16.msra.mxu0 %v11516_v62  ;;  %10226 = vmatpush3.bf16.msra.mxu1 %v11518_v63 }
 0xac3   :  { %10221 = vmatprep.subr.bf16.mxu0 %v11120_v1  ;;  %10227 = vmatprep.subr.bf16.mxu1 %v11120_v1 }
 0xac4   :  { %9482 = vmatprep.mubr.msk.f32.mxu0 %vm11119_vm1, %v11118_v15  ;;  %9493 = vmatprep.mubr.msk.f32.mxu1 %vm11119_vm1, %v11118_v15 }
 0xac6   :  { %10223 = vmatpush3.bf16.msra.mxu0 %v11526_v5  ;;  %10229 = vmatpush3.bf16.msra.mxu1 %v11528_v6 }
 0xac7   :  { %10230 = vmatprep.subr.bf16.mxu0 %v11120_v1  ;;  %10236 = vmatprep.subr.bf16.mxu1 %v11120_v1 }
 0xb8c   :  { %v3553_v12 = vpop.f32.mrb[38].mxu0  ;;  %v3642_v17 = vpop.f32.mrb[38].mxu1 }
 0xb8d   :  { %v3558_v22 = vrot.slane %v3553_v12, 4  ;;  %v3559_v23 = vrot.slane %v3553_v12, 5  ;;  %v3647_v24 = vrot.slane %v3642_v17, 4  ;;  %v3648_v25 = vrot.slane %v3642_v17, 5  ;;  %v9440_v20 = vpop.f32.mrb[39].mxu0  ;;  %v9451_v49 = vpop.f32.mrb[39].mxu1 }
 0xb8e   :  { %v3836_v20 = vrot.slane %v11755_v38, 7 }
 0xb8f   :  { %v3562_v26 = vadd.f32 %v3558_v22, %v11582_v29  ;;  %v3563_v27 = vadd.f32 %v3559_v23, %v11586_v30  ;;  %v3651_v19 = vadd.f32 %v3647_v24, %v11584_v48  ;;  %v3652_v28 = vadd.f32 %v3648_v25, %v11588_v31 }
 0xb90   :  { %v3835_v22 = vrot.slane %v11753_v2, 7 }
 0xb91   :  { %v8487_v4 = vmul.f32 -1.442695, %v3562_v26  ;;  %v8488_v34 = vmul.f32 -1.442695, %v3563_v27  ;;  %v8490_v35 = vmul.f32 -1.442695, %v3651_v19 }
 0xb92   :  { %v8491_v3 = vmul.f32 -1.442695, %v3652_v28 }
 0xb93   :  { %10683 = vpow2.f32 %v8487_v4 }
 0xb94   :  { %10685 = vpow2.f32 %v8488_v34  ;;  %v3731_v36 = vpop.f32.mrb[40].mxu0  ;;  %v3810_v37 = vpop.f32.mrb[40].mxu1 }
 0xb95   :  { %10687 = vpow2.f32 %v8490_v35  ;;  %v3736_v41 = vrot.slane %v3731_v36, 4  ;;  %v3737_v43 = vrot.slane %v3731_v36, 5  ;;  %v3815_v44 = vrot.slane %v3810_v37, 4  ;;  %v9462_v45 = vpop.f32.mrb[41].mxu0  ;;  %v9473_v46 = vpop.f32.mrb[41].mxu1 }
 0xb96   :  { %10689 = vpow2.f32 %v8491_v3  ;;  %v3816_v47 = vrot.slane %v3810_v37, 5 }
 0xb97   :  { %v3819_v50 = vadd.f32 %v3815_v44, %v11600_v52  ;;  %v3740_v51 = vadd.f32 %v3736_v41, %v11604_v54  ;;  %v3741_v56 = vadd.f32 %v3737_v43, %v11602_v53 }
 0xb98   :  { %v3820_v55 = vadd.f32 %v3816_v47, %v11606_v57 }
 0xb99   :  { %v8494_v58 = vmul.f32 -1.442695, %v3819_v50  ;;  %10691 = vtanh.f32 %v3740_v51 }
 0xb9a   :  { %v8495_v59 = vmul.f32 -1.442695, %v3820_v55  ;;  %10693 = vtanh.f32 %v3741_v56 }
 0xb9b   :  { %10695 = vpow2.f32 %v8494_v58 }
 0xb9c   :  { %10697 = vpow2.f32 %v8495_v59 }
 0xb9d   :  { %v10684_v60 = vpop.eup %10683 }
 0xb9e   :  { %v10686_v61 = vpop.eup %10685  ;;  %v3570_v0 = vadd.f32 1.0, %v10684_v60 }
 0xb9f   :  { %v10688_v32 = vpop.eup %10687  ;;  %v3571_v7 = vadd.f32 1.0, %v10686_v61 }
 0xba0   :  { %v10690_v8 = vpop.eup %10689  ;;  %10699 = vrcp.f32 %v3570_v0  ;;  %v3659_v33 = vadd.f32 1.0, %v10688_v32 }
 0xba1   :  { %10701 = vrcp.f32 %v3571_v7  ;;  %v3660_v42 = vadd.f32 1.0, %v10690_v8 }
 0xba2   :  { %10703 = vrcp.f32 %v3659_v33 }
 0xba3   :  { %10705 = vrcp.f32 %v3660_v42  ;;  %v10692_v9 = vpop.eup %10691 }
 0xba4   :  { %v10694_v10 = vpop.eup %10693 }
 0xba5   :  { %v10696_v16 = vpop.eup %10695 }
 0xba6   :  { %v10698_v14 = vpop.eup %10697  ;;  %v3827_v24 = vadd.f32 1.0, %v10696_v16 }
 0xba7   :  { %v3828_v26 = vadd.f32 1.0, %v10698_v14 }
 0xba8   :  { %10707 = vrcp.f32 %v3827_v24 }
 0xba9   :  { %10709 = vrcp.f32 %v3828_v26 }
 0xbaa   :  { %v10700_v12 = vpop.eup %10699 }
 0xbab   :  { %v10702_v17 = vpop.eup %10701  ;;  %v3841_v23 = vmul.f32 %v10700_v12, %v10692_v9 }
 0xbac   :  { %v10704_v25 = vpop.eup %10703  ;;  %v3842_v49 = vmul.f32 %v10702_v17, %v10694_v10 }
 0xbad   :  { %v10706_v27 = vpop.eup %10705  ;;  %v3839_v19 = vmul.f32 %v10704_v25, %v3835_v22 }
 0xbae   :  { %v3840_v28 = vmul.f32 %v10706_v27, %v3836_v20 }
 0xbaf   :  { %v11800_v4 = vadd.f32 %v3841_v23, %v3839_v19 }
 0xbb0   :  { %v11802_v34 = vadd.f32 %v3842_v49, %v3840_v28 }
 0xbb1   :  { %10711 = vtanh.f32 %v11800_v4 }
 0xbb2   :  { %10713 = vtanh.f32 %v11802_v34  ;;  %v10708_v2 = vpop.eup %10707 }
 0xbb3   :  { %v10710_v35 = vpop.eup %10709 }
 0xbbb   :  { %v10712_v3 = vpop.eup %10711 }
 0xbbc   :  { %v10714_v38 = vpop.eup %10713  ;;  %v3847_v36 = vmul.f32 %v10712_v3, %v10708_v2 }
 0xbbd   :  { %v3848_v37 = vmul.f32 %v10714_v38, %v10710_v35 }
 0xbbe   :  { %3850 = vst.msk [vmem:[#allocation2] sm:$0x10] %vm3849_vm9, %v3847_v36  ;;  %v3854_v41 = vrot.slane %v3847_v36, 4 }
 0xbbf   :  { %3851 = vst.msk [vmem:[#allocation2 + $0x8] sm:$0x10] %vm3849_vm9, %v3848_v37  ;;  %v3855_v43 = vrot.slane %v3848_v37, 3 }
 0xbc1   :  { %v3856_v44 = vsel %vm2372_vm5, %v3855_v43, %v3854_v41 }
 0xbc2   :  { %9483 = vmatmul.mubr.msk.f32.vlgmr.msra.gmra.mrb[42].mxu0 %vm71_vm0, %v3856_v44  ;;  %9494 = vmatmul.mubr.msk.f32.vlgmr.msra.gmra.mrb[42].mxu1 %vm71_vm0, %v3856_v44 }
 0xbc3   :  { %10232 = vmatpush3.bf16.msra.mxu0 %v11538_v11  ;;  %10238 = vmatpush3.bf16.msra.mxu1 %v11540_v13 }
 0xbc4   :  { %10233 = vmatprep.subr.bf16.mxu0 %v11120_v1  ;;  %10239 = vmatprep.subr.bf16.mxu1 %v11120_v1 }
 0xbc5   :  { %9504 = vmatprep.mubr.msk.f32.mxu0 %vm11119_vm1, %v11118_v15  ;;  %9515 = vmatprep.mubr.msk.f32.mxu1 %vm11119_vm1, %v11118_v15 }
 0xbc7   :  { %10235 = vmatpush3.bf16.msra.mxu0 %v11548_v18  ;;  %10241 = vmatpush3.bf16.msra.mxu1 %v11550_v21 }
 0xbc8   :  { %10242 = vmatprep.subr.bf16.mxu0 %v11120_v1  ;;  %10248 = vmatprep.subr.bf16.mxu1 %v11120_v1 }
 0xbca   :  { %9505 = vmatmul.mubr.msk.f32.vlgmr.msra.gmra.mrb[44].mxu0 %vm71_vm0, %v3856_v44  ;;  %9516 = vmatmul.mubr.msk.f32.vlgmr.msra.gmra.mrb[44].mxu1 %vm71_vm0, %v3856_v44 }
 0xbcb   :  { %10244 = vmatpush3.bf16.msra.mxu0 %v11516_v62  ;;  %10250 = vmatpush3.bf16.msra.mxu1 %v11518_v63 }
 0xbcc   :  { %10245 = vmatprep.subr.bf16.mxu0 %v11120_v1  ;;  %10251 = vmatprep.subr.bf16.mxu1 %v11120_v1 }
 0xbcd   :  { %9526 = vmatprep.mubr.msk.f32.mxu0 %vm11119_vm1, %v11118_v15  ;;  %9537 = vmatprep.mubr.msk.f32.mxu1 %vm11119_vm1, %v11118_v15 }
 0xbcf   :  { %10247 = vmatpush3.bf16.msra.mxu0 %v11526_v5  ;;  %10253 = vmatpush3.bf16.msra.mxu1 %v11528_v6 }
 0xbd0   :  { %10254 = vmatprep.subr.bf16.mxu0 %v11120_v1  ;;  %10260 = vmatprep.subr.bf16.mxu1 %v11120_v1 }
 0xc95   :  { %v3925_v45 = vpop.f32.mrb[42].mxu0  ;;  %v4014_v46 = vpop.f32.mrb[42].mxu1 }
 0xc96   :  { %v3930_v47 = vrot.slane %v3925_v45, 3  ;;  %v3931_v50 = vrot.slane %v3925_v45, 4  ;;  %v4019_v51 = vrot.slane %v4014_v46, 3  ;;  %v4020_v55 = vrot.slane %v4014_v46, 4  ;;  %v9484_v56 = vpop.f32.mrb[43].mxu0  ;;  %v9495_v58 = vpop.f32.mrb[43].mxu1 }
 0xc97   :  { %v4208_v56 = vrot.slane %v11802_v34, 7 }
 0xc98   :  { %v3934_v59 = vadd.f32 %v3930_v47, %v11582_v29  ;;  %v3935_v60 = vadd.f32 %v3931_v50, %v11586_v30  ;;  %v4023_v61 = vadd.f32 %v4019_v51, %v11584_v48  ;;  %v4024_v0 = vadd.f32 %v4020_v55, %v11588_v31 }
 0xc99   :  { %v4207_v47 = vrot.slane %v11800_v4, 7 }
 0xc9a   :  { %v8497_v32 = vmul.f32 -1.442695, %v3934_v59  ;;  %v8498_v7 = vmul.f32 -1.442695, %v3935_v60  ;;  %v8500_v8 = vmul.f32 -1.442695, %v4023_v61 }
 0xc9b   :  { %v8501_v33 = vmul.f32 -1.442695, %v4024_v0 }
 0xc9c   :  { %10715 = vpow2.f32 %v8497_v32 }
 0xc9d   :  { %10717 = vpow2.f32 %v8498_v7  ;;  %v4103_v42 = vpop.f32.mrb[44].mxu0  ;;  %v4182_v9 = vpop.f32.mrb[44].mxu1 }
 0xc9e   :  { %10719 = vpow2.f32 %v8500_v8  ;;  %v4108_v10 = vrot.slane %v4103_v42, 3  ;;  %v4109_v16 = vrot.slane %v4103_v42, 4  ;;  %v4187_v14 = vrot.slane %v4182_v9, 3  ;;  %v9506_v12 = vpop.f32.mrb[45].mxu0  ;;  %v9517_v17 = vpop.f32.mrb[45].mxu1 }
 0xc9f   :  { %10721 = vpow2.f32 %v8501_v33  ;;  %v4188_v22 = vrot.slane %v4182_v9, 4 }
 0xca0   :  { %v4191_v23 = vadd.f32 %v4187_v14, %v11600_v52  ;;  %v4112_v24 = vadd.f32 %v4108_v10, %v11604_v54  ;;  %v4113_v20 = vadd.f32 %v4109_v16, %v11602_v53 }
 0xca1   :  { %v4192_v25 = vadd.f32 %v4188_v22, %v11606_v57 }
 0xca2   :  { %v8504_v49 = vmul.f32 -1.442695, %v4191_v23  ;;  %10723 = vtanh.f32 %v4112_v24 }
 0xca3   :  { %v8505_v26 = vmul.f32 -1.442695, %v4192_v25  ;;  %10725 = vtanh.f32 %v4113_v20 }
 0xca4   :  { %10727 = vpow2.f32 %v8504_v49 }
 0xca5   :  { %10729 = vpow2.f32 %v8505_v26 }
 0xca6   :  { %v10716_v27 = vpop.eup %10715 }
 0xca7   :  { %v10718_v19 = vpop.eup %10717  ;;  %v3942_v28 = vadd.f32 1.0, %v10716_v27 }
 0xca8   :  { %v10720_v2 = vpop.eup %10719  ;;  %v3943_v35 = vadd.f32 1.0, %v10718_v19 }
 0xca9   :  { %v10722_v3 = vpop.eup %10721  ;;  %10731 = vrcp.f32 %v3942_v28  ;;  %v4031_v38 = vadd.f32 1.0, %v10720_v2 }
 0xcaa   :  { %10733 = vrcp.f32 %v3943_v35  ;;  %v4032_v36 = vadd.f32 1.0, %v10722_v3 }
 0xcab   :  { %10735 = vrcp.f32 %v4031_v38 }
 0xcac   :  { %10737 = vrcp.f32 %v4032_v36  ;;  %v10724_v37 = vpop.eup %10723 }
 0xcad   :  { %v10726_v41 = vpop.eup %10725 }
 0xcae   :  { %v10728_v43 = vpop.eup %10727 }
 0xcaf   :  { %v10730_v44 = vpop.eup %10729  ;;  %v4199_v51 = vadd.f32 1.0, %v10728_v43 }
 0xcb0   :  { %v4200_v59 = vadd.f32 1.0, %v10730_v44 }
 0xcb1   :  { %10739 = vrcp.f32 %v4199_v51 }
 0xcb2   :  { %10741 = vrcp.f32 %v4200_v59 }
 0xcb3   :  { %v10732_v45 = vpop.eup %10731 }
 0xcb4   :  { %v10734_v46 = vpop.eup %10733  ;;  %v4213_v50 = vmul.f32 %v10732_v45, %v10724_v37 }
 0xcb5   :  { %v10736_v55 = vpop.eup %10735  ;;  %v4214_v58 = vmul.f32 %v10734_v46, %v10726_v41 }
 0xcb6   :  { %v10738_v60 = vpop.eup %10737  ;;  %v4211_v61 = vmul.f32 %v10736_v55, %v4207_v47 }
 0xcb7   :  { %v4212_v0 = vmul.f32 %v10738_v60, %v4208_v56 }
 0xcb8   :  { %v11847_v32 = vadd.f32 %v4213_v50, %v4211_v61 }
 0xcb9   :  { %v11849_v7 = vadd.f32 %v4214_v58, %v4212_v0 }
 0xcba   :  { %10743 = vtanh.f32 %v11847_v32 }
 0xcbb   :  { %10745 = vtanh.f32 %v11849_v7  ;;  %v10740_v4 = vpop.eup %10739 }
 0xcbc   :  { %v10742_v8 = vpop.eup %10741 }
 0xcc4   :  { %v10744_v33 = vpop.eup %10743 }
 0xcc5   :  { %v10746_v34 = vpop.eup %10745  ;;  %v4219_v42 = vmul.f32 %v10744_v33, %v10740_v4 }
 0xcc6   :  { %v4220_v9 = vmul.f32 %v10746_v34, %v10742_v8 }
 0xcc7   :  { %4222 = vst.msk [vmem:[#allocation2] sm:$0x20] %vm4221_vm10, %v4219_v42  ;;  %v4226_v10 = vrot.slane %v4219_v42, 5 }
 0xcc8   :  { %4223 = vst.msk [vmem:[#allocation2 + $0x8] sm:$0x20] %vm4221_vm10, %v4220_v9  ;;  %v4227_v16 = vrot.slane %v4220_v9, 4 }
 0xcca   :  { %v4228_v14 = vsel %vm2372_vm5, %v4227_v16, %v4226_v10  ;;  %v4579_v16 = vrot.slane %v11847_v32, 7 }
 0xccb   :  { %9527 = vmatmul.mubr.msk.f32.vlgmr.msra.gmra.mrb[46].mxu0 %vm71_vm0, %v4228_v14  ;;  %9538 = vmatmul.mubr.msk.f32.vlgmr.msra.gmra.mrb[46].mxu1 %vm71_vm0, %v4228_v14 }
 0xccc   :  { %10256 = vmatpush3.bf16.msra.mxu0 %v11538_v11  ;;  %10262 = vmatpush3.bf16.msra.mxu1 %v11540_v13 }
 0xccd   :  { %10257 = vmatprep.subr.bf16.mxu0 %v11120_v1  ;;  %10263 = vmatprep.subr.bf16.mxu1 %v11120_v1 }
 0xcce   :  { %9548 = vmatprep.mubr.msk.f32.mxu0 %vm11119_vm1, %v11118_v15  ;;  %9559 = vmatprep.mubr.msk.f32.mxu1 %vm11119_vm1, %v11118_v15 }
 0xcd0   :  { %10259 = vmatpush3.bf16.msra.mxu0 %v11548_v18  ;;  %10265 = vmatpush3.bf16.msra.mxu1 %v11550_v21 }
 0xcd1   :  { %10266 = vmatprep.subr.bf16.mxu0 %v11120_v1  ;;  %10272 = vmatprep.subr.bf16.mxu1 %v11120_v1 }
 0xcd3   :  { %9549 = vmatmul.mubr.msk.f32.vlgmr.msra.gmra.mrb[48].mxu0 %vm71_vm0, %v4228_v14  ;;  %9560 = vmatmul.mubr.msk.f32.vlgmr.msra.gmra.mrb[48].mxu1 %vm71_vm0, %v4228_v14 }
 0xcd4   :  { %10268 = vmatpush3.bf16.msra.mxu0 %v11516_v62  ;;  %10274 = vmatpush3.bf16.msra.mxu1 %v11518_v63 }
 0xcd5   :  { %10269 = vmatprep.subr.bf16.mxu0 %v11120_v1  ;;  %10275 = vmatprep.subr.bf16.mxu1 %v11120_v1 }
 0xcd6   :  { %9570 = vmatprep.mubr.msk.f32.mxu0 %vm11119_vm1, %v11118_v15  ;;  %9581 = vmatprep.mubr.msk.f32.mxu1 %vm11119_vm1, %v11118_v15 }
 0xcd8   :  { %10271 = vmatpush3.bf16.msra.mxu0 %v11526_v5  ;;  %10277 = vmatpush3.bf16.msra.mxu1 %v11528_v6 }
 0xcd9   :  { %10278 = vmatprep.subr.bf16.mxu0 %v11120_v1  ;;  %10284 = vmatprep.subr.bf16.mxu1 %v11120_v1 }
 0xd9e   :  { %v4297_v62 = vpop.f32.mrb[46].mxu0  ;;  %v4386_v63 = vpop.f32.mrb[46].mxu1 }
 0xd9f   :  { %v4302_v12 = vrot.slane %v4297_v62, 2  ;;  %v4303_v17 = vrot.slane %v4297_v62, 3  ;;  %v4391_v22 = vrot.slane %v4386_v63, 2  ;;  %v4392_v23 = vrot.slane %v4386_v63, 3  ;;  %v9528_v24 = vpop.f32.mrb[47].mxu0  ;;  %v9539_v25 = vpop.f32.mrb[47].mxu1 }
 0xda1   :  { %v4306_v20 = vadd.f32 %v4302_v12, %v11582_v29  ;;  %v4307_v49 = vadd.f32 %v4303_v17, %v11586_v30  ;;  %v4395_v5 = vadd.f32 %v4391_v22, %v11584_v48  ;;  %v4396_v6 = vadd.f32 %v4392_v23, %v11588_v31 }
 0xda2   :  { %v4580_v12 = vrot.slane %v11849_v7, 7 }
 0xda3   :  { %v8507_v26 = vmul.f32 -1.442695, %v4306_v20  ;;  %v8508_v27 = vmul.f32 -1.442695, %v4307_v49  ;;  %v8510_v19 = vmul.f32 -1.442695, %v4395_v5 }
 0xda4   :  { %v8511_v28 = vmul.f32 -1.442695, %v4396_v6 }
 0xda5   :  { %10747 = vpow2.f32 %v8507_v26 }
 0xda6   :  { %10749 = vpow2.f32 %v8508_v27  ;;  %v4475_v2 = vpop.f32.mrb[48].mxu0  ;;  %v4554_v35 = vpop.f32.mrb[48].mxu1 }
 0xda7   :  { %10751 = vpow2.f32 %v8510_v19  ;;  %v4480_v3 = vrot.slane %v4475_v2, 2  ;;  %v4481_v38 = vrot.slane %v4475_v2, 3  ;;  %v4559_v36 = vrot.slane %v4554_v35, 2  ;;  %v9550_v37 = vpop.f32.mrb[49].mxu0  ;;  %v9561_v41 = vpop.f32.mrb[49].mxu1 }
 0xda8   :  { %10753 = vpow2.f32 %v8511_v28  ;;  %v4560_v43 = vrot.slane %v4554_v35, 3  ;;  %v8534_v35 = vld [vmem:[%s12429_s5 + $0xa0] sm:$0xff]  ;;  %v8536_v37 = vld [vmem:[%s12429_s5 + $0xb0] sm:$0xff] }
 0xda9   :  { %v4563_v44 = vadd.f32 %v4559_v36, %v11600_v52  ;;  %v4484_v45 = vadd.f32 %v4480_v3, %v11604_v54  ;;  %v4485_v47 = vadd.f32 %v4481_v38, %v11602_v53  ;;  %v8528_v38 = vld [vmem:[%s12429_s5 + $0x90] sm:$0xff]  ;;  %v8529_v36 = vld [vmem:[%s12429_s5 + $0x98] sm:$0xff] }
 0xdaa   :  { %v4564_v46 = vadd.f32 %v4560_v43, %v11606_v57  ;;  %v10294_v41 = vpack.c.bf16 %v8529_v36, %v8528_v38  ;;  %v8537_v43 = vld [vmem:[%s12429_s5 + $0xb8] sm:$0xff] }
 0xdab   :  { %v8514_v50 = vmul.f32 -1.442695, %v4563_v44  ;;  %10755 = vtanh.f32 %v4484_v45  ;;  %v10302_v44 = vpack.c.bf16 %v8537_v43, %v8536_v37  ;;  %v8542_v45 = vld [vmem:[%s12429_s5 + $0xc0] sm:$0xff] }
 0xdac   :  { %v8515_v51 = vmul.f32 -1.442695, %v4564_v46  ;;  %10757 = vtanh.f32 %v4485_v47  ;;  %v8543_v46 = vld [vmem:[%s12429_s5 + $0xc8] sm:$0xff]  ;;  %v8550_v47 = vld [vmem:[%s12429_s5 + $0xe0] sm:$0xff] }
 0xdad   :  { %10759 = vpow2.f32 %v8514_v50  ;;  %v11950_v50 = vpack.c.bf16 %v8543_v46, %v8542_v45 }
 0xdae   :  { %10761 = vpow2.f32 %v8515_v51  ;;  %v8551_v51 = vld [vmem:[%s12429_s5 + $0xe8] sm:$0xff] }
 0xdaf   :  { %v10748_v55 = vpop.eup %10747 }
 0xdb0   :  { %v10750_v56 = vpop.eup %10749  ;;  %v4314_v58 = vadd.f32 1.0, %v10748_v55  ;;  %v11955_v55 = vpack.c.bf16 %v8551_v51, %v8550_v47 }
 0xdb1   :  { %v10752_v59 = vpop.eup %10751  ;;  %v4315_v60 = vadd.f32 1.0, %v10750_v56 }
 0xdb2   :  { %v10754_v61 = vpop.eup %10753  ;;  %10763 = vrcp.f32 %v4314_v58  ;;  %v4403_v0 = vadd.f32 1.0, %v10752_v59 }
 0xdb3   :  { %10765 = vrcp.f32 %v4315_v60  ;;  %v4404_v4 = vadd.f32 1.0, %v10754_v61 }
 0xdb4   :  { %10767 = vrcp.f32 %v4403_v0 }
 0xdb5   :  { %10769 = vrcp.f32 %v4404_v4  ;;  %v10756_v8 = vpop.eup %10755 }
 0xdb6   :  { %v10758_v33 = vpop.eup %10757 }
 0xdb7   :  { %v10760_v34 = vpop.eup %10759 }
 0xdb8   :  { %v10762_v42 = vpop.eup %10761  ;;  %v4571_v62 = vadd.f32 1.0, %v10760_v34 }
 0xdb9   :  { %v4572_v22 = vadd.f32 1.0, %v10762_v42 }
 0xdba   :  { %10771 = vrcp.f32 %v4571_v62 }
 0xdbb   :  { %10773 = vrcp.f32 %v4572_v22 }
 0xdbc   :  { %v10764_v9 = vpop.eup %10763 }
 0xdbd   :  { %v10766_v10 = vpop.eup %10765  ;;  %v4585_v14 = vmul.f32 %v10764_v9, %v10756_v8 }
 0xdbe   :  { %v10768_v63 = vpop.eup %10767  ;;  %v4586_v17 = vmul.f32 %v10766_v10, %v10758_v33 }
 0xdbf   :  { %v10770_v23 = vpop.eup %10769  ;;  %v4583_v24 = vmul.f32 %v10768_v63, %v4579_v16 }
 0xdc0   :  { %v4584_v25 = vmul.f32 %v10770_v23, %v4580_v12 }
 0xdc1   :  { %v11894_v20 = vadd.f32 %v4585_v14, %v4583_v24 }
 0xdc2   :  { %v11896_v49 = vadd.f32 %v4586_v17, %v4584_v25 }
 0xdc3   :  { %10775 = vtanh.f32 %v11894_v20 }
 0xdc4   :  { %10777 = vtanh.f32 %v11896_v49  ;;  %v10772_v32 = vpop.eup %10771  ;;  %v4952_v37 = vrot.slane %v11896_v49, 7  ;;  %v8544_v49 = vld [vmem:[%s12429_s5 + $0xd0] sm:$0xff] }
 0xdc5   :  { %v10774_v5 = vpop.eup %10773 }
 0xdcd   :  { %v10776_v6 = vpop.eup %10775 }
 0xdce   :  { %v10778_v7 = vpop.eup %10777  ;;  %v4591_v26 = vmul.f32 %v10776_v6, %v10772_v32 }
 0xdcf   :  { %v4592_v27 = vmul.f32 %v10778_v7, %v10774_v5 }
 0xdd0   :  { %4594 = vst.msk [vmem:[#allocation2] sm:$0x40] %vm4593_vm11, %v4591_v26  ;;  %v4598_v19 = vrot.slane %v4591_v26, 6 }
 0xdd1   :  { %4595 = vst.msk [vmem:[#allocation2 + $0x8] sm:$0x40] %vm4593_vm11, %v4592_v27  ;;  %v4599_v28 = vrot.slane %v4592_v27, 5 }
 0xdd3   :  { %v4600_v2 = vsel %vm2372_vm5, %v4599_v28, %v4598_v19 }
 0xdd4   :  { %9571 = vmatmul.mubr.msk.f32.vlgmr.msra.gmra.mrb[50].mxu0 %vm71_vm0, %v4600_v2  ;;  %9582 = vmatmul.mubr.msk.f32.vlgmr.msra.gmra.mrb[50].mxu1 %vm71_vm0, %v4600_v2 }
 0xdd5   :  { %10280 = vmatpush3.bf16.msra.mxu0 %v11538_v11  ;;  %10286 = vmatpush3.bf16.msra.mxu1 %v11540_v13  ;;  %v8526_v11 = vld [vmem:[%s12429_s5 + $0x80] sm:$0xff]  ;;  %v8527_v13 = vld [vmem:[%s12429_s5 + $0x88] sm:$0xff] }
 0xdd6   :  { %10281 = vmatprep.subr.bf16.mxu0 %v11120_v1  ;;  %10287 = vmatprep.subr.bf16.mxu1 %v11120_v1  ;;  %v10290_v3 = vpack.c.bf16 %v8527_v13, %v8526_v11 }
 0xdd7   :  { %9592 = vmatprep.mubr.msk.f32.mxu0 %vm11119_vm1, %v11118_v15  ;;  %9603 = vmatprep.mubr.msk.f32.mxu1 %vm11119_vm1, %v11118_v15 }
 0xdd9   :  { %10283 = vmatpush3.bf16.msra.mxu0 %v11548_v18  ;;  %10289 = vmatpush3.bf16.msra.mxu1 %v11550_v21  ;;  %v8535_v18 = vld [vmem:[%s12429_s5 + $0xa8] sm:$0xff] }
 0xdda   :  { %v10298_v21 = vpack.c.bf16 %v8535_v18, %v8534_v35  ;;  %10291 = vmatprep.subr.bf16.mxu0 %v10290_v3  ;;  %v4951_v18 = vrot.slane %v11894_v20, 7 }
 0xddc   :  { %9593 = vmatmul.mubr.msk.f32.vlgmr.msra.gmra.mrb[52].mxu0 %vm71_vm0, %v4600_v2  ;;  %9604 = vmatmul.mubr.msk.f32.vlgmr.msra.gmra.mrb[52].mxu1 %vm71_vm0, %v4600_v2 }
 0xddd   :  { %10299 = vmatprep.subr.bf16.mxu1 %v10298_v21  ;;  %10293 = vmatpush3.bf16.msra.mxu0 %v10290_v3 }
 0xdde   :  { %10301 = vmatpush3.bf16.msra.mxu1 %v10298_v21  ;;  %10295 = vmatprep.subr.bf16.mxu0 %v10294_v41 }
 0xddf   :  { %10303 = vmatprep.subr.bf16.mxu1 %v10302_v44 }
 0xde1   :  { %10297 = vmatpush3.bf16.msra.mxu0 %v10294_v41 }
 0xde2   :  { %10305 = vmatpush3.bf16.msra.mxu1 %v10302_v44  ;;  %10307 = vmatprep.subr.bf16.mxu0 %v11950_v50 }
 0xde3   :  { %10315 = vmatprep.subr.bf16.mxu1 %v11955_v55 }
 0xea7   :  { %v4669_v56 = vpop.f32.mrb[50].mxu0  ;;  %v4758_v58 = vpop.f32.mrb[50].mxu1 }
 0xea8   :  { %v4674_v59 = vrot.slane %v4669_v56, 1  ;;  %v4675_v60 = vrot.slane %v4669_v56, 2  ;;  %v4763_v61 = vrot.slane %v4758_v58, 1  ;;  %v4764_v0 = vrot.slane %v4758_v58, 2  ;;  %v9572_v4 = vpop.f32.mrb[51].mxu0  ;;  %v9583_v8 = vpop.f32.mrb[51].mxu1 }
 0xea9   :  { %v8552_v4 = vld [vmem:[%s12429_s5 + $0xf0] sm:$0xff]  ;;  %v8553_v8 = vld [vmem:[%s12429_s5 + $0xf8] sm:$0xff] }
 0xeaa   :  { %v4678_v33 = vadd.f32 %v4674_v59, %v11582_v29  ;;  %v4679_v34 = vadd.f32 %v4675_v60, %v11586_v30  ;;  %v4767_v42 = vadd.f32 %v4763_v61, %v11584_v48  ;;  %v4768_v9 = vadd.f32 %v4764_v0, %v11588_v31  ;;  %v8545_v0 = vld [vmem:[%s12429_s5 + $0xd8] sm:$0xff] }
 0xeac   :  { %v8517_v10 = vmul.f32 -1.442695, %v4678_v33  ;;  %v8518_v16 = vmul.f32 -1.442695, %v4679_v34  ;;  %v8520_v14 = vmul.f32 -1.442695, %v4767_v42  ;;  %v10310_v42 = vpack.c.bf16 %v8545_v0, %v8544_v49 }
 0xead   :  { %v8521_v62 = vmul.f32 -1.442695, %v4768_v9  ;;  %v10318_v9 = vpack.c.bf16 %v8553_v8, %v8552_v4 }
 0xeae   :  { %10779 = vpow2.f32 %v8517_v10  ;;  %v5329_v10 = vld [vmem:[#allocation4 + $0x80] sm:$0xff] }
 0xeaf   :  { %10781 = vpow2.f32 %v8518_v16  ;;  %v4847_v63 = vpop.f32.mrb[52].mxu0  ;;  %v4926_v12 = vpop.f32.mrb[52].mxu1  ;;  %v5330_v16 = vld [vmem:[#allocation4 + $0x88] sm:$0xff] }
 0xeb0   :  { %10783 = vpow2.f32 %v8520_v14  ;;  %v4852_v17 = vrot.slane %v4847_v63, 1  ;;  %v4853_v22 = vrot.slane %v4847_v63, 2  ;;  %v4931_v23 = vrot.slane %v4926_v12, 1  ;;  %v9594_v24 = vpop.f32.mrb[53].mxu0  ;;  %v9605_v29 = vpop.f32.mrb[53].mxu1  ;;  %v5334_v14 = vld [vmem:[#allocation4 + $0xa0] sm:$0xff] }
 0xeb1   :  { %10785 = vpow2.f32 %v8521_v62  ;;  %v4932_v30 = vrot.slane %v4926_v12, 2  ;;  %v5335_v62 = vld [vmem:[#allocation4 + $0xa8] sm:$0xff]  ;;  %v11991_v63 = vpack.c.bf16 %v5330_v16, %v5329_v10  ;;  %v5339_v29 = vld [vmem:[#allocation4 + $0xc0] sm:$0xff] }
 0xeb2   :  { %v4935_v48 = vadd.f32 %v4931_v23, %v11600_v52  ;;  %v4856_v31 = vadd.f32 %v4852_v17, %v11604_v54  ;;  %v4857_v32 = vadd.f32 %v4853_v22, %v11602_v53  ;;  %v11993_v12 = vpack.c.bf16 %v5335_v62, %v5334_v14  ;;  %v5331_v17 = vld [vmem:[#allocation4 + $0x90] sm:$0xff]  ;;  %v5337_v22 = vld [vmem:[#allocation4 + $0xb8] sm:$0xff] }
 0xeb3   :  { %v4936_v25 = vadd.f32 %v4932_v30, %v11606_v57  ;;  %v5340_v30 = vld [vmem:[#allocation4 + $0xc8] sm:$0xff] }
 0xeb4   :  { %v8524_v5 = vmul.f32 -1.442695, %v4935_v48  ;;  %10787 = vtanh.f32 %v4856_v31  ;;  %v5344_v48 = vld [vmem:[#allocation4 + $0xe0] sm:$0xff]  ;;  %v5345_v31 = vld [vmem:[#allocation4 + $0xe8] sm:$0xff] }
 0xeb5   :  { %v8525_v6 = vmul.f32 -1.442695, %v4936_v25  ;;  %10789 = vtanh.f32 %v4857_v32  ;;  %v12013_v25 = vpack.c.bf16 %v5340_v30, %v5339_v29  ;;  %v12015_v32 = vpack.c.bf16 %v5345_v31, %v5344_v48 }
 0xeb6   :  { %10791 = vpow2.f32 %v8524_v5  ;;  %v5341_v5 = vld [vmem:[#allocation4 + $0xd0] sm:$0xff] }
 0xeb7   :  { %10793 = vpow2.f32 %v8525_v6  ;;  %v5342_v6 = vld [vmem:[#allocation4 + $0xd8] sm:$0xff] }
 0xeb8   :  { %v10780_v7 = vpop.eup %10779 }
 0xeb9   :  { %v10782_v26 = vpop.eup %10781  ;;  %v4686_v27 = vadd.f32 1.0, %v10780_v7  ;;  %v5346_v7 = vld [vmem:[#allocation4 + $0xf0] sm:$0xff] }
 0xeba   :  { %v10784_v19 = vpop.eup %10783  ;;  %v4687_v28 = vadd.f32 1.0, %v10782_v26  ;;  %v5347_v26 = vld [vmem:[#allocation4 + $0xf8] sm:$0xff] }
 0xebb   :  { %v10786_v2 = vpop.eup %10785  ;;  %10795 = vrcp.f32 %v4686_v27  ;;  %v4775_v52 = vadd.f32 1.0, %v10784_v19  ;;  %v12023_v27 = vpack.c.bf16 %v5342_v6, %v5341_v5  ;;  %v12025_v19 = vpack.c.bf16 %v5347_v26, %v5346_v7 }
 0xebc   :  { %10797 = vrcp.f32 %v4687_v28  ;;  %v4776_v54 = vadd.f32 1.0, %v10786_v2 }
 0xebd   :  { %10799 = vrcp.f32 %v4775_v52 }
 0xebe   :  { %10801 = vrcp.f32 %v4776_v54  ;;  %v10788_v57 = vpop.eup %10787 }
 0xebf   :  { %v10790_v53 = vpop.eup %10789 }
 0xec0   :  { %v10792_v11 = vpop.eup %10791 }
 0xec1   :  { %v10794_v13 = vpop.eup %10793  ;;  %v4943_v38 = vadd.f32 1.0, %v10792_v11 }
 0xec2   :  { %v4944_v43 = vadd.f32 1.0, %v10794_v13 }
 0xec3   :  { %10803 = vrcp.f32 %v4943_v38 }
 0xec4   :  { %10805 = vrcp.f32 %v4944_v43 }
 0xec5   :  { %v10796_v35 = vpop.eup %10795 }
 0xec6   :  { %v10798_v3 = vpop.eup %10797  ;;  %v4957_v21 = vmul.f32 %v10796_v35, %v10788_v57  ;;  %v8531_v35 = vld [vmem:[%s12431_s7 + $0x4] ss:$0 sm:$0xff] }
 0xec7   :  { %v10800_v36 = vpop.eup %10799  ;;  %v4958_v41 = vmul.f32 %v10798_v3, %v10790_v53  ;;  %v8539_v3 = vld [vmem:[%s12431_s7 + $0x5] ss:$0 sm:$0xff] }
 0xec8   :  { %v10802_v44 = vpop.eup %10801  ;;  %v4955_v45 = vmul.f32 %v10800_v36, %v4951_v18 }
 0xec9   :  { %v4956_v46 = vmul.f32 %v10802_v44, %v4952_v37 }
 0xeca   :  { %v4959_v47 = vadd.f32 %v4957_v21, %v4955_v45 }
 0xecb   :  { %v4960_v51 = vadd.f32 %v4958_v41, %v4956_v46 }
 0xecc   :  { %10807 = vtanh.f32 %v4959_v47 }
 0xecd   :  { %10809 = vtanh.f32 %v4960_v51  ;;  %v10804_v56 = vpop.eup %10803 }
 0xece   :  { %v10806_v58 = vpop.eup %10805 }
 0xed6   :  { %v10808_v59 = vpop.eup %10807 }
 0xed7   :  { %v10810_v20 = vpop.eup %10809  ;;  %v4963_v60 = vmul.f32 %v10808_v59, %v10804_v56 }
 0xed8   :  { %v4964_v61 = vmul.f32 %v10810_v20, %v10806_v58 }
 0xed9   :  { %4966 = vst.msk [vmem:[#allocation2] sm:$0x80] %vm4965_vm12, %v4963_v60  ;;  %v8555_v60 = vld [vmem:[%s12431_s7 + $0x7] ss:$0 sm:$0xff] }
 0xeda   :  { %4967 = vst.msk [vmem:[#allocation2 + $0x8] sm:$0x80] %vm4965_vm12, %v4964_v61  ;;  %v8547_v61 = vld [vmem:[%s12431_s7 + $0x6] ss:$0 sm:$0xff] }
 0xee0   :  { %v4968_v33 = vld [vmem:[#allocation2] sm:$0xff] }
 0xee1   :  { %9614 = vmatprep.mubr.msk.f32.mxu0 %vm71_vm0, %v4968_v33  ;;  %9625 = vmatprep.mubr.msk.f32.mxu1 %vm71_vm0, %v4968_v33  ;;  %v4969_v34 = vld [vmem:[#allocation2 + $0x8] sm:$0xff] }
 0xee2   :  { %9615 = vmatmul.mubr.msk.f32.vlgmr.msra.gmra.mrb[54].mxu0 %vm71_vm0, %v4969_v34  ;;  %9626 = vmatmul.mubr.msk.f32.vlgmr.msra.gmra.mrb[54].mxu1 %vm71_vm0, %v4969_v34 }
 0xee3   :  { %10309 = vmatpush3.bf16.msra.mxu0 %v11950_v50  ;;  %10317 = vmatpush3.bf16.msra.mxu1 %v11955_v55  ;;  %v5332_v50 = vld [vmem:[#allocation4 + $0x98] sm:$0xff]  ;;  %v5336_v55 = vld [vmem:[#allocation4 + $0xb0] sm:$0xff] }
 0xee4   :  { %9636 = vmatprep.mubr.msk.f32.mxu0 %vm71_vm0, %v4968_v33  ;;  %9647 = vmatprep.mubr.msk.f32.mxu1 %vm71_vm0, %v4968_v33  ;;  %v12001_v23 = vpack.c.bf16 %v5332_v50, %v5331_v17  ;;  %v12003_v24 = vpack.c.bf16 %v5337_v22, %v5336_v55 }
 0xee5   :  { %10311 = vmatprep.subr.bf16.mxu0 %v10310_v42  ;;  %10319 = vmatprep.subr.bf16.mxu1 %v10318_v9 }
 0xee7   :  { %10313 = vmatpush3.bf16.msra.mxu0 %v10310_v42  ;;  %10321 = vmatpush3.bf16.msra.mxu1 %v10318_v9 }
 0xee8   :  { %10322 = vmatprep.subr.bf16.mxu0 %v11120_v1  ;;  %10328 = vmatprep.subr.bf16.mxu1 %v11120_v1 }
 0xeea   :  { %9637 = vmatmul.mubr.msk.f32.vlgmr.msra.gmra.mrb[56].mxu0 %vm71_vm0, %v4969_v34  ;;  %9648 = vmatmul.mubr.msk.f32.vlgmr.msra.gmra.mrb[56].mxu1 %vm71_vm0, %v4969_v34 }
 0xeeb   :  { %10324 = vmatpush3.bf16.msra.mxu0 %v11991_v63  ;;  %10330 = vmatpush3.bf16.msra.mxu1 %v11993_v12 }
 0xeec   :  { %10325 = vmatprep.subr.bf16.mxu0 %v11120_v1  ;;  %10331 = vmatprep.subr.bf16.mxu1 %v11120_v1 }
 0xeed   :  { %9658 = vmatprep.mubr.msk.f32.mxu0 %vm11119_vm1, %v11118_v15  ;;  %9669 = vmatprep.mubr.msk.f32.mxu1 %vm11119_vm1, %v11118_v15 }
 0xeef   :  { %10327 = vmatpush3.bf16.msra.mxu0 %v12001_v23  ;;  %10333 = vmatpush3.bf16.msra.mxu1 %v12003_v24 }
 0xef0   :  { %10334 = vmatprep.subr.bf16.mxu0 %v11120_v1  ;;  %10340 = vmatprep.subr.bf16.mxu1 %v11120_v1 }
 0xef2   :  { %9659 = vmatmul.mubr.f32.vlgmr.msra.gmra.mrb[58].mxu0 %v11118_v15  ;;  %9670 = vmatmul.mubr.f32.vlgmr.msra.gmra.mrb[58].mxu1 %v11118_v15 }
 0xef3   :  { %10336 = vmatpush3.bf16.msra.mxu0 %v12013_v25  ;;  %10342 = vmatpush3.bf16.msra.mxu1 %v12015_v32 }
 0xef4   :  { %10337 = vmatprep.subr.bf16.mxu0 %v11120_v1  ;;  %10343 = vmatprep.subr.bf16.mxu1 %v11120_v1 }
 0xef5   :  { %9680 = vmatprep.mubr.msk.f32.mxu0 %vm11119_vm1, %v11118_v15  ;;  %9691 = vmatprep.mubr.msk.f32.mxu1 %vm11119_vm1, %v11118_v15 }
 0xef7   :  { %10339 = vmatpush3.bf16.msra.mxu0 %v12023_v27  ;;  %10345 = vmatpush3.bf16.msra.mxu1 %v12025_v19 }
 0xef8   :  { %10346 = vmatprep.subr.bf16.mxu0 %v11120_v1  ;;  %10352 = vmatprep.subr.bf16.mxu1 %v11120_v1 }
 0xefa   :  { %9681 = vmatmul.mubr.f32.vlgmr.msra.gmra.mrb[60].mxu0 %v11118_v15  ;;  %9692 = vmatmul.mubr.f32.vlgmr.msra.gmra.mrb[60].mxu1 %v11118_v15 }
 0xefb   :  { %10348 = vmatpush3.bf16.msra.mxu0 %v11991_v63  ;;  %10354 = vmatpush3.bf16.msra.mxu1 %v11993_v12 }
 0xefc   :  { %10349 = vmatprep.subr.bf16.mxu0 %v11120_v1  ;;  %10355 = vmatprep.subr.bf16.mxu1 %v11120_v1 }
 0xefd   :  { %9702 = vmatprep.mubr.msk.f32.mxu0 %vm11119_vm1, %v11118_v15  ;;  %9713 = vmatprep.mubr.msk.f32.mxu1 %vm11119_vm1, %v11118_v15 }
 0xeff   :  { %10351 = vmatpush3.bf16.msra.mxu0 %v12001_v23  ;;  %10357 = vmatpush3.bf16.msra.mxu1 %v12003_v24 }
 0xf00   :  { %10358 = vmatprep.subr.bf16.mxu0 %v11120_v1  ;;  %10364 = vmatprep.subr.bf16.mxu1 %v11120_v1 }
 0xfb5   :  { %v9616_v28 = vpop.f32.mrb[54].mxu0  ;;  %v9627_v2 = vpop.f32.mrb[54].mxu1 }
 0xfb6   :  { %v5055_v52 = vpop.f32.mrb[55].mxu0  ;;  %v5143_v54 = vpop.f32.mrb[55].mxu1  ;;  %v12061_v38 = vadd.f32 %v9616_v28, %v8531_v35  ;;  %v12063_v36 = vadd.f32 %v9627_v2, %v8539_v3 }
 0xfb7   :  { %v12057_v18 = vadd.f32 %v8531_v35, %v5055_v52  ;;  %v12059_v21 = vadd.f32 %v8539_v3, %v5143_v54 }
 0xfbd   :  { %v9638_v57 = vpop.f32.mrb[56].mxu0  ;;  %v9649_v53 = vpop.f32.mrb[56].mxu1 }
 0xfbe   :  { %v5231_v11 = vpop.f32.mrb[57].mxu0  ;;  %v5319_v13 = vpop.f32.mrb[57].mxu1  ;;  %v12077_v8 = vadd.f32 %v9638_v57, %v8547_v61  ;;  %v12081_v9 = vadd.f32 %v9649_v53, %v8555_v60 }
 0xfbf   :  { %v12075_v4 = vadd.f32 %v8555_v60, %v5319_v13  ;;  %v12079_v33 = vadd.f32 %v8547_v61, %v5231_v11 }
 0xfc5   :  { %v5414_v37 = vpop.f32.mrb[58].mxu0  ;;  %v5502_v41 = vpop.f32.mrb[58].mxu1 }
 0xfc6   :  { %v5419_v43 = vrot.slane %v5414_v37, 1  ;;  %v5422_v44 = vadd.f32 %v5414_v37, %v12057_v18  ;;  %v5507_v45 = vrot.slane %v5502_v41, 1  ;;  %v5510_v46 = vadd.f32 %v5502_v41, %v12059_v21  ;;  %v9660_v47 = vpop.f32.mrb[59].mxu0  ;;  %v9671_v51 = vpop.f32.mrb[59].mxu1 }
 0xfc8   :  { %v5423_v56 = vadd.f32 %v5419_v43, %v12061_v38  ;;  %v8558_v58 = vmul.f32 -1.442695, %v5422_v44  ;;  %v5511_v59 = vadd.f32 %v5507_v45, %v12063_v36  ;;  %v8560_v20 = vmul.f32 -1.442695, %v5510_v46 }
 0xfca   :  { %10811 = vpow2.f32 %v8558_v58  ;;  %v8559_v49 = vmul.f32 -1.442695, %v5423_v56  ;;  %v8561_v0 = vmul.f32 -1.442695, %v5511_v59 }
 0xfcb   :  { %10813 = vpow2.f32 %v8560_v20 }
 0xfcc   :  { %10815 = vpow2.f32 %v8559_v49 }
 0xfcd   :  { %10817 = vpow2.f32 %v8561_v0  ;;  %v5590_v34 = vpop.f32.mrb[60].mxu0  ;;  %v5668_v42 = vpop.f32.mrb[60].mxu1 }
 0xfce   :  { %v5595_v10 = vrot.slane %v5590_v34, 1  ;;  %v5673_v16 = vrot.slane %v5668_v42, 1  ;;  %v5676_v14 = vadd.f32 %v5668_v42, %v12075_v4  ;;  %v9682_v62 = vpop.f32.mrb[61].mxu0  ;;  %v9693_v17 = vpop.f32.mrb[61].mxu1  ;;  %v5598_v50 = vadd.f32 %v5590_v34, %v12079_v33 }
 0xfd0   :  { %v5599_v55 = vadd.f32 %v5595_v10, %v12077_v8  ;;  %v5677_v22 = vadd.f32 %v5673_v16, %v12081_v9  ;;  %v8562_v29 = vmul.f32 -1.442695, %v5676_v14  ;;  %10819 = vtanh.f32 %v5598_v50 }
 0xfd2   :  { %v8563_v30 = vmul.f32 -1.442695, %v5677_v22  ;;  %10821 = vtanh.f32 %v5599_v55 }
 0xfd3   :  { %10823 = vpow2.f32 %v8562_v29 }
 0xfd4   :  { %v10812_v48 = vpop.eup %10811  ;;  %10825 = vpow2.f32 %v8563_v30 }
 0xfd5   :  { %v10814_v31 = vpop.eup %10813  ;;  %v5430_v5 = vadd.f32 1.0, %v10812_v48 }
 0xfd6   :  { %v10816_v6 = vpop.eup %10815  ;;  %v5518_v7 = vadd.f32 1.0, %v10814_v31 }
 0xfd7   :  { %v10818_v26 = vpop.eup %10817  ;;  %v5431_v28 = vadd.f32 1.0, %v10816_v6  ;;  %10827 = vrcp.f32 %v5430_v5 }
 0xfd8   :  { %v5519_v2 = vadd.f32 1.0, %v10818_v26  ;;  %10829 = vrcp.f32 %v5518_v7 }
 0xfd9   :  { %10831 = vrcp.f32 %v5431_v28 }
 0xfda   :  { %10833 = vrcp.f32 %v5519_v2  ;;  %v10820_v52 = vpop.eup %10819 }
 0xfdc   :  { %v10822_v54 = vpop.eup %10821 }
 0xfdd   :  { %v10824_v57 = vpop.eup %10823 }
 0xfde   :  { %v10826_v53 = vpop.eup %10825  ;;  %v5684_v3 = vadd.f32 1.0, %v10824_v57 }
 0xfdf   :  { %v5685_v45 = vadd.f32 1.0, %v10826_v53 }
 0xfe0   :  { %10835 = vrcp.f32 %v5684_v3 }
 0xfe1   :  { %v10828_v11 = vpop.eup %10827 }
 0xfe2   :  { %v10830_v13 = vpop.eup %10829  ;;  %v5692_v35 = vmul.f32 %v10828_v11, %v10820_v52 }
 0xfe3   :  { %v10832_v37 = vpop.eup %10831  ;;  %v5690_v41 = vmul.f32 0.0, %v10830_v13 }
 0xfe4   :  { %v10834_v43 = vpop.eup %10833  ;;  %v5693_v44 = vmul.f32 %v10832_v37, %v10822_v54 }
 0xfe5   :  { %v5691_v46 = vmul.f32 0.0, %v10834_v43  ;;  %v12087_v47 = vadd.f32 %v5692_v35, %v5690_v41 }
 0xfe7   :  { %v12089_v51 = vadd.f32 %v5693_v44, %v5691_v46  ;;  %10837 = vtanh.f32 %v12087_v47 }
 0xfe8   :  { %10839 = vrcp.f32 %v5685_v45 }
 0xfe9   :  { %10841 = vtanh.f32 %v12089_v51 }
 0xfea   :  { %v10836_v56 = vpop.eup %10835 }
 0xff1   :  { %v10838_v58 = vpop.eup %10837 }
 0xff2   :  { %v10840_v59 = vpop.eup %10839  ;;  %v5698_v20 = vmul.f32 %v10838_v58, %v10836_v56 }
 0xff3   :  { %v10842_v60 = vpop.eup %10841 }
 0xff4   :  { %v5699_v61 = vmul.f32 %v10842_v60, %v10840_v59  ;;  %5700 = vst.msk [vmem:[#allocation2] sm:$0x1] %vm2366_vm4, %v5698_v20 }
 0xff6   :  { %5701 = vst.msk [vmem:[#allocation2 + $0x8] sm:$0x1] %vm2366_vm4, %v5699_v61  ;;  %v5704_v49 = vrot.slane %v5699_v61, 7  ;;  %v6053_v61 = vrot.slane %v12089_v51, 7 }
 0xff8   :  { %v5705_v0 = vsel %vm2372_vm5, %v5704_v49, %v5698_v20 }
 0xff9   :  { %9703 = vmatmul.mubr.msk.f32.vlgmr.msra.gmra.mrb[62].mxu0 %vm71_vm0, %v5705_v0  ;;  %9714 = vmatmul.mubr.msk.f32.vlgmr.msra.gmra.mrb[62].mxu1 %vm71_vm0, %v5705_v0 }
 0xffa   :  { %10360 = vmatpush3.bf16.msra.mxu0 %v12013_v25  ;;  %10366 = vmatpush3.bf16.msra.mxu1 %v12015_v32 }
 0xffb   :  { %10361 = vmatprep.subr.bf16.mxu0 %v11120_v1  ;;  %10367 = vmatprep.subr.bf16.mxu1 %v11120_v1 }
 0xffc   :  { %9724 = vmatprep.mubr.msk.f32.mxu0 %vm11119_vm1, %v11118_v15  ;;  %9735 = vmatprep.mubr.msk.f32.mxu1 %vm11119_vm1, %v11118_v15 }
 0xffe   :  { %10363 = vmatpush3.bf16.msra.mxu0 %v12023_v27  ;;  %10369 = vmatpush3.bf16.msra.mxu1 %v12025_v19 }
 0xfff   :  { %10370 = vmatprep.subr.bf16.mxu0 %v11120_v1  ;;  %10376 = vmatprep.subr.bf16.mxu1 %v11120_v1 }
0x1001   :  { %9725 = vmatmul.mubr.msk.f32.vlgmr.msra.gmra.mrb[64].mxu0 %vm71_vm0, %v5705_v0  ;;  %9736 = vmatmul.mubr.msk.f32.vlgmr.msra.gmra.mrb[64].mxu1 %vm71_vm0, %v5705_v0 }
0x1002   :  { %10372 = vmatpush3.bf16.msra.mxu0 %v11991_v63  ;;  %10378 = vmatpush3.bf16.msra.mxu1 %v11993_v12 }
0x1003   :  { %10373 = vmatprep.subr.bf16.mxu0 %v11120_v1  ;;  %10379 = vmatprep.subr.bf16.mxu1 %v11120_v1 }
0x1004   :  { %9746 = vmatprep.mubr.msk.f32.mxu0 %vm11119_vm1, %v11118_v15  ;;  %9757 = vmatprep.mubr.msk.f32.mxu1 %vm11119_vm1, %v11118_v15 }
0x1006   :  { %10375 = vmatpush3.bf16.msra.mxu0 %v12001_v23  ;;  %10381 = vmatpush3.bf16.msra.mxu1 %v12003_v24 }
0x1007   :  { %10382 = vmatprep.subr.bf16.mxu0 %v11120_v1  ;;  %10388 = vmatprep.subr.bf16.mxu1 %v11120_v1 }
0x10cc   :  { %v5774_v34 = vpop.f32.mrb[62].mxu0  ;;  %v5862_v42 = vpop.f32.mrb[62].mxu1 }
0x10cd   :  { %v5779_v10 = vrot.slane %v5774_v34, 7  ;;  %v5783_v16 = vadd.f32 %v5774_v34, %v12061_v38  ;;  %v5867_v14 = vrot.slane %v5862_v42, 7  ;;  %v5871_v62 = vadd.f32 %v5862_v42, %v12063_v36  ;;  %v9704_v17 = vpop.f32.mrb[63].mxu0  ;;  %v9715_v50 = vpop.f32.mrb[63].mxu1 }
0x10cf   :  { %v5782_v55 = vadd.f32 %v5779_v10, %v12057_v18  ;;  %v8566_v22 = vmul.f32 -1.442695, %v5783_v16  ;;  %v5870_v29 = vadd.f32 %v5867_v14, %v12059_v21  ;;  %v8569_v30 = vmul.f32 -1.442695, %v5871_v62 }
0x10d0   :  { %v6052_v10 = vrot.slane %v12087_v47, 7 }
0x10d1   :  { %v8565_v48 = vmul.f32 -1.442695, %v5782_v55  ;;  %10843 = vpow2.f32 %v8566_v22  ;;  %v8568_v31 = vmul.f32 -1.442695, %v5870_v29 }
0x10d2   :  { %10845 = vpow2.f32 %v8569_v30 }
0x10d3   :  { %10847 = vpow2.f32 %v8565_v48 }
0x10d4   :  { %10849 = vpow2.f32 %v8568_v31  ;;  %v5950_v5 = vpop.f32.mrb[64].mxu0  ;;  %v6028_v6 = vpop.f32.mrb[64].mxu1 }
0x10d5   :  { %v5955_v7 = vrot.slane %v5950_v5, 7  ;;  %v6033_v26 = vrot.slane %v6028_v6, 7  ;;  %v6037_v28 = vadd.f32 %v6028_v6, %v12081_v9  ;;  %v9726_v2 = vpop.f32.mrb[65].mxu0  ;;  %v9737_v52 = vpop.f32.mrb[65].mxu1  ;;  %v5959_v54 = vadd.f32 %v5950_v5, %v12077_v8 }
0x10d7   :  { %v5958_v57 = vadd.f32 %v5955_v7, %v12079_v33  ;;  %v6036_v53 = vadd.f32 %v6033_v26, %v12075_v4  ;;  %v8573_v11 = vmul.f32 -1.442695, %v6037_v28  ;;  %10851 = vtanh.f32 %v5959_v54 }
0x10d9   :  { %v8572_v13 = vmul.f32 -1.442695, %v6036_v53  ;;  %10853 = vtanh.f32 %v5958_v57 }
0x10da   :  { %10855 = vpow2.f32 %v8573_v11 }
0x10db   :  { %v10844_v35 = vpop.eup %10843  ;;  %10857 = vpow2.f32 %v8572_v13 }
0x10dc   :  { %v10846_v3 = vpop.eup %10845  ;;  %v5791_v37 = vadd.f32 1.0, %v10844_v35 }
0x10dd   :  { %v10848_v41 = vpop.eup %10847  ;;  %v5879_v43 = vadd.f32 1.0, %v10846_v3 }
0x10de   :  { %v10850_v44 = vpop.eup %10849  ;;  %v5790_v45 = vadd.f32 1.0, %v10848_v41  ;;  %10859 = vrcp.f32 %v5791_v37 }
0x10df   :  { %v5878_v46 = vadd.f32 1.0, %v10850_v44  ;;  %10861 = vrcp.f32 %v5879_v43 }
0x10e0   :  { %10863 = vrcp.f32 %v5790_v45 }
0x10e1   :  { %10865 = vrcp.f32 %v5878_v46  ;;  %v10852_v56 = vpop.eup %10851 }
0x10e3   :  { %v10854_v58 = vpop.eup %10853 }
0x10e4   :  { %v10856_v59 = vpop.eup %10855 }
0x10e5   :  { %v10858_v20 = vpop.eup %10857  ;;  %v6045_v34 = vadd.f32 1.0, %v10856_v59 }
0x10e6   :  { %v6044_v17 = vadd.f32 1.0, %v10858_v20 }
0x10e7   :  { %10867 = vrcp.f32 %v6045_v34 }
0x10e8   :  { %v10860_v60 = vpop.eup %10859 }
0x10e9   :  { %v10862_v49 = vpop.eup %10861  ;;  %v6059_v0 = vmul.f32 %v10860_v60, %v10852_v56 }
0x10ea   :  { %v10864_v42 = vpop.eup %10863  ;;  %v6057_v16 = vmul.f32 %v10862_v49, %v6053_v61 }
0x10eb   :  { %v10866_v14 = vpop.eup %10865  ;;  %v6058_v62 = vmul.f32 %v10864_v42, %v10854_v58 }
0x10ec   :  { %v6056_v50 = vmul.f32 %v10866_v14, %v6052_v10  ;;  %v12134_v55 = vadd.f32 %v6059_v0, %v6057_v16 }
0x10ee   :  { %v12136_v22 = vadd.f32 %v6058_v62, %v6056_v50  ;;  %10869 = vtanh.f32 %v12134_v55 }
0x10ef   :  { %10871 = vrcp.f32 %v6044_v17 }
0x10f0   :  { %10873 = vtanh.f32 %v12136_v22 }
0x10f1   :  { %v10868_v51 = vpop.eup %10867 }
0x10f8   :  { %v10870_v29 = vpop.eup %10869 }
0x10f9   :  { %v10872_v30 = vpop.eup %10871  ;;  %v6065_v48 = vmul.f32 %v10870_v29, %v10868_v51 }
0x10fa   :  { %v10874_v47 = vpop.eup %10873 }
0x10fb   :  { %v6064_v31 = vmul.f32 %v10874_v47, %v10872_v30  ;;  %6067 = vst.msk [vmem:[#allocation2 + $0x8] sm:$0x2] %vm2734_vm6, %v6065_v48 }
0x10fd   :  { %6066 = vst.msk [vmem:[#allocation2] sm:$0x2] %vm2734_vm6, %v6064_v31  ;;  %v6070_v5 = vrot.slane %v6064_v31, 1 }
0x10ff   :  { %v6071_v6 = vsel %vm2372_vm5, %v6065_v48, %v6070_v5 }
0x1100   :  { %9747 = vmatmul.mubr.msk.f32.vlgmr.msra.gmra.mrb[66].mxu0 %vm71_vm0, %v6071_v6  ;;  %9758 = vmatmul.mubr.msk.f32.vlgmr.msra.gmra.mrb[66].mxu1 %vm71_vm0, %v6071_v6 }
0x1101   :  { %10384 = vmatpush3.bf16.msra.mxu0 %v12013_v25  ;;  %10390 = vmatpush3.bf16.msra.mxu1 %v12015_v32 }
0x1102   :  { %10385 = vmatprep.subr.bf16.mxu0 %v11120_v1  ;;  %10391 = vmatprep.subr.bf16.mxu1 %v11120_v1 }
0x1103   :  { %9768 = vmatprep.mubr.msk.f32.mxu0 %vm11119_vm1, %v11118_v15  ;;  %9779 = vmatprep.mubr.msk.f32.mxu1 %vm11119_vm1, %v11118_v15 }
0x1105   :  { %10387 = vmatpush3.bf16.msra.mxu0 %v12023_v27  ;;  %10393 = vmatpush3.bf16.msra.mxu1 %v12025_v19 }
0x1106   :  { %10394 = vmatprep.subr.bf16.mxu0 %v11120_v1  ;;  %10400 = vmatprep.subr.bf16.mxu1 %v11120_v1 }
0x1108   :  { %9769 = vmatmul.mubr.msk.f32.vlgmr.msra.gmra.mrb[68].mxu0 %vm71_vm0, %v6071_v6  ;;  %9780 = vmatmul.mubr.msk.f32.vlgmr.msra.gmra.mrb[68].mxu1 %vm71_vm0, %v6071_v6 }
0x1109   :  { %10396 = vmatpush3.bf16.msra.mxu0 %v11991_v63  ;;  %10402 = vmatpush3.bf16.msra.mxu1 %v11993_v12 }
0x110a   :  { %10397 = vmatprep.subr.bf16.mxu0 %v11120_v1  ;;  %10403 = vmatprep.subr.bf16.mxu1 %v11120_v1 }
0x110b   :  { %9790 = vmatprep.mubr.msk.f32.mxu0 %vm11119_vm1, %v11118_v15  ;;  %9801 = vmatprep.mubr.msk.f32.mxu1 %vm11119_vm1, %v11118_v15 }
0x110d   :  { %10399 = vmatpush3.bf16.msra.mxu0 %v12001_v23  ;;  %10405 = vmatpush3.bf16.msra.mxu1 %v12003_v24 }
0x110e   :  { %10406 = vmatprep.subr.bf16.mxu0 %v11120_v1  ;;  %10412 = vmatprep.subr.bf16.mxu1 %v11120_v1 }
0x11d3   :  { %v6140_v7 = vpop.f32.mrb[66].mxu0  ;;  %v6229_v26 = vpop.f32.mrb[66].mxu1 }
0x11d4   :  { %v6145_v28 = vrot.slane %v6140_v7, 6  ;;  %v6146_v2 = vrot.slane %v6140_v7, 7  ;;  %v6234_v52 = vrot.slane %v6229_v26, 6  ;;  %v6235_v54 = vrot.slane %v6229_v26, 7  ;;  %v9748_v57 = vpop.f32.mrb[67].mxu0  ;;  %v9759_v53 = vpop.f32.mrb[67].mxu1 }
0x11d5   :  { %v6423_v57 = vrot.slane %v12134_v55, 7 }
0x11d6   :  { %v6149_v11 = vadd.f32 %v6145_v28, %v12057_v18  ;;  %v6150_v13 = vadd.f32 %v6146_v2, %v12061_v38  ;;  %v6238_v35 = vadd.f32 %v6234_v52, %v12059_v21  ;;  %v6239_v3 = vadd.f32 %v6235_v54, %v12063_v36 }
0x11d7   :  { %v6422_v28 = vrot.slane %v12136_v22, 7 }
0x11d8   :  { %v8575_v37 = vmul.f32 -1.442695, %v6149_v11  ;;  %v8576_v41 = vmul.f32 -1.442695, %v6150_v13  ;;  %v8578_v43 = vmul.f32 -1.442695, %v6238_v35 }
0x11d9   :  { %v8579_v44 = vmul.f32 -1.442695, %v6239_v3 }
0x11da   :  { %10875 = vpow2.f32 %v8575_v37 }
0x11db   :  { %10877 = vpow2.f32 %v8576_v41  ;;  %v6318_v45 = vpop.f32.mrb[68].mxu0  ;;  %v6397_v46 = vpop.f32.mrb[68].mxu1 }
0x11dc   :  { %10879 = vpow2.f32 %v8578_v43  ;;  %v6323_v56 = vrot.slane %v6318_v45, 6  ;;  %v6324_v58 = vrot.slane %v6318_v45, 7  ;;  %v6402_v59 = vrot.slane %v6397_v46, 6  ;;  %v9770_v20 = vpop.f32.mrb[69].mxu0  ;;  %v9781_v60 = vpop.f32.mrb[69].mxu1 }
0x11dd   :  { %10881 = vpow2.f32 %v8579_v44  ;;  %v6403_v61 = vrot.slane %v6397_v46, 7 }
0x11de   :  { %v6406_v49 = vadd.f32 %v6402_v59, %v12075_v4  ;;  %v6327_v0 = vadd.f32 %v6323_v56, %v12079_v33  ;;  %v6328_v42 = vadd.f32 %v6324_v58, %v12077_v8 }
0x11df   :  { %v6407_v34 = vadd.f32 %v6403_v61, %v12081_v9 }
0x11e0   :  { %v8582_v10 = vmul.f32 -1.442695, %v6406_v49  ;;  %10883 = vtanh.f32 %v6327_v0 }
0x11e1   :  { %v8583_v16 = vmul.f32 -1.442695, %v6407_v34  ;;  %10885 = vtanh.f32 %v6328_v42 }
0x11e2   :  { %10887 = vpow2.f32 %v8582_v10 }
0x11e3   :  { %10889 = vpow2.f32 %v8583_v16 }
0x11e4   :  { %v10876_v14 = vpop.eup %10875 }
0x11e5   :  { %v10878_v62 = vpop.eup %10877  ;;  %v6157_v17 = vadd.f32 1.0, %v10876_v14 }
0x11e6   :  { %v10880_v50 = vpop.eup %10879  ;;  %v6158_v51 = vadd.f32 1.0, %v10878_v62 }
0x11e7   :  { %v10882_v29 = vpop.eup %10881  ;;  %10891 = vrcp.f32 %v6157_v17  ;;  %v6246_v30 = vadd.f32 1.0, %v10880_v50 }
0x11e8   :  { %10893 = vrcp.f32 %v6158_v51  ;;  %v6247_v48 = vadd.f32 1.0, %v10882_v29 }
0x11e9   :  { %10895 = vrcp.f32 %v6246_v30 }
0x11ea   :  { %10897 = vrcp.f32 %v6247_v48  ;;  %v10884_v47 = vpop.eup %10883 }
0x11eb   :  { %v10886_v31 = vpop.eup %10885 }
0x11ec   :  { %v10888_v5 = vpop.eup %10887 }
0x11ed   :  { %v10890_v6 = vpop.eup %10889  ;;  %v6414_v52 = vadd.f32 1.0, %v10888_v5 }
0x11ee   :  { %v6415_v11 = vadd.f32 1.0, %v10890_v6 }
0x11ef   :  { %10899 = vrcp.f32 %v6414_v52 }
0x11f0   :  { %10901 = vrcp.f32 %v6415_v11 }
0x11f1   :  { %v10892_v7 = vpop.eup %10891 }
0x11f2   :  { %v10894_v26 = vpop.eup %10893  ;;  %v6428_v2 = vmul.f32 %v10892_v7, %v10884_v47 }
0x11f3   :  { %v10896_v54 = vpop.eup %10895  ;;  %v6429_v53 = vmul.f32 %v10894_v26, %v10886_v31 }
0x11f4   :  { %v10898_v13 = vpop.eup %10897  ;;  %v6426_v35 = vmul.f32 %v10896_v54, %v6422_v28 }
0x11f5   :  { %v6427_v3 = vmul.f32 %v10898_v13, %v6423_v57 }
0x11f6   :  { %v12181_v37 = vadd.f32 %v6428_v2, %v6426_v35 }
0x11f7   :  { %v12183_v41 = vadd.f32 %v6429_v53, %v6427_v3 }
0x11f8   :  { %10903 = vtanh.f32 %v12181_v37 }
0x11f9   :  { %10905 = vtanh.f32 %v12183_v41  ;;  %v10900_v22 = vpop.eup %10899 }
0x11fa   :  { %v10902_v43 = vpop.eup %10901 }
0x1202   :  { %v10904_v44 = vpop.eup %10903 }
0x1203   :  { %v10906_v45 = vpop.eup %10905  ;;  %v6434_v55 = vmul.f32 %v10904_v44, %v10900_v22 }
0x1204   :  { %v6435_v46 = vmul.f32 %v10906_v45, %v10902_v43 }
0x1205   :  { %6436 = vst.msk [vmem:[#allocation2] sm:$0x4] %vm3105_vm7, %v6434_v55  ;;  %v6440_v56 = vrot.slane %v6434_v55, 2 }
0x1206   :  { %6437 = vst.msk [vmem:[#allocation2 + $0x8] sm:$0x4] %vm3105_vm7, %v6435_v46  ;;  %v6441_v58 = vrot.slane %v6435_v46, 1 }
0x1208   :  { %v6442_v59 = vsel %vm2372_vm5, %v6441_v58, %v6440_v56 }
0x1209   :  { %9791 = vmatmul.mubr.msk.f32.vlgmr.msra.gmra.mrb[70].mxu0 %vm71_vm0, %v6442_v59  ;;  %9802 = vmatmul.mubr.msk.f32.vlgmr.msra.gmra.mrb[70].mxu1 %vm71_vm0, %v6442_v59 }
0x120a   :  { %10408 = vmatpush3.bf16.msra.mxu0 %v12013_v25  ;;  %10414 = vmatpush3.bf16.msra.mxu1 %v12015_v32 }
0x120b   :  { %10409 = vmatprep.subr.bf16.mxu0 %v11120_v1  ;;  %10415 = vmatprep.subr.bf16.mxu1 %v11120_v1 }
0x120c   :  { %9812 = vmatprep.mubr.msk.f32.mxu0 %vm11119_vm1, %v11118_v15  ;;  %9823 = vmatprep.mubr.msk.f32.mxu1 %vm11119_vm1, %v11118_v15 }
0x120e   :  { %10411 = vmatpush3.bf16.msra.mxu0 %v12023_v27  ;;  %10417 = vmatpush3.bf16.msra.mxu1 %v12025_v19 }
0x120f   :  { %10418 = vmatprep.subr.bf16.mxu0 %v11120_v1  ;;  %10424 = vmatprep.subr.bf16.mxu1 %v11120_v1 }
0x1211   :  { %9813 = vmatmul.mubr.msk.f32.vlgmr.msra.gmra.mrb[72].mxu0 %vm71_vm0, %v6442_v59  ;;  %9824 = vmatmul.mubr.msk.f32.vlgmr.msra.gmra.mrb[72].mxu1 %vm71_vm0, %v6442_v59 }
0x1212   :  { %10420 = vmatpush3.bf16.msra.mxu0 %v11991_v63  ;;  %10426 = vmatpush3.bf16.msra.mxu1 %v11993_v12 }
0x1213   :  { %10421 = vmatprep.subr.bf16.mxu0 %v11120_v1  ;;  %10427 = vmatprep.subr.bf16.mxu1 %v11120_v1 }
0x1214   :  { %9834 = vmatprep.mubr.msk.f32.mxu0 %vm11119_vm1, %v11118_v15  ;;  %9845 = vmatprep.mubr.msk.f32.mxu1 %vm11119_vm1, %v11118_v15 }
0x1216   :  { %10423 = vmatpush3.bf16.msra.mxu0 %v12001_v23  ;;  %10429 = vmatpush3.bf16.msra.mxu1 %v12003_v24 }
0x1217   :  { %10430 = vmatprep.subr.bf16.mxu0 %v11120_v1  ;;  %10436 = vmatprep.subr.bf16.mxu1 %v11120_v1 }
0x12dc   :  { %v6511_v20 = vpop.f32.mrb[70].mxu0  ;;  %v6600_v60 = vpop.f32.mrb[70].mxu1 }
0x12dd   :  { %v6516_v61 = vrot.slane %v6511_v20, 5  ;;  %v6517_v49 = vrot.slane %v6511_v20, 6  ;;  %v6605_v0 = vrot.slane %v6600_v60, 5  ;;  %v6606_v34 = vrot.slane %v6600_v60, 6  ;;  %v9792_v42 = vpop.f32.mrb[71].mxu0  ;;  %v9803_v10 = vpop.f32.mrb[71].mxu1 }
0x12de   :  { %v6794_v42 = vrot.slane %v12183_v41, 7 }
0x12df   :  { %v6520_v16 = vadd.f32 %v6516_v61, %v12057_v18  ;;  %v6521_v14 = vadd.f32 %v6517_v49, %v12061_v38  ;;  %v6609_v62 = vadd.f32 %v6605_v0, %v12059_v21  ;;  %v6610_v17 = vadd.f32 %v6606_v34, %v12063_v36 }
0x12e0   :  { %v6793_v61 = vrot.slane %v12181_v37, 7 }
0x12e1   :  { %v8585_v50 = vmul.f32 -1.442695, %v6520_v16  ;;  %v8586_v51 = vmul.f32 -1.442695, %v6521_v14  ;;  %v8588_v29 = vmul.f32 -1.442695, %v6609_v62 }
0x12e2   :  { %v8589_v30 = vmul.f32 -1.442695, %v6610_v17 }
0x12e3   :  { %10907 = vpow2.f32 %v8585_v50 }
0x12e4   :  { %10909 = vpow2.f32 %v8586_v51  ;;  %v6689_v48 = vpop.f32.mrb[72].mxu0  ;;  %v6768_v47 = vpop.f32.mrb[72].mxu1 }
0x12e5   :  { %10911 = vpow2.f32 %v8588_v29  ;;  %v6694_v31 = vrot.slane %v6689_v48, 5  ;;  %v6695_v5 = vrot.slane %v6689_v48, 6  ;;  %v6773_v6 = vrot.slane %v6768_v47, 5  ;;  %v9814_v7 = vpop.f32.mrb[73].mxu0  ;;  %v9825_v26 = vpop.f32.mrb[73].mxu1 }
0x12e6   :  { %10913 = vpow2.f32 %v8589_v30  ;;  %v6774_v28 = vrot.slane %v6768_v47, 6 }
0x12e7   :  { %v6777_v2 = vadd.f32 %v6773_v6, %v12075_v4  ;;  %v6698_v52 = vadd.f32 %v6694_v31, %v12079_v33  ;;  %v6699_v57 = vadd.f32 %v6695_v5, %v12077_v8 }
0x12e8   :  { %v6778_v54 = vadd.f32 %v6774_v28, %v12081_v9 }
0x12e9   :  { %v8592_v53 = vmul.f32 -1.442695, %v6777_v2  ;;  %10915 = vtanh.f32 %v6698_v52 }
0x12ea   :  { %v8593_v11 = vmul.f32 -1.442695, %v6778_v54  ;;  %10917 = vtanh.f32 %v6699_v57 }
0x12eb   :  { %10919 = vpow2.f32 %v8592_v53 }
0x12ec   :  { %10921 = vpow2.f32 %v8593_v11 }
0x12ed   :  { %v10908_v13 = vpop.eup %10907 }
0x12ee   :  { %v10910_v35 = vpop.eup %10909  ;;  %v6528_v3 = vadd.f32 1.0, %v10908_v13 }
0x12ef   :  { %v10912_v22 = vpop.eup %10911  ;;  %v6529_v43 = vadd.f32 1.0, %v10910_v35 }
0x12f0   :  { %v10914_v44 = vpop.eup %10913  ;;  %10923 = vrcp.f32 %v6528_v3  ;;  %v6617_v45 = vadd.f32 1.0, %v10912_v22 }
0x12f1   :  { %10925 = vrcp.f32 %v6529_v43  ;;  %v6618_v55 = vadd.f32 1.0, %v10914_v44 }
0x12f2   :  { %10927 = vrcp.f32 %v6617_v45 }
0x12f3   :  { %10929 = vrcp.f32 %v6618_v55  ;;  %v10916_v46 = vpop.eup %10915 }
0x12f4   :  { %v10918_v56 = vpop.eup %10917 }
0x12f5   :  { %v10920_v58 = vpop.eup %10919 }
0x12f6   :  { %v10922_v59 = vpop.eup %10921  ;;  %v6785_v0 = vadd.f32 1.0, %v10920_v58 }
0x12f7   :  { %v6786_v16 = vadd.f32 1.0, %v10922_v59 }
0x12f8   :  { %10931 = vrcp.f32 %v6785_v0 }
0x12f9   :  { %10933 = vrcp.f32 %v6786_v16 }
0x12fa   :  { %v10924_v20 = vpop.eup %10923 }
0x12fb   :  { %v10926_v60 = vpop.eup %10925  ;;  %v6799_v49 = vmul.f32 %v10924_v20, %v10916_v46 }
0x12fc   :  { %v10928_v34 = vpop.eup %10927  ;;  %v6800_v10 = vmul.f32 %v10926_v60, %v10918_v56 }
0x12fd   :  { %v10930_v14 = vpop.eup %10929  ;;  %v6797_v62 = vmul.f32 %v10928_v34, %v6793_v61 }
0x12fe   :  { %v6798_v17 = vmul.f32 %v10930_v14, %v6794_v42 }
0x12ff   :  { %v12228_v50 = vadd.f32 %v6799_v49, %v6797_v62 }
0x1300   :  { %v12230_v51 = vadd.f32 %v6800_v10, %v6798_v17 }
0x1301   :  { %10935 = vtanh.f32 %v12228_v50 }
0x1302   :  { %10937 = vtanh.f32 %v12230_v51  ;;  %v10932_v37 = vpop.eup %10931 }
0x1303   :  { %v10934_v29 = vpop.eup %10933 }
0x130b   :  { %v10936_v30 = vpop.eup %10935 }
0x130c   :  { %v10938_v48 = vpop.eup %10937  ;;  %v6805_v41 = vmul.f32 %v10936_v30, %v10932_v37 }
0x130d   :  { %v6806_v47 = vmul.f32 %v10938_v48, %v10934_v29 }
0x130e   :  { %6807 = vst.msk [vmem:[#allocation2] sm:$0x8] %vm3477_vm8, %v6805_v41  ;;  %v6811_v31 = vrot.slane %v6805_v41, 3 }
0x130f   :  { %6808 = vst.msk [vmem:[#allocation2 + $0x8] sm:$0x8] %vm3477_vm8, %v6806_v47  ;;  %v6812_v5 = vrot.slane %v6806_v47, 2 }
0x1311   :  { %v6813_v6 = vsel %vm2372_vm5, %v6812_v5, %v6811_v31 }
0x1312   :  { %9835 = vmatmul.mubr.msk.f32.vlgmr.msra.gmra.mrb[74].mxu0 %vm71_vm0, %v6813_v6  ;;  %9846 = vmatmul.mubr.msk.f32.vlgmr.msra.gmra.mrb[74].mxu1 %vm71_vm0, %v6813_v6 }
0x1313   :  { %10432 = vmatpush3.bf16.msra.mxu0 %v12013_v25  ;;  %10438 = vmatpush3.bf16.msra.mxu1 %v12015_v32 }
0x1314   :  { %10433 = vmatprep.subr.bf16.mxu0 %v11120_v1  ;;  %10439 = vmatprep.subr.bf16.mxu1 %v11120_v1 }
0x1315   :  { %9856 = vmatprep.mubr.msk.f32.mxu0 %vm11119_vm1, %v11118_v15  ;;  %9867 = vmatprep.mubr.msk.f32.mxu1 %vm11119_vm1, %v11118_v15 }
0x1317   :  { %10435 = vmatpush3.bf16.msra.mxu0 %v12023_v27  ;;  %10441 = vmatpush3.bf16.msra.mxu1 %v12025_v19 }
0x1318   :  { %10442 = vmatprep.subr.bf16.mxu0 %v11120_v1  ;;  %10448 = vmatprep.subr.bf16.mxu1 %v11120_v1 }
0x131a   :  { %9857 = vmatmul.mubr.msk.f32.vlgmr.msra.gmra.mrb[76].mxu0 %vm71_vm0, %v6813_v6  ;;  %9868 = vmatmul.mubr.msk.f32.vlgmr.msra.gmra.mrb[76].mxu1 %vm71_vm0, %v6813_v6 }
0x131b   :  { %10444 = vmatpush3.bf16.msra.mxu0 %v11991_v63  ;;  %10450 = vmatpush3.bf16.msra.mxu1 %v11993_v12 }
0x131c   :  { %10445 = vmatprep.subr.bf16.mxu0 %v11120_v1  ;;  %10451 = vmatprep.subr.bf16.mxu1 %v11120_v1 }
0x131d   :  { %9878 = vmatprep.mubr.msk.f32.mxu0 %vm11119_vm1, %v11118_v15  ;;  %9889 = vmatprep.mubr.msk.f32.mxu1 %vm11119_vm1, %v11118_v15 }
0x131f   :  { %10447 = vmatpush3.bf16.msra.mxu0 %v12001_v23  ;;  %10453 = vmatpush3.bf16.msra.mxu1 %v12003_v24 }
0x1320   :  { %10454 = vmatprep.subr.bf16.mxu0 %v11120_v1  ;;  %10460 = vmatprep.subr.bf16.mxu1 %v11120_v1 }
0x13e5   :  { %v6882_v7 = vpop.f32.mrb[74].mxu0  ;;  %v6971_v26 = vpop.f32.mrb[74].mxu1 }
0x13e6   :  { %v6887_v28 = vrot.slane %v6882_v7, 4  ;;  %v6888_v2 = vrot.slane %v6882_v7, 5  ;;  %v6976_v52 = vrot.slane %v6971_v26, 4  ;;  %v6977_v54 = vrot.slane %v6971_v26, 5  ;;  %v9836_v57 = vpop.f32.mrb[75].mxu0  ;;  %v9847_v53 = vpop.f32.mrb[75].mxu1 }
0x13e7   :  { %v7165_v57 = vrot.slane %v12230_v51, 7 }
0x13e8   :  { %v6891_v11 = vadd.f32 %v6887_v28, %v12057_v18  ;;  %v6892_v13 = vadd.f32 %v6888_v2, %v12061_v38  ;;  %v6980_v35 = vadd.f32 %v6976_v52, %v12059_v21  ;;  %v6981_v3 = vadd.f32 %v6977_v54, %v12063_v36 }
0x13e9   :  { %v7164_v28 = vrot.slane %v12228_v50, 7 }
0x13ea   :  { %v8595_v22 = vmul.f32 -1.442695, %v6891_v11  ;;  %v8596_v43 = vmul.f32 -1.442695, %v6892_v13  ;;  %v8598_v44 = vmul.f32 -1.442695, %v6980_v35 }
0x13eb   :  { %v8599_v45 = vmul.f32 -1.442695, %v6981_v3 }
0x13ec   :  { %10939 = vpow2.f32 %v8595_v22 }
0x13ed   :  { %10941 = vpow2.f32 %v8596_v43  ;;  %v7060_v55 = vpop.f32.mrb[76].mxu0  ;;  %v7139_v46 = vpop.f32.mrb[76].mxu1 }
0x13ee   :  { %10943 = vpow2.f32 %v8598_v44  ;;  %v7065_v56 = vrot.slane %v7060_v55, 4  ;;  %v7066_v58 = vrot.slane %v7060_v55, 5  ;;  %v7144_v59 = vrot.slane %v7139_v46, 4  ;;  %v9858_v20 = vpop.f32.mrb[77].mxu0  ;;  %v9869_v60 = vpop.f32.mrb[77].mxu1 }
0x13ef   :  { %10945 = vpow2.f32 %v8599_v45  ;;  %v7145_v61 = vrot.slane %v7139_v46, 5 }
0x13f0   :  { %v7148_v49 = vadd.f32 %v7144_v59, %v12075_v4  ;;  %v7069_v0 = vadd.f32 %v7065_v56, %v12079_v33  ;;  %v7070_v42 = vadd.f32 %v7066_v58, %v12077_v8 }
0x13f1   :  { %v7149_v34 = vadd.f32 %v7145_v61, %v12081_v9 }
0x13f2   :  { %v8602_v10 = vmul.f32 -1.442695, %v7148_v49  ;;  %10947 = vtanh.f32 %v7069_v0 }
0x13f3   :  { %v8603_v16 = vmul.f32 -1.442695, %v7149_v34  ;;  %10949 = vtanh.f32 %v7070_v42 }
0x13f4   :  { %10951 = vpow2.f32 %v8602_v10 }
0x13f5   :  { %10953 = vpow2.f32 %v8603_v16 }
0x13f6   :  { %v10940_v14 = vpop.eup %10939 }
0x13f7   :  { %v10942_v62 = vpop.eup %10941  ;;  %v6899_v17 = vadd.f32 1.0, %v10940_v14 }
0x13f8   :  { %v10944_v37 = vpop.eup %10943  ;;  %v6900_v29 = vadd.f32 1.0, %v10942_v62 }
0x13f9   :  { %v10946_v30 = vpop.eup %10945  ;;  %10955 = vrcp.f32 %v6899_v17  ;;  %v6988_v48 = vadd.f32 1.0, %v10944_v37 }
0x13fa   :  { %10957 = vrcp.f32 %v6900_v29  ;;  %v6989_v41 = vadd.f32 1.0, %v10946_v30 }
0x13fb   :  { %10959 = vrcp.f32 %v6988_v48 }
0x13fc   :  { %10961 = vrcp.f32 %v6989_v41  ;;  %v10948_v47 = vpop.eup %10947 }
0x13fd   :  { %v10950_v31 = vpop.eup %10949 }
0x13fe   :  { %v10952_v5 = vpop.eup %10951 }
0x13ff   :  { %v10954_v6 = vpop.eup %10953  ;;  %v7156_v52 = vadd.f32 1.0, %v10952_v5 }
0x1400   :  { %v7157_v11 = vadd.f32 1.0, %v10954_v6 }
0x1401   :  { %10963 = vrcp.f32 %v7156_v52 }
0x1402   :  { %10965 = vrcp.f32 %v7157_v11 }
0x1403   :  { %v10956_v7 = vpop.eup %10955 }
0x1404   :  { %v10958_v26 = vpop.eup %10957  ;;  %v7170_v2 = vmul.f32 %v10956_v7, %v10948_v47 }
0x1405   :  { %v10960_v54 = vpop.eup %10959  ;;  %v7171_v53 = vmul.f32 %v10958_v26, %v10950_v31 }
0x1406   :  { %v10962_v13 = vpop.eup %10961  ;;  %v7168_v35 = vmul.f32 %v10960_v54, %v7164_v28 }
0x1407   :  { %v7169_v3 = vmul.f32 %v10962_v13, %v7165_v57 }
0x1408   :  { %v12275_v22 = vadd.f32 %v7170_v2, %v7168_v35 }
0x1409   :  { %v12277_v43 = vadd.f32 %v7171_v53, %v7169_v3 }
0x140a   :  { %10967 = vtanh.f32 %v12275_v22 }
0x140b   :  { %10969 = vtanh.f32 %v12277_v43  ;;  %v10964_v50 = vpop.eup %10963 }
0x140c   :  { %v10966_v44 = vpop.eup %10965 }
0x1414   :  { %v10968_v45 = vpop.eup %10967 }
0x1415   :  { %v10970_v55 = vpop.eup %10969  ;;  %v7176_v51 = vmul.f32 %v10968_v45, %v10964_v50 }
0x1416   :  { %v7177_v46 = vmul.f32 %v10970_v55, %v10966_v44 }
0x1417   :  { %7178 = vst.msk [vmem:[#allocation2] sm:$0x10] %vm3849_vm9, %v7176_v51  ;;  %v7182_v56 = vrot.slane %v7176_v51, 4 }
0x1418   :  { %7179 = vst.msk [vmem:[#allocation2 + $0x8] sm:$0x10] %vm3849_vm9, %v7177_v46  ;;  %v7183_v58 = vrot.slane %v7177_v46, 3 }
0x141a   :  { %v7184_v59 = vsel %vm2372_vm5, %v7183_v58, %v7182_v56 }
0x141b   :  { %9879 = vmatmul.mubr.msk.f32.vlgmr.msra.gmra.mrb[78].mxu0 %vm71_vm0, %v7184_v59  ;;  %9890 = vmatmul.mubr.msk.f32.vlgmr.msra.gmra.mrb[78].mxu1 %vm71_vm0, %v7184_v59 }
0x141c   :  { %10456 = vmatpush3.bf16.msra.mxu0 %v12013_v25  ;;  %10462 = vmatpush3.bf16.msra.mxu1 %v12015_v32 }
0x141d   :  { %10457 = vmatprep.subr.bf16.mxu0 %v11120_v1  ;;  %10463 = vmatprep.subr.bf16.mxu1 %v11120_v1 }
0x141e   :  { %9900 = vmatprep.mubr.msk.f32.mxu0 %vm11119_vm1, %v11118_v15  ;;  %9911 = vmatprep.mubr.msk.f32.mxu1 %vm11119_vm1, %v11118_v15 }
0x1420   :  { %10459 = vmatpush3.bf16.msra.mxu0 %v12023_v27  ;;  %10465 = vmatpush3.bf16.msra.mxu1 %v12025_v19 }
0x1421   :  { %10466 = vmatprep.subr.bf16.mxu0 %v11120_v1  ;;  %10472 = vmatprep.subr.bf16.mxu1 %v11120_v1 }
0x1423   :  { %9901 = vmatmul.mubr.msk.f32.vlgmr.msra.gmra.mrb[80].mxu0 %vm71_vm0, %v7184_v59  ;;  %9912 = vmatmul.mubr.msk.f32.vlgmr.msra.gmra.mrb[80].mxu1 %vm71_vm0, %v7184_v59 }
0x1424   :  { %10468 = vmatpush3.bf16.msra.mxu0 %v11991_v63  ;;  %10474 = vmatpush3.bf16.msra.mxu1 %v11993_v12 }
0x1425   :  { %10469 = vmatprep.subr.bf16.mxu0 %v11120_v1  ;;  %10475 = vmatprep.subr.bf16.mxu1 %v11120_v1 }
0x1426   :  { %9922 = vmatprep.mubr.msk.f32.mxu0 %vm11119_vm1, %v11118_v15  ;;  %9933 = vmatprep.mubr.msk.f32.mxu1 %vm11119_vm1, %v11118_v15 }
0x1428   :  { %10471 = vmatpush3.bf16.msra.mxu0 %v12001_v23  ;;  %10477 = vmatpush3.bf16.msra.mxu1 %v12003_v24 }
0x1429   :  { %10478 = vmatprep.subr.bf16.mxu0 %v11120_v1  ;;  %10484 = vmatprep.subr.bf16.mxu1 %v11120_v1 }
0x14ee   :  { %v7253_v20 = vpop.f32.mrb[78].mxu0  ;;  %v7342_v60 = vpop.f32.mrb[78].mxu1 }
0x14ef   :  { %v7258_v61 = vrot.slane %v7253_v20, 3  ;;  %v7259_v49 = vrot.slane %v7253_v20, 4  ;;  %v7347_v0 = vrot.slane %v7342_v60, 3  ;;  %v7348_v34 = vrot.slane %v7342_v60, 4  ;;  %v9880_v42 = vpop.f32.mrb[79].mxu0  ;;  %v9891_v10 = vpop.f32.mrb[79].mxu1 }
0x14f0   :  { %v7536_v42 = vrot.slane %v12277_v43, 7 }
0x14f1   :  { %v7262_v16 = vadd.f32 %v7258_v61, %v12057_v18  ;;  %v7263_v14 = vadd.f32 %v7259_v49, %v12061_v38  ;;  %v7351_v62 = vadd.f32 %v7347_v0, %v12059_v21  ;;  %v7352_v17 = vadd.f32 %v7348_v34, %v12063_v36 }
0x14f2   :  { %v7535_v61 = vrot.slane %v12275_v22, 7 }
0x14f3   :  { %v8605_v37 = vmul.f32 -1.442695, %v7262_v16  ;;  %v8606_v29 = vmul.f32 -1.442695, %v7263_v14  ;;  %v8608_v30 = vmul.f32 -1.442695, %v7351_v62 }
0x14f4   :  { %v8609_v48 = vmul.f32 -1.442695, %v7352_v17 }
0x14f5   :  { %10971 = vpow2.f32 %v8605_v37 }
0x14f6   :  { %10973 = vpow2.f32 %v8606_v29  ;;  %v7431_v41 = vpop.f32.mrb[80].mxu0  ;;  %v7510_v47 = vpop.f32.mrb[80].mxu1 }
0x14f7   :  { %10975 = vpow2.f32 %v8608_v30  ;;  %v7436_v31 = vrot.slane %v7431_v41, 3  ;;  %v7437_v5 = vrot.slane %v7431_v41, 4  ;;  %v7515_v6 = vrot.slane %v7510_v47, 3  ;;  %v9902_v7 = vpop.f32.mrb[81].mxu0  ;;  %v9913_v26 = vpop.f32.mrb[81].mxu1 }
0x14f8   :  { %10977 = vpow2.f32 %v8609_v48  ;;  %v7516_v28 = vrot.slane %v7510_v47, 4 }
0x14f9   :  { %v7519_v2 = vadd.f32 %v7515_v6, %v12075_v4  ;;  %v7440_v52 = vadd.f32 %v7436_v31, %v12079_v33  ;;  %v7441_v57 = vadd.f32 %v7437_v5, %v12077_v8 }
0x14fa   :  { %v7520_v54 = vadd.f32 %v7516_v28, %v12081_v9 }
0x14fb   :  { %v8612_v53 = vmul.f32 -1.442695, %v7519_v2  ;;  %10979 = vtanh.f32 %v7440_v52 }
0x14fc   :  { %v8613_v11 = vmul.f32 -1.442695, %v7520_v54  ;;  %10981 = vtanh.f32 %v7441_v57 }
0x14fd   :  { %10983 = vpow2.f32 %v8612_v53 }
0x14fe   :  { %10985 = vpow2.f32 %v8613_v11 }
0x14ff   :  { %v10972_v13 = vpop.eup %10971 }
0x1500   :  { %v10974_v35 = vpop.eup %10973  ;;  %v7270_v3 = vadd.f32 1.0, %v10972_v13 }
0x1501   :  { %v10976_v50 = vpop.eup %10975  ;;  %v7271_v44 = vadd.f32 1.0, %v10974_v35 }
0x1502   :  { %v10978_v45 = vpop.eup %10977  ;;  %10987 = vrcp.f32 %v7270_v3  ;;  %v7359_v55 = vadd.f32 1.0, %v10976_v50 }
0x1503   :  { %10989 = vrcp.f32 %v7271_v44  ;;  %v7360_v51 = vadd.f32 1.0, %v10978_v45 }
0x1504   :  { %10991 = vrcp.f32 %v7359_v55 }
0x1505   :  { %10993 = vrcp.f32 %v7360_v51  ;;  %v10980_v46 = vpop.eup %10979 }
0x1506   :  { %v10982_v56 = vpop.eup %10981 }
0x1507   :  { %v10984_v58 = vpop.eup %10983 }
0x1508   :  { %v10986_v59 = vpop.eup %10985  ;;  %v7527_v0 = vadd.f32 1.0, %v10984_v58 }
0x1509   :  { %v7528_v16 = vadd.f32 1.0, %v10986_v59 }
0x150a   :  { %10995 = vrcp.f32 %v7527_v0 }
0x150b   :  { %10997 = vrcp.f32 %v7528_v16 }
0x150c   :  { %v10988_v20 = vpop.eup %10987 }
0x150d   :  { %v10990_v60 = vpop.eup %10989  ;;  %v7541_v49 = vmul.f32 %v10988_v20, %v10980_v46 }
0x150e   :  { %v10992_v34 = vpop.eup %10991  ;;  %v7542_v10 = vmul.f32 %v10990_v60, %v10982_v56 }
0x150f   :  { %v10994_v14 = vpop.eup %10993  ;;  %v7539_v62 = vmul.f32 %v10992_v34, %v7535_v61 }
0x1510   :  { %v7540_v17 = vmul.f32 %v10994_v14, %v7536_v42 }
0x1511   :  { %v12322_v37 = vadd.f32 %v7541_v49, %v7539_v62 }
0x1512   :  { %v12324_v29 = vadd.f32 %v7542_v10, %v7540_v17 }
0x1513   :  { %10999 = vtanh.f32 %v12322_v37 }
0x1514   :  { %11001 = vtanh.f32 %v12324_v29  ;;  %v10996_v22 = vpop.eup %10995 }
0x1515   :  { %v10998_v30 = vpop.eup %10997 }
0x151d   :  { %v11000_v48 = vpop.eup %10999 }
0x151e   :  { %v11002_v41 = vpop.eup %11001  ;;  %v7547_v43 = vmul.f32 %v11000_v48, %v10996_v22 }
0x151f   :  { %v7548_v47 = vmul.f32 %v11002_v41, %v10998_v30 }
0x1520   :  { %7549 = vst.msk [vmem:[#allocation2] sm:$0x20] %vm4221_vm10, %v7547_v43  ;;  %v7553_v31 = vrot.slane %v7547_v43, 5 }
0x1521   :  { %7550 = vst.msk [vmem:[#allocation2 + $0x8] sm:$0x20] %vm4221_vm10, %v7548_v47  ;;  %v7554_v5 = vrot.slane %v7548_v47, 4 }
0x1523   :  { %v7555_v6 = vsel %vm2372_vm5, %v7554_v5, %v7553_v31  ;;  %v7906_v5 = vrot.slane %v12322_v37, 7 }
0x1524   :  { %9923 = vmatmul.mubr.msk.f32.vlgmr.msra.gmra.mrb[82].mxu0 %vm71_vm0, %v7555_v6  ;;  %9934 = vmatmul.mubr.msk.f32.vlgmr.msra.gmra.mrb[82].mxu1 %vm71_vm0, %v7555_v6 }
0x1525   :  { %10480 = vmatpush3.bf16.msra.mxu0 %v12013_v25  ;;  %10486 = vmatpush3.bf16.msra.mxu1 %v12015_v32 }
0x1526   :  { %10481 = vmatprep.subr.bf16.mxu0 %v11120_v1  ;;  %10487 = vmatprep.subr.bf16.mxu1 %v11120_v1 }
0x1527   :  { %9944 = vmatprep.mubr.msk.f32.mxu0 %vm11119_vm1, %v11118_v15  ;;  %9955 = vmatprep.mubr.msk.f32.mxu1 %vm11119_vm1, %v11118_v15 }
0x1529   :  { %10483 = vmatpush3.bf16.msra.mxu0 %v12023_v27  ;;  %10489 = vmatpush3.bf16.msra.mxu1 %v12025_v19 }
0x152a   :  { %10490 = vmatprep.subr.bf16.mxu0 %v11120_v1  ;;  %10496 = vmatprep.subr.bf16.mxu1 %v11120_v1 }
0x152c   :  { %9945 = vmatmul.mubr.msk.f32.vlgmr.msra.gmra.mrb[84].mxu0 %vm71_vm0, %v7555_v6  ;;  %9956 = vmatmul.mubr.msk.f32.vlgmr.msra.gmra.mrb[84].mxu1 %vm71_vm0, %v7555_v6 }
0x152d   :  { %10492 = vmatpush3.bf16.msra.mxu0 %v11991_v63  ;;  %10498 = vmatpush3.bf16.msra.mxu1 %v11993_v12 }
0x152e   :  { %10493 = vmatprep.subr.bf16.mxu0 %v11120_v1  ;;  %10499 = vmatprep.subr.bf16.mxu1 %v11120_v1 }
0x152f   :  { %9966 = vmatprep.mubr.msk.f32.mxu0 %vm11119_vm1, %v11118_v15  ;;  %9977 = vmatprep.mubr.msk.f32.mxu1 %vm11119_vm1, %v11118_v15 }
0x1531   :  { %10495 = vmatpush3.bf16.msra.mxu0 %v12001_v23  ;;  %10501 = vmatpush3.bf16.msra.mxu1 %v12003_v24 }
0x1532   :  { %10502 = vmatprep.subr.bf16.mxu0 %v11120_v1  ;;  %10508 = vmatprep.subr.bf16.mxu1 %v11120_v1 }
0x15f7   :  { %v7624_v63 = vpop.f32.mrb[82].mxu0  ;;  %v7713_v12 = vpop.f32.mrb[82].mxu1 }
0x15f8   :  { %v7629_v7 = vrot.slane %v7624_v63, 2  ;;  %v7630_v26 = vrot.slane %v7624_v63, 3  ;;  %v7718_v28 = vrot.slane %v7713_v12, 2  ;;  %v7719_v2 = vrot.slane %v7713_v12, 3  ;;  %v9924_v52 = vpop.f32.mrb[83].mxu0  ;;  %v9935_v54 = vpop.f32.mrb[83].mxu1 }
0x15fa   :  { %v7633_v57 = vadd.f32 %v7629_v7, %v12057_v18  ;;  %v7634_v53 = vadd.f32 %v7630_v26, %v12061_v38  ;;  %v7722_v23 = vadd.f32 %v7718_v28, %v12059_v21  ;;  %v7723_v24 = vadd.f32 %v7719_v2, %v12063_v36 }
0x15fb   :  { %v7907_v7 = vrot.slane %v12324_v29, 7 }
0x15fc   :  { %v8615_v11 = vmul.f32 -1.442695, %v7633_v57  ;;  %v8616_v13 = vmul.f32 -1.442695, %v7634_v53  ;;  %v8618_v35 = vmul.f32 -1.442695, %v7722_v23 }
0x15fd   :  { %v8619_v3 = vmul.f32 -1.442695, %v7723_v24 }
0x15fe   :  { %11003 = vpow2.f32 %v8615_v11 }
0x15ff   :  { %11005 = vpow2.f32 %v8616_v13  ;;  %v7802_v50 = vpop.f32.mrb[84].mxu0  ;;  %v7881_v44 = vpop.f32.mrb[84].mxu1 }
0x1600   :  { %11007 = vpow2.f32 %v8618_v35  ;;  %v7807_v45 = vrot.slane %v7802_v50, 2  ;;  %v7808_v55 = vrot.slane %v7802_v50, 3  ;;  %v7886_v51 = vrot.slane %v7881_v44, 2  ;;  %v9946_v46 = vpop.f32.mrb[85].mxu0  ;;  %v9957_v56 = vpop.f32.mrb[85].mxu1 }
0x1601   :  { %11009 = vpow2.f32 %v8619_v3  ;;  %v7887_v58 = vrot.slane %v7881_v44, 3 }
0x1602   :  { %v7890_v59 = vadd.f32 %v7886_v51, %v12075_v4  ;;  %v7811_v20 = vadd.f32 %v7807_v45, %v12079_v33  ;;  %v7812_v61 = vadd.f32 %v7808_v55, %v12077_v8 }
0x1603   :  { %v7891_v60 = vadd.f32 %v7887_v58, %v12081_v9 }
0x1604   :  { %v8622_v49 = vmul.f32 -1.442695, %v7890_v59  ;;  %11011 = vtanh.f32 %v7811_v20 }
0x1605   :  { %v8623_v0 = vmul.f32 -1.442695, %v7891_v60  ;;  %11013 = vtanh.f32 %v7812_v61 }
0x1606   :  { %11015 = vpow2.f32 %v8622_v49 }
0x1607   :  { %11017 = vpow2.f32 %v8623_v0 }
0x1608   :  { %v11004_v34 = vpop.eup %11003 }
0x1609   :  { %v11006_v42 = vpop.eup %11005  ;;  %v7641_v10 = vadd.f32 1.0, %v11004_v34 }
0x160a   :  { %v11008_v16 = vpop.eup %11007  ;;  %v7642_v14 = vadd.f32 1.0, %v11006_v42 }
0x160b   :  { %v11010_v62 = vpop.eup %11009  ;;  %11019 = vrcp.f32 %v7641_v10  ;;  %v7730_v17 = vadd.f32 1.0, %v11008_v16 }
0x160c   :  { %11021 = vrcp.f32 %v7642_v14  ;;  %v7731_v22 = vadd.f32 1.0, %v11010_v62 }
0x160d   :  { %11023 = vrcp.f32 %v7730_v17 }
0x160e   :  { %11025 = vrcp.f32 %v7731_v22  ;;  %v11012_v30 = vpop.eup %11011 }
0x160f   :  { %v11014_v48 = vpop.eup %11013 }
0x1610   :  { %v11016_v41 = vpop.eup %11015 }
0x1611   :  { %v11018_v43 = vpop.eup %11017  ;;  %v7898_v63 = vadd.f32 1.0, %v11016_v41 }
0x1612   :  { %v7899_v28 = vadd.f32 1.0, %v11018_v43 }
0x1613   :  { %11027 = vrcp.f32 %v7898_v63 }
0x1614   :  { %11029 = vrcp.f32 %v7899_v28 }
0x1615   :  { %v11020_v47 = vpop.eup %11019 }
0x1616   :  { %v11022_v31 = vpop.eup %11021  ;;  %v7912_v6 = vmul.f32 %v11020_v47, %v11012_v30 }
0x1617   :  { %v11024_v12 = vpop.eup %11023  ;;  %v7913_v26 = vmul.f32 %v11022_v31, %v11014_v48 }
0x1618   :  { %v11026_v2 = vpop.eup %11025  ;;  %v7910_v52 = vmul.f32 %v11024_v12, %v7906_v5 }
0x1619   :  { %v7911_v54 = vmul.f32 %v11026_v2, %v7907_v7 }
0x161a   :  { %v12369_v57 = vadd.f32 %v7912_v6, %v7910_v52 }
0x161b   :  { %v12371_v53 = vadd.f32 %v7913_v26, %v7911_v54 }
0x161c   :  { %11031 = vtanh.f32 %v12369_v57  ;;  %v8277_v7 = vrot.slane %v12369_v57, 7 }
0x161d   :  { %11033 = vtanh.f32 %v12371_v53  ;;  %v11028_v37 = vpop.eup %11027  ;;  %v8278_v52 = vrot.slane %v12371_v53, 7  ;;  %v8634_v53 = vld [vmem:[%s12432_s8] ss:$0 sm:$0xff]  ;;  %s11122_s8 = smov [#allocation7]  }
0x161e   :  { %v11030_v23 = vpop.eup %11029  ;;  %s8342_s19 = sshll.u32 %s11122_s8, 4  ;;  %s8343_s19 = int_to_ptr.vmem [resolvable:$true] %s8342_s19 }
0x161f   :  { %s11089_s3 = scalar_lea.vmem %s8343_s19, 32  ;;  %p11094_p9 = scmp.lt.s32.totalorder %s8343_s19, %s8343_s19 }
0x1620   :  { %p11090_p8 = scmp.ne.s32.totalorder %s8343_s19, %s11089_s3  ;;  %p11095_p10 = scmp.lt.s32.totalorder %s11089_s3, %s11089_s3 }
0x1622   :  { %p11096_p11 = por %p11095_p10, %p11094_p9 }
0x1624   :  { %p11097_p12 = pnand %p11096_p11, %p11090_p8 }
0x1626   :  { %v11032_v24 = vpop.eup %11031 }
0x1627   :  { %v11034_v11 = vpop.eup %11033  ;;  %v7918_v29 = vmul.f32 %v11032_v24, %v11028_v37 }
0x1628   :  { %v7919_v13 = vmul.f32 %v11034_v11, %v11030_v23 }
0x1629   :  { %7920 = vst.msk [vmem:[#allocation2] sm:$0x40] %vm4593_vm11, %v7918_v29  ;;  %v7924_v35 = vrot.slane %v7918_v29, 6 }
0x162a   :  { %7921 = vst.msk [vmem:[#allocation2 + $0x8] sm:$0x40] %vm4593_vm11, %v7919_v13  ;;  %v7925_v3 = vrot.slane %v7919_v13, 5 }
0x162c   :  { %v7926_v50 = vsel %vm2372_vm5, %v7925_v3, %v7924_v35 }
0x162d   :  { %9967 = vmatmul.mubr.msk.f32.vlgmr.msra.gmra.mrb[86].mxu0 %vm71_vm0, %v7926_v50  ;;  %9978 = vmatmul.mubr.msk.f32.vlgmr.msra.gmra.mrb[86].mxu1 %vm71_vm0, %v7926_v50 }
0x162e   :  { %10504 = vmatpush3.bf16.msra.mxu0 %v12013_v25  ;;  %10510 = vmatpush3.bf16.msra.mxu1 %v12015_v32  ;;  %v11121_v25 = vmov 0  }
0x162f   :  { %10505 = vmatprep.subr.bf16.mxu0 %v11120_v1  ;;  %10511 = vmatprep.subr.bf16.mxu1 %v11120_v1 }
0x1630   :  { %9988 = vmatprep.mubr.msk.f32.mxu0 %vm11119_vm1, %v11118_v15  ;;  %9999 = vmatprep.mubr.msk.f32.mxu1 %vm11119_vm1, %v11118_v15 }
0x1631   :  { %10522 = vset.pattern.permute.xlu0 %v11121_v25 }
0x1632   :  { %10507 = vmatpush3.bf16.msra.mxu0 %v12023_v27  ;;  %10513 = vmatpush3.bf16.msra.mxu1 %v12025_v19 }
0x1635   :  { %9989 = vmatmul.mubr.msk.f32.vlgmr.msra.gmra.mrb[88].mxu0 %vm71_vm0, %v7926_v50  ;;  %10000 = vmatmul.mubr.msk.f32.vlgmr.msra.gmra.mrb[88].mxu1 %vm71_vm0, %v7926_v50 }
0x1700   :  { %v7995_v32 = vpop.f32.mrb[86].mxu0  ;;  %v8084_v44 = vpop.f32.mrb[86].mxu1 }
0x1701   :  { %v8000_v45 = vrot.slane %v7995_v32, 1  ;;  %v8001_v1 = vrot.slane %v7995_v32, 2  ;;  %v8089_v55 = vrot.slane %v8084_v44, 1  ;;  %v8090_v51 = vrot.slane %v8084_v44, 2  ;;  %v9968_v46 = vpop.f32.mrb[87].mxu0  ;;  %v9979_v56 = vpop.f32.mrb[87].mxu1 }
0x1702   :  { %v8635_v56 = vld [vmem:[#allocation3] ss:$0 sm:$0xff] }
0x1703   :  { %v8004_v15 = vadd.f32 %v8000_v45, %v12057_v18  ;;  %v8005_v27 = vadd.f32 %v8001_v1, %v12061_v38  ;;  %v8093_v19 = vadd.f32 %v8089_v55, %v12059_v21  ;;  %v8094_v58 = vadd.f32 %v8090_v51, %v12063_v36 }
0x1705   :  { %v8625_v59 = vmul.f32 -1.442695, %v8004_v15  ;;  %v8626_v20 = vmul.f32 -1.442695, %v8005_v27  ;;  %v8628_v60 = vmul.f32 -1.442695, %v8093_v19  ;;  %v8326_v27 = vsub.s32 %v11291_v40, %v11289_v39 }
0x1706   :  { %v8629_v61 = vmul.f32 -1.442695, %v8094_v58 }
0x1707   :  { %11035 = vpow2.f32 %v8625_v59 }
0x1708   :  { %11037 = vpow2.f32 %v8626_v20  ;;  %v8173_v49 = vpop.f32.mrb[88].mxu0  ;;  %v8252_v0 = vpop.f32.mrb[88].mxu1 }
0x1709   :  { %11039 = vpow2.f32 %v8628_v60  ;;  %v8178_v34 = vrot.slane %v8173_v49, 1  ;;  %v8179_v42 = vrot.slane %v8173_v49, 2  ;;  %v8257_v10 = vrot.slane %v8252_v0, 1  ;;  %v9990_v16 = vpop.f32.mrb[89].mxu0  ;;  %v10001_v18 = vpop.f32.mrb[89].mxu1 }
0x170a   :  { %11041 = vpow2.f32 %v8629_v61  ;;  %v8258_v38 = vrot.slane %v8252_v0, 2 }
0x170b   :  { %v8261_v21 = vadd.f32 %v8257_v10, %v12075_v4  ;;  %v8182_v36 = vadd.f32 %v8178_v34, %v12079_v33  ;;  %v8183_v62 = vadd.f32 %v8179_v42, %v12077_v8 }
0x170c   :  { %v8262_v14 = vadd.f32 %v8258_v38, %v12081_v9 }
0x170d   :  { %v8632_v17 = vmul.f32 -1.442695, %v8261_v21  ;;  %11043 = vtanh.f32 %v8182_v36 }
0x170e   :  { %v8633_v22 = vmul.f32 -1.442695, %v8262_v14  ;;  %11045 = vtanh.f32 %v8183_v62 }
0x170f   :  { %11047 = vpow2.f32 %v8632_v17 }
0x1710   :  { %11049 = vpow2.f32 %v8633_v22 }
0x1711   :  { %v11036_v30 = vpop.eup %11035 }
0x1712   :  { %v11038_v48 = vpop.eup %11037  ;;  %v8012_v41 = vadd.f32 1.0, %v11036_v30 }
0x1713   :  { %v11040_v43 = vpop.eup %11039  ;;  %v8013_v47 = vadd.f32 1.0, %v11038_v48 }
0x1714   :  { %v11042_v31 = vpop.eup %11041  ;;  %11051 = vrcp.f32 %v8012_v41  ;;  %v8101_v4 = vadd.f32 1.0, %v11040_v43 }
0x1715   :  { %11053 = vrcp.f32 %v8013_v47  ;;  %v8102_v33 = vadd.f32 1.0, %v11042_v31 }
0x1716   :  { %11055 = vrcp.f32 %v8101_v4 }
0x1717   :  { %11057 = vrcp.f32 %v8102_v33  ;;  %v11044_v9 = vpop.eup %11043 }
0x1718   :  { %v11046_v8 = vpop.eup %11045 }
0x1719   :  { %v11048_v5 = vpop.eup %11047 }
0x171a   :  { %v11050_v6 = vpop.eup %11049  ;;  %v8269_v28 = vadd.f32 1.0, %v11048_v5 }
0x171b   :  { %v8270_v37 = vadd.f32 1.0, %v11050_v6 }
0x171c   :  { %11059 = vrcp.f32 %v8269_v28 }
0x171d   :  { %11061 = vrcp.f32 %v8270_v37 }
0x171e   :  { %v11052_v63 = vpop.eup %11051 }
0x171f   :  { %v11054_v12 = vpop.eup %11053  ;;  %v8283_v26 = vmul.f32 %v11052_v63, %v11044_v9 }
0x1720   :  { %v11056_v2 = vpop.eup %11055  ;;  %v8284_v54 = vmul.f32 %v11054_v12, %v11046_v8 }
0x1721   :  { %v11058_v23 = vpop.eup %11057  ;;  %v8281_v24 = vmul.f32 %v11056_v2, %v8277_v7 }
0x1722   :  { %v8282_v11 = vmul.f32 %v11058_v23, %v8278_v52 }
0x1723   :  { %v8285_v29 = vadd.f32 %v8283_v26, %v8281_v24 }
0x1724   :  { %v8286_v13 = vadd.f32 %v8284_v54, %v8282_v11 }
0x1725   :  { %11063 = vtanh.f32 %v8285_v29 }
0x1726   :  { %11065 = vtanh.f32 %v8286_v13  ;;  %v11060_v35 = vpop.eup %11059 }
0x1727   :  { %v11062_v3 = vpop.eup %11061 }
0x172f   :  { %v11064_v50 = vpop.eup %11063 }
0x1730   :  { %v11066_v57 = vpop.eup %11065  ;;  %v8289_v25 = vmul.f32 %v11064_v50, %v11060_v35 }
0x1731   :  { %v8290_v32 = vmul.f32 %v11066_v57, %v11062_v3 }
0x1732   :  { %8291 = vst.msk [vmem:[#allocation2] sm:$0x80] %vm4965_vm12, %v8289_v25 }
0x1733   :  { %8292 = vst.msk [vmem:[#allocation2 + $0x8] sm:$0x80] %vm4965_vm12, %v8290_v32 }
0x1739   :  { %v8293_v44 = vld [vmem:[#allocation2] sm:$0xff] }
0x173a   :  { %v8294_v45 = vld [vmem:[#allocation2 + $0x8] sm:$0xff]  ;;  %v8302_v1 = vmul.f32 %v8634_v53, %v8293_v44 }
0x173b   :  { %v8303_v55 = vmul.f32 %v8634_v53, %v8294_v45 }
0x173c   :  { %v8304_v51 = vsel %vm71_vm0, %v8302_v1, 0.0 }
0x173d   :  { %v8307_v46 = vsel %vm71_vm0, %v8303_v55, 0.0  ;;  %8305 = vadd.xlane.f32.xlu0 %v8304_v51 }
0x173e   :  { %8308 = vadd.xlane.f32.xlu1 %v8307_v46 }
0x1753   :  { %8317 = vperm.xlu0 %10522, %v8635_v56  }
0x17ca   :  { %v8306_v15 = vpop.xlane.xlu0 %8305 }
0x17cb   :  { %v8309_v19 = vpop.xlane.xlu1 %8308 }
0x17d2   :  { %v8318_v58 = vpop.permute.xlu0 %8317 }
0x17d3   :  { %v8320_v59 = vadd.f32 %v8318_v58, %v8306_v15  ;;  %v8321_v20 = vadd.f32 %v8318_v58, %v8309_v19 }
0x17d5   :  { %v8327_v60 = vrot.slane %v8320_v59, %v8326_v27  ;;  %v8331_v61 = vrot.slane %v8321_v20, %v8326_v27 }
0x17d7   :  { %v8332_v49 = vsel %vm2372_vm5, %v8331_v61, %v8327_v60 }
0x17d8   :  { %8335 = vst.msk [vmem:[#allocation7] sm:$0x3] %vm8334_vm13, %v8332_v49 }
0x17d9   :  { %11100 = shalt.err (!%p11097_p12)
}
0x17da   :  { %s11101_s21 = scalar_lea.hbm %s12434_s10, 32 }
0x17db   :  { %p11102_p13 = scmp.ne.s32.totalorder %s12434_s10, %s11101_s21  ;;  %p11105_p0 = scmp.lt.u32.totalorder %s11101_s21, %s12434_s10 }
0x17dd   :  { %p11107_p1 = pnand %p11105_p0, %p11102_p13 }
0x17df   :  { %11110 = shalt.err (!%p11107_p1)
}
0x17e0   :  { %8345 = dma.vmem_to_hbm [thread:$0]  %s8343_s19, 32, %s12434_s10, [#allocation6]  }
0x17e1   :  { %11113 = dma.done.wait [#allocation6], 32  }
0x17e2   :  { %11114 = vsyncadd [#allocation6], 4294967264 }
0x17e3   :  { %8349 = vsyncpa [#allocation5], 1 }
0x17e4   :  { %8350 = vsyncpa [#allocation6], 1 }

</bundles_post_ra>
